<compile_context>
chip_gen: v5e
topology: v5e:2x2
jax: 0.10.0
libtpu: 0.0.40
codegen_flags: <defaults>
</compile_context>

<pallas_src>
import functools
import math

import jax
import jax.numpy as jnp
from jax.experimental import pallas as pl
from jax.experimental.pallas import tpu as pltpu

# Small, shape-consistent stand-in for the BartConfig in the module.
CFG = dict(vocab=128, d_model=32, heads=4, ffn=64,
           enc_layers=2, dec_layers=2, max_pos=64, pad_id=1)
NEG_INF = -1e9
LN_EPS = 1e-5

_PARALLEL = pltpu.CompilerParams(dimension_semantics=("parallel",))


# ----------------------- in-kernel math (traced in Pallas bodies) ----------

def _layernorm(h, g, b):
    mu = jnp.mean(h, axis=-1, keepdims=True)
    var = jnp.mean(jnp.square(h - mu), axis=-1, keepdims=True)
    return (h - mu) * jax.lax.rsqrt(var + LN_EPS) * g + b


def _erf(x):
    # Abramowitz & Stegun 7.1.26, |err| < 1.5e-7 (only exp / VPU ops, so exact
    # GELU semantics stay in-kernel without relying on a lax.erf lowering).
    a1, a2, a3, a4, a5 = 0.254829592, -0.284496736, 1.421413741, -1.453152027, 1.061405429
    p = 0.3275911
    sgn = jnp.where(x >= 0.0, 1.0, -1.0)
    ax = jnp.abs(x)
    t = 1.0 / (1.0 + p * ax)
    poly = ((((a5 * t + a4) * t + a3) * t + a2) * t + a1) * t
    return sgn * (1.0 - poly * jnp.exp(-ax * ax))


def _gelu(x):
    return 0.5 * x * (1.0 + _erf(x * (1.0 / math.sqrt(2.0))))


def _softmax_rows(s):
    s = s - jnp.max(s, axis=-1, keepdims=True)
    p = jnp.exp(s)
    return p * pl.reciprocal(jnp.sum(p, axis=-1, keepdims=True), approx=True)


def _causal_bias(sq, sk):
    row = jax.lax.broadcasted_iota(jnp.int32, (sq, sk), 0)
    col = jax.lax.broadcasted_iota(jnp.int32, (sq, sk), 1)
    return jnp.where(row >= col, 0.0, NEG_INF)


def _attention(q, k, v, bias, wo, bo, heads):
    """Multi-head attention with fused output projection.

    q: (Sq, D), k/v: (Sk, D), bias: additive (Sq, Sk) or (1, Sk),
    wo: (D, D), bo: (1, D).  Accumulating ctx_h @ wo[rows_h] over heads equals
    concat(heads) @ wo without a lane-dim concatenate.
    """
    D = q.shape[-1]
    Dh = D // heads
    scale = Dh ** -0.5
    out = bo
    for h in range(heads):  # static unroll (H=4), all inside one kernel
        lo, hi = h * Dh, (h + 1) * Dh
        qh = q[:, lo:hi] * scale
        s = jax.lax.dot_general(qh, k[:, lo:hi], (((1,), (1,)), ((), ())),
                                preferred_element_type=jnp.float32)
        p = _softmax_rows(s + bias)
        ctx = jnp.dot(p, v[:, lo:hi], preferred_element_type=jnp.float32)
        out = out + jnp.dot(ctx, wo[lo:hi, :], preferred_element_type=jnp.float32)
    return out


# ----------------------------- Pallas kernels ------------------------------

def _encoder_kernel(tok_ref, pos_ref, embg_ref, embb_ref, pad_ref,
                    wqkv_ref, bqkv_ref, wo_ref, bo_ref, ln1g_ref, ln1b_ref,
                    w1_ref, b1_ref, w2_ref, b2_ref, ln2g_ref, ln2b_ref,
                    o_ref, *, heads, layers):
    # embedding add + layernorm_embedding
    x = _layernorm(tok_ref[0] + pos_ref[...], embg_ref[...], embb_ref[...])
    pad = pad_ref[0]                                    # (1, Se) additive bias
    D = x.shape[-1]
    for l in range(layers):                             # static unroll over layers
        qkv = jnp.dot(x, wqkv_ref[l], preferred_element_type=jnp.float32) + bqkv_ref[l]
        attn = _attention(qkv[:, :D], qkv[:, D:2 * D], qkv[:, 2 * D:],
                          pad, wo_ref[l], bo_ref[l], heads)
        h = _layernorm(x + attn, ln1g_ref[l], ln1b_ref[l])
        f = _gelu(jnp.dot(h, w1_ref[l], preferred_element_type=jnp.float32) + b1_ref[l])
        f = jnp.dot(f, w2_ref[l], preferred_element_type=jnp.float32) + b2_ref[l]
        x = _layernorm(h + f, ln2g_ref[l], ln2b_ref[l])
    o_ref[0] = x.astype(o_ref.dtype)


def _decoder_kernel(tok_ref, pos_ref, embg_ref, embb_ref, enc_ref, dpad_ref, epad_ref,
                    wqkv_ref, bqkv_ref, wo_ref, bo_ref, ln1g_ref, ln1b_ref,
                    cwq_ref, cbq_ref, cwkv_ref, cbkv_ref, cwo_ref, cbo_ref,
                    ln2g_ref, ln2b_ref,
                    w1_ref, b1_ref, w2_ref, b2_ref, ln3g_ref, ln3b_ref,
                    emb_ref, fbias_ref, o_ref, *, heads, layers):
    x = _layernorm(tok_ref[0] + pos_ref[...], embg_ref[...], embb_ref[...])
    enc = enc_ref[0]                                    # (Se, D) encoder output
    D = x.shape[-1]
    Sd = x.shape[0]
    self_bias = _causal_bias(Sd, Sd) + dpad_ref[0]      # built in-kernel (iota + pad row)
    cross_bias = epad_ref[0]                            # (1, Se)

    for l in range(layers):                             # static unroll over layers
        # masked causal self-attention
        qkv = jnp.dot(x, wqkv_ref[l], preferred_element_type=jnp.float32) + bqkv_ref[l]
        attn = _attention(qkv[:, :D], qkv[:, D:2 * D], qkv[:, 2 * D:],
                          self_bias, wo_ref[l], bo_ref[l], heads)
        h = _layernorm(x + attn, ln1g_ref[l], ln1b_ref[l])

        # cross-attention against encoder output (K/V fused into one matmul)
        q = jnp.dot(h, cwq_ref[l], preferred_element_type=jnp.float32) + cbq_ref[l]
        kv = jnp.dot(enc, cwkv_ref[l], preferred_element_type=jnp.float32) + cbkv_ref[l]
        cattn = _attention(q, kv[:, :D], kv[:, D:],
                           cross_bias, cwo_ref[l], cbo_ref[l], heads)
        h = _layernorm(h + cattn, ln2g_ref[l], ln2b_ref[l])

        # GELU FFN
        f = _gelu(jnp.dot(h, w1_ref[l], preferred_element_type=jnp.float32) + b1_ref[l])
        f = jnp.dot(f, w2_ref[l], preferred_element_type=jnp.float32) + b2_ref[l]
        x = _layernorm(h + f, ln3g_ref[l], ln3b_ref[l])

    # tied LM head: contract against shared embedding (V, D) on D (== y @ shared.T)
    logits = jax.lax.dot_general(x, emb_ref[...], (((1,), (1,)), ((), ())),
                                 preferred_element_type=jnp.float32)
    o_ref[0] = (logits + fbias_ref[...]).astype(o_ref.dtype)


# ----------------------------- pallas_call wrappers -------------------------

def _rep_spec(shape):
    """Full-array block replicated across the batch grid axis."""
    n = len(shape)
    return pl.BlockSpec(shape, lambda i, n=n: (0,) * n)


def pallas_bart_encoder(tok_emb, pos_emb, emb_g, emb_b, pad_bias, p):
    B, Se, D = tok_emb.shape
    L = p['wqkv'].shape[0]
    F = p['w1'].shape[2]
    kern = functools.partial(_encoder_kernel, heads=CFG['heads'], layers=L)
    return pl.pallas_call(
        kern,
        out_shape=jax.ShapeDtypeStruct((B, Se, D), jnp.float32),
        grid=(B,),
        in_specs=[pl.BlockSpec((1, Se, D), lambda i: (i, 0, 0)),
                  _rep_spec((Se, D)),
                  _rep_spec((1, D)), _rep_spec((1, D)),
                  pl.BlockSpec((1, 1, Se), lambda i: (i, 0, 0)),
                  _rep_spec((L, D, 3 * D)), _rep_spec((L, 1, 3 * D)),
                  _rep_spec((L, D, D)), _rep_spec((L, 1, D)),
                  _rep_spec((L, 1, D)), _rep_spec((L, 1, D)),
                  _rep_spec((L, D, F)), _rep_spec((L, 1, F)),
                  _rep_spec((L, F, D)), _rep_spec((L, 1, D)),
                  _rep_spec((L, 1, D)), _rep_spec((L, 1, D))],
        out_specs=pl.BlockSpec((1, Se, D), lambda i: (i, 0, 0)),
        compiler_params=_PARALLEL,
    )(tok_emb, pos_emb, emb_g, emb_b, pad_bias,
      p['wqkv'], p['bqkv'], p['wo'], p['bo'], p['ln1g'], p['ln1b'],
      p['w1'], p['b1'], p['w2'], p['b2'], p['ln2g'], p['ln2b'])


def pallas_bart_decoder(tok_emb, pos_emb, emb_g, emb_b, enc_out,
                        dec_pad, enc_pad, p, shared_emb, final_bias):
    B, Sd, D = tok_emb.shape
    Se = enc_out.shape[1]
    L = p['wqkv'].shape[0]
    F = p['w1'].shape[2]
    V = shared_emb.shape[0]
    kern = functools.partial(_decoder_kernel, heads=CFG['heads'], layers=L)
    return pl.pallas_call(
        kern,
        out_shape=jax.ShapeDtypeStruct((B, Sd, V), jnp.float32),
        grid=(B,),
        in_specs=[pl.BlockSpec((1, Sd, D), lambda i: (i, 0, 0)),
                  _rep_spec((Sd, D)),
                  _rep_spec((1, D)), _rep_spec((1, D)),
                  pl.BlockSpec((1, Se, D), lambda i: (i, 0, 0)),
                  pl.BlockSpec((1, 1, Sd), lambda i: (i, 0, 0)),
                  pl.BlockSpec((1, 1, Se), lambda i: (i, 0, 0)),
                  _rep_spec((L, D, 3 * D)), _rep_spec((L, 1, 3 * D)),
                  _rep_spec((L, D, D)), _rep_spec((L, 1, D)),
                  _rep_spec((L, 1, D)), _rep_spec((L, 1, D)),
                  _rep_spec((L, D, D)), _rep_spec((L, 1, D)),
                  _rep_spec((L, D, 2 * D)), _rep_spec((L, 1, 2 * D)),
                  _rep_spec((L, D, D)), _rep_spec((L, 1, D)),
                  _rep_spec((L, 1, D)), _rep_spec((L, 1, D)),
                  _rep_spec((L, D, F)), _rep_spec((L, 1, F)),
                  _rep_spec((L, F, D)), _rep_spec((L, 1, D)),
                  _rep_spec((L, 1, D)), _rep_spec((L, 1, D)),
                  _rep_spec((V, D)), _rep_spec((1, V))],
        out_specs=pl.BlockSpec((1, Sd, V), lambda i: (i, 0, 0)),
        compiler_params=_PARALLEL,
    )(tok_emb, pos_emb, emb_g, emb_b, enc_out, dec_pad, enc_pad,
      p['wqkv'], p['bqkv'], p['wo'], p['bo'], p['ln1g'], p['ln1b'],
      p['cwq'], p['cbq'], p['cwkv'], p['cbkv'], p['cwo'], p['cbo'],
      p['lncg'], p['lncb'],
      p['w1'], p['b1'], p['w2'], p['b2'], p['ln2g'], p['ln2b'],
      shared_emb, final_bias)


# ----------------------------- model glue ----------------------------------

@jax.jit
def bart_forward(params, input_ids, attention_mask,
                 decoder_input_ids, decoder_attention_mask):
    B, Se = input_ids.shape
    Sd = decoder_input_ids.shape[1]

    # Tiny per-batch additive pad rows (B, 1, S); full masks are built in-kernel.
    enc_pad = ((1.0 - attention_mask.astype(jnp.float32)) * NEG_INF).reshape(B, 1, Se)
    dec_pad = ((1.0 - decoder_attention_mask.astype(jnp.float32)) * NEG_INF).reshape(B, 1, Sd)

    # TODO(synk): data-dependent token-embedding row gather stays in XLA glue;
    # everything downstream runs inside the two fused Pallas kernels.
    enc_out = pallas_bart_encoder(
        params['shared'][input_ids],
        params['enc_pos'][2:2 + Se],                     # BART pos offset = 2
        params['enc_emb_ln_g'], params['enc_emb_ln_b'],
        enc_pad, params['enc'])

    logits = pallas_bart_decoder(
        params['shared'][decoder_input_ids],
        params['dec_pos'][2:2 + Sd],
        params['dec_emb_ln_g'], params['dec_emb_ln_b'],
        enc_out, dec_pad, enc_pad, params['dec'],
        params['shared'], params['final_logits_bias'])
    return logits


# ----------------------------- deterministic init ---------------------------

def init_params(key):
    D, V, F = CFG['d_model'], CFG['vocab'], CFG['ffn']
    Le, Ld = CFG['enc_layers'], CFG['dec_layers']
    keys = iter(jax.random.split(key, 64))

    def nrm(shape):
        return jax.random.normal(next(keys), shape, jnp.float32) * 0.02

    def enc_stack(L):
        return dict(wqkv=nrm((L, D, 3 * D)), bqkv=jnp.zeros((L, 1, 3 * D), jnp.float32),
                    wo=nrm((L, D, D)), bo=jnp.zeros((L, 1, D), jnp.float32),
                    ln1g=jnp.ones((L, 1, D), jnp.float32),
                    ln1b=jnp.zeros((L, 1, D), jnp.float32),
                    w1=nrm((L, D, F)), b1=jnp.zeros((L, 1, F), jnp.float32),
                    w2=nrm((L, F, D)), b2=jnp.zeros((L, 1, D), jnp.float32),
                    ln2g=jnp.ones((L, 1, D), jnp.float32),
                    ln2b=jnp.zeros((L, 1, D), jnp.float32))

    def dec_stack(L):
        d = enc_stack(L)
        d.update(cwq=nrm((L, D, D)), cbq=jnp.zeros((L, 1, D), jnp.float32),
                 cwkv=nrm((L, D, 2 * D)), cbkv=jnp.zeros((L, 1, 2 * D), jnp.float32),
                 cwo=nrm((L, D, D)), cbo=jnp.zeros((L, 1, D), jnp.float32),
                 lncg=jnp.ones((L, 1, D), jnp.float32),
                 lncb=jnp.zeros((L, 1, D), jnp.float32))
        return d

    return dict(
        shared=nrm((V, D)),
        enc_pos=nrm((CFG['max_pos'] + 2, D)),
        dec_pos=nrm((CFG['max_pos'] + 2, D)),
        enc_emb_ln_g=jnp.ones((1, D), jnp.float32),
        enc_emb_ln_b=jnp.zeros((1, D), jnp.float32),
        dec_emb_ln_g=jnp.ones((1, D), jnp.float32),
        dec_emb_ln_b=jnp.zeros((1, D), jnp.float32),
        enc=enc_stack(Le),
        dec=dec_stack(Ld),
        final_logits_bias=jnp.zeros((1, V), jnp.float32),
    )


# ----------------------------- main ----------------------------------------

if __name__ == "__main__":
    key = jax.random.PRNGKey(0)
    pkey, ikey, dkey = jax.random.split(key, 3)

    params = init_params(pkey)

    B, Se, Sd = 2, 8, 8
    input_ids = jax.random.randint(ikey, (B, Se), 3, CFG['vocab'], dtype=jnp.int32)
    attention_mask = jnp.ones((B, Se), jnp.int32)
    # pad the tail of the second sequence to exercise the padding mask
    input_ids = input_ids.at[1, 6:].set(CFG['pad_id'])
    attention_mask = attention_mask.at[1, 6:].set(0)

    decoder_input_ids = jax.random.randint(dkey, (B, Sd), 3, CFG['vocab'], dtype=jnp.int32)
    decoder_attention_mask = jnp.ones((B, Sd), jnp.int32)
    decoder_input_ids = decoder_input_ids.at[1, 7:].set(CFG['pad_id'])
    decoder_attention_mask = decoder_attention_mask.at[1, 7:].set(0)

    logits = bart_forward(params, input_ids, attention_mask,
                          decoder_input_ids, decoder_attention_mask)
    jax.block_until_ready(logits)

    assert logits.shape == (B, Sd, CFG['vocab'])
    assert bool(jnp.all(jnp.isfinite(logits)))
    print("KERNEL_OK")
</pallas_src>

<mosaic_0001>
module attributes {stable_mosaic.version = 11 : i64} {
  func.func @_encoder_kernel(%arg0: i32, %arg1: memref<1x8x32xf32, #tpu.memory_space<vmem>>, %arg2: memref<8x32xf32, #tpu.memory_space<vmem>>, %arg3: memref<1x32xf32, #tpu.memory_space<vmem>>, %arg4: memref<1x32xf32, #tpu.memory_space<vmem>>, %arg5: memref<1x1x8xf32, #tpu.memory_space<vmem>>, %arg6: memref<2x32x96xf32, #tpu.memory_space<vmem>>, %arg7: memref<2x1x96xf32, #tpu.memory_space<vmem>>, %arg8: memref<2x32x32xf32, #tpu.memory_space<vmem>>, %arg9: memref<2x1x32xf32, #tpu.memory_space<vmem>>, %arg10: memref<2x1x32xf32, #tpu.memory_space<vmem>>, %arg11: memref<2x1x32xf32, #tpu.memory_space<vmem>>, %arg12: memref<2x32x64xf32, #tpu.memory_space<vmem>>, %arg13: memref<2x1x64xf32, #tpu.memory_space<vmem>>, %arg14: memref<2x64x32xf32, #tpu.memory_space<vmem>>, %arg15: memref<2x1x32xf32, #tpu.memory_space<vmem>>, %arg16: memref<2x1x32xf32, #tpu.memory_space<vmem>>, %arg17: memref<2x1x32xf32, #tpu.memory_space<vmem>>, %arg18: memref<1x8x32xf32, #tpu.memory_space<vmem>>) attributes {dimension_semantics = [#tpu.dimension_semantics<parallel>], iteration_bounds = array<i64: 2>, scalar_prefetch = 0 : i64, scratch_operands = 0 : i64, tpu.core_type = #tpu.core_type<tc>, window_params = [{transform_indices = @transform_0, window_bounds = array<i64: 1, 8, 32>}, {pipeline_mode = #tpu.pipeline_mode<synchronous>, transform_indices = @transform_1, window_bounds = array<i64: 8, 32>}, {pipeline_mode = #tpu.pipeline_mode<synchronous>, transform_indices = @transform_2, window_bounds = array<i64: 1, 32>}, {pipeline_mode = #tpu.pipeline_mode<synchronous>, transform_indices = @transform_3, window_bounds = array<i64: 1, 32>}, {transform_indices = @transform_4, window_bounds = array<i64: 1, 1, 8>}, {pipeline_mode = #tpu.pipeline_mode<synchronous>, transform_indices = @transform_5, window_bounds = array<i64: 2, 32, 96>}, {pipeline_mode = #tpu.pipeline_mode<synchronous>, transform_indices = @transform_6, window_bounds = array<i64: 2, 1, 96>}, {pipeline_mode = #tpu.pipeline_mode<synchronous>, transform_indices = @transform_7, window_bounds = array<i64: 2, 32, 32>}, {pipeline_mode = #tpu.pipeline_mode<synchronous>, transform_indices = @transform_8, window_bounds = array<i64: 2, 1, 32>}, {pipeline_mode = #tpu.pipeline_mode<synchronous>, transform_indices = @transform_9, window_bounds = array<i64: 2, 1, 32>}, {pipeline_mode = #tpu.pipeline_mode<synchronous>, transform_indices = @transform_10, window_bounds = array<i64: 2, 1, 32>}, {pipeline_mode = #tpu.pipeline_mode<synchronous>, transform_indices = @transform_11, window_bounds = array<i64: 2, 32, 64>}, {pipeline_mode = #tpu.pipeline_mode<synchronous>, transform_indices = @transform_12, window_bounds = array<i64: 2, 1, 64>}, {pipeline_mode = #tpu.pipeline_mode<synchronous>, transform_indices = @transform_13, window_bounds = array<i64: 2, 64, 32>}, {pipeline_mode = #tpu.pipeline_mode<synchronous>, transform_indices = @transform_14, window_bounds = array<i64: 2, 1, 32>}, {pipeline_mode = #tpu.pipeline_mode<synchronous>, transform_indices = @transform_15, window_bounds = array<i64: 2, 1, 32>}, {pipeline_mode = #tpu.pipeline_mode<synchronous>, transform_indices = @transform_16, window_bounds = array<i64: 2, 1, 32>}, {transform_indices = @transform_17, window_bounds = array<i64: 1, 8, 32>}]} {
    %c0 = arith.constant 0 : index
    %c0_0 = arith.constant 0 : index
    %c0_1 = arith.constant 0 : index
    %0 = vector.load %arg1[%c0, %c0_0, %c0_1] : memref<1x8x32xf32, #tpu.memory_space<vmem>>, vector<1x8x32xf32>
    %1 = vector.shape_cast %0 : vector<1x8x32xf32> to vector<8x32xf32>
    %c0_2 = arith.constant 0 : index
    %c0_3 = arith.constant 0 : index
    %2 = vector.load %arg2[%c0_2, %c0_3] : memref<8x32xf32, #tpu.memory_space<vmem>>, vector<8x32xf32>
    %3 = arith.addf %1, %2 : vector<8x32xf32>
    %c0_4 = arith.constant 0 : index
    %c0_5 = arith.constant 0 : index
    %4 = vector.load %arg3[%c0_4, %c0_5] : memref<1x32xf32, #tpu.memory_space<vmem>>, vector<1x32xf32>
    %c0_6 = arith.constant 0 : index
    %c0_7 = arith.constant 0 : index
    %5 = vector.load %arg4[%c0_6, %c0_7] : memref<1x32xf32, #tpu.memory_space<vmem>>, vector<1x32xf32>
    %cst = arith.constant dense<0.000000e+00> : vector<8xf32>
    %6 = vector.multi_reduction <add>, %3, %cst [1] : vector<8x32xf32> to vector<8xf32>
    %7 = vector.shape_cast %6 : vector<8xf32> to vector<8x1xf32>
    %cst_8 = arith.constant 3.200000e+01 : f32
    %8 = vector.broadcast %cst_8 : f32 to vector<8x1xf32>
    %9 = arith.divf %7, %8 : vector<8x1xf32>
    %10 = vector.broadcast %9 : vector<8x1xf32> to vector<8x32xf32>
    %11 = arith.subf %3, %10 : vector<8x32xf32>
    %12 = arith.mulf %11, %11 : vector<8x32xf32>
    %cst_9 = arith.constant dense<0.000000e+00> : vector<8xf32>
    %13 = vector.multi_reduction <add>, %12, %cst_9 [1] : vector<8x32xf32> to vector<8xf32>
    %14 = vector.shape_cast %13 : vector<8xf32> to vector<8x1xf32>
    %cst_10 = arith.constant 3.200000e+01 : f32
    %15 = vector.broadcast %cst_10 : f32 to vector<8x1xf32>
    %16 = arith.divf %14, %15 : vector<8x1xf32>
    %17 = vector.broadcast %9 : vector<8x1xf32> to vector<8x32xf32>
    %18 = arith.subf %3, %17 : vector<8x32xf32>
    %cst_11 = arith.constant 9.99999974E-6 : f32
    %19 = vector.broadcast %cst_11 : f32 to vector<8x1xf32>
    %20 = arith.addf %16, %19 : vector<8x1xf32>
    %21 = math.rsqrt %20 : vector<8x1xf32>
    %22 = vector.broadcast %21 : vector<8x1xf32> to vector<8x32xf32>
    %23 = arith.mulf %18, %22 : vector<8x32xf32>
    %24 = vector.broadcast %4 : vector<1x32xf32> to vector<8x32xf32>
    %25 = arith.mulf %23, %24 : vector<8x32xf32>
    %26 = vector.broadcast %5 : vector<1x32xf32> to vector<8x32xf32>
    %27 = arith.addf %25, %26 : vector<8x32xf32>
    %c0_12 = arith.constant 0 : index
    %c0_13 = arith.constant 0 : index
    %c0_14 = arith.constant 0 : index
    %28 = vector.load %arg5[%c0_12, %c0_13, %c0_14] : memref<1x1x8xf32, #tpu.memory_space<vmem>>, vector<1x1x8xf32>
    %29 = vector.shape_cast %28 : vector<1x1x8xf32> to vector<1x8xf32>
    %c0_15 = arith.constant 0 : index
    %c0_16 = arith.constant 0 : index
    %c0_17 = arith.constant 0 : index
    %30 = vector.load %arg6[%c0_15, %c0_16, %c0_17] : memref<2x32x96xf32, #tpu.memory_space<vmem>>, vector<1x32x96xf32>
    %31 = vector.shape_cast %30 : vector<1x32x96xf32> to vector<32x96xf32>
    %cst_18 = arith.constant dense<0.000000e+00> : vector<8x96xf32>
    %32 = tpu.matmul %27, %31, %cst_18 {dimension_numbers = #tpu.dot_dimension_numbers<[1], [0], [0], [1], [0, 0, 1, 1], [], []>} : vector<8x32xf32>, vector<32x96xf32>, vector<8x96xf32> -> vector<8x96xf32>
    %c0_19 = arith.constant 0 : index
    %c0_20 = arith.constant 0 : index
    %c0_21 = arith.constant 0 : index
    %33 = vector.load %arg7[%c0_19, %c0_20, %c0_21] : memref<2x1x96xf32, #tpu.memory_space<vmem>>, vector<1x1x96xf32>
    %34 = vector.shape_cast %33 : vector<1x1x96xf32> to vector<1x96xf32>
    %35 = vector.broadcast %34 : vector<1x96xf32> to vector<8x96xf32>
    %36 = arith.addf %32, %35 : vector<8x96xf32>
    %37 = vector.extract_strided_slice %36 {offsets = [0, 0], sizes = [8, 32], strides = [1, 1]} : vector<8x96xf32> to vector<8x32xf32>
    %38 = vector.extract_strided_slice %36 {offsets = [0, 32], sizes = [8, 32], strides = [1, 1]} : vector<8x96xf32> to vector<8x32xf32>
    %39 = vector.extract_strided_slice %36 {offsets = [0, 64], sizes = [8, 32], strides = [1, 1]} : vector<8x96xf32> to vector<8x32xf32>
    %c0_22 = arith.constant 0 : index
    %c0_23 = arith.constant 0 : index
    %c0_24 = arith.constant 0 : index
    %40 = vector.load %arg8[%c0_22, %c0_23, %c0_24] : memref<2x32x32xf32, #tpu.memory_space<vmem>>, vector<1x32x32xf32>
    %41 = vector.shape_cast %40 : vector<1x32x32xf32> to vector<32x32xf32>
    %c0_25 = arith.constant 0 : index
    %c0_26 = arith.constant 0 : index
    %c0_27 = arith.constant 0 : index
    %42 = vector.load %arg9[%c0_25, %c0_26, %c0_27] : memref<2x1x32xf32, #tpu.memory_space<vmem>>, vector<1x1x32xf32>
    %43 = vector.shape_cast %42 : vector<1x1x32xf32> to vector<1x32xf32>
    %44 = vector.extract_strided_slice %37 {offsets = [0, 0], sizes = [8, 8], strides = [1, 1]} : vector<8x32xf32> to vector<8x8xf32>
    %cst_28 = arith.constant 0.353553385 : f32
    %45 = vector.broadcast %cst_28 : f32 to vector<8x8xf32>
    %46 = arith.mulf %44, %45 : vector<8x8xf32>
    %47 = vector.extract_strided_slice %38 {offsets = [0, 0], sizes = [8, 8], strides = [1, 1]} : vector<8x32xf32> to vector<8x8xf32>
    %cst_29 = arith.constant dense<0.000000e+00> : vector<8x8xf32>
    %48 = tpu.matmul %46, %47, %cst_29 {dimension_numbers = #tpu.dot_dimension_numbers<[1], [1], [0], [0], [0, 0, 1, 0], [], []>} : vector<8x8xf32>, vector<8x8xf32>, vector<8x8xf32> -> vector<8x8xf32>
    %49 = vector.broadcast %29 : vector<1x8xf32> to vector<8x8xf32>
    %50 = arith.addf %48, %49 : vector<8x8xf32>
    %cst_30 = arith.constant dense<0xFF800000> : vector<8xf32>
    %51 = vector.multi_reduction <maximumf>, %50, %cst_30 [1] : vector<8x8xf32> to vector<8xf32>
    %52 = vector.shape_cast %51 : vector<8xf32> to vector<8x1xf32>
    %53 = vector.broadcast %52 : vector<8x1xf32> to vector<8x8xf32>
    %54 = arith.subf %50, %53 : vector<8x8xf32>
    %55 = math.exp %54 : vector<8x8xf32>
    %cst_31 = arith.constant dense<0.000000e+00> : vector<8xf32>
    %56 = vector.multi_reduction <add>, %55, %cst_31 [1] : vector<8x8xf32> to vector<8xf32>
    %57 = vector.shape_cast %56 : vector<8xf32> to vector<8x1xf32>
    %58 = tpu.reciprocal %57 {approx = true} : vector<8x1xf32> -> vector<8x1xf32>
    %59 = vector.broadcast %58 : vector<8x1xf32> to vector<8x8xf32>
    %60 = arith.mulf %55, %59 : vector<8x8xf32>
    %61 = vector.extract_strided_slice %39 {offsets = [0, 0], sizes = [8, 8], strides = [1, 1]} : vector<8x32xf32> to vector<8x8xf32>
    %cst_32 = arith.constant dense<0.000000e+00> : vector<8x8xf32>
    %62 = tpu.matmul %60, %61, %cst_32 {dimension_numbers = #tpu.dot_dimension_numbers<[1], [0], [0], [1], [0, 0, 1, 1], [], []>} : vector<8x8xf32>, vector<8x8xf32>, vector<8x8xf32> -> vector<8x8xf32>
    %63 = vector.extract_strided_slice %41 {offsets = [0, 0], sizes = [8, 32], strides = [1, 1]} : vector<32x32xf32> to vector<8x32xf32>
    %cst_33 = arith.constant dense<0.000000e+00> : vector<8x32xf32>
    %64 = tpu.matmul %62, %63, %cst_33 {dimension_numbers = #tpu.dot_dimension_numbers<[1], [0], [0], [1], [0, 0, 1, 1], [], []>} : vector<8x8xf32>, vector<8x32xf32>, vector<8x32xf32> -> vector<8x32xf32>
    %65 = vector.broadcast %43 : vector<1x32xf32> to vector<8x32xf32>
    %66 = arith.addf %65, %64 : vector<8x32xf32>
    %67 = vector.extract_strided_slice %37 {offsets = [0, 8], sizes = [8, 8], strides = [1, 1]} : vector<8x32xf32> to vector<8x8xf32>
    %cst_34 = arith.constant 0.353553385 : f32
    %68 = vector.broadcast %cst_34 : f32 to vector<8x8xf32>
    %69 = arith.mulf %67, %68 : vector<8x8xf32>
    %70 = vector.extract_strided_slice %38 {offsets = [0, 8], sizes = [8, 8], strides = [1, 1]} : vector<8x32xf32> to vector<8x8xf32>
    %cst_35 = arith.constant dense<0.000000e+00> : vector<8x8xf32>
    %71 = tpu.matmul %69, %70, %cst_35 {dimension_numbers = #tpu.dot_dimension_numbers<[1], [1], [0], [0], [0, 0, 1, 0], [], []>} : vector<8x8xf32>, vector<8x8xf32>, vector<8x8xf32> -> vector<8x8xf32>
    %72 = vector.broadcast %29 : vector<1x8xf32> to vector<8x8xf32>
    %73 = arith.addf %71, %72 : vector<8x8xf32>
    %cst_36 = arith.constant dense<0xFF800000> : vector<8xf32>
    %74 = vector.multi_reduction <maximumf>, %73, %cst_36 [1] : vector<8x8xf32> to vector<8xf32>
    %75 = vector.shape_cast %74 : vector<8xf32> to vector<8x1xf32>
    %76 = vector.broadcast %75 : vector<8x1xf32> to vector<8x8xf32>
    %77 = arith.subf %73, %76 : vector<8x8xf32>
    %78 = math.exp %77 : vector<8x8xf32>
    %cst_37 = arith.constant dense<0.000000e+00> : vector<8xf32>
    %79 = vector.multi_reduction <add>, %78, %cst_37 [1] : vector<8x8xf32> to vector<8xf32>
    %80 = vector.shape_cast %79 : vector<8xf32> to vector<8x1xf32>
    %81 = tpu.reciprocal %80 {approx = true} : vector<8x1xf32> -> vector<8x1xf32>
    %82 = vector.broadcast %81 : vector<8x1xf32> to vector<8x8xf32>
    %83 = arith.mulf %78, %82 : vector<8x8xf32>
    %84 = vector.extract_strided_slice %39 {offsets = [0, 8], sizes = [8, 8], strides = [1, 1]} : vector<8x32xf32> to vector<8x8xf32>
    %cst_38 = arith.constant dense<0.000000e+00> : vector<8x8xf32>
    %85 = tpu.matmul %83, %84, %cst_38 {dimension_numbers = #tpu.dot_dimension_numbers<[1], [0], [0], [1], [0, 0, 1, 1], [], []>} : vector<8x8xf32>, vector<8x8xf32>, vector<8x8xf32> -> vector<8x8xf32>
    %86 = vector.extract_strided_slice %41 {offsets = [8, 0], sizes = [8, 32], strides = [1, 1]} : vector<32x32xf32> to vector<8x32xf32>
    %cst_39 = arith.constant dense<0.000000e+00> : vector<8x32xf32>
    %87 = tpu.matmul %85, %86, %cst_39 {dimension_numbers = #tpu.dot_dimension_numbers<[1], [0], [0], [1], [0, 0, 1, 1], [], []>} : vector<8x8xf32>, vector<8x32xf32>, vector<8x32xf32> -> vector<8x32xf32>
    %88 = arith.addf %66, %87 : vector<8x32xf32>
    %89 = vector.extract_strided_slice %37 {offsets = [0, 16], sizes = [8, 8], strides = [1, 1]} : vector<8x32xf32> to vector<8x8xf32>
    %cst_40 = arith.constant 0.353553385 : f32
    %90 = vector.broadcast %cst_40 : f32 to vector<8x8xf32>
    %91 = arith.mulf %89, %90 : vector<8x8xf32>
    %92 = vector.extract_strided_slice %38 {offsets = [0, 16], sizes = [8, 8], strides = [1, 1]} : vector<8x32xf32> to vector<8x8xf32>
    %cst_41 = arith.constant dense<0.000000e+00> : vector<8x8xf32>
    %93 = tpu.matmul %91, %92, %cst_41 {dimension_numbers = #tpu.dot_dimension_numbers<[1], [1], [0], [0], [0, 0, 1, 0], [], []>} : vector<8x8xf32>, vector<8x8xf32>, vector<8x8xf32> -> vector<8x8xf32>
    %94 = vector.broadcast %29 : vector<1x8xf32> to vector<8x8xf32>
    %95 = arith.addf %93, %94 : vector<8x8xf32>
    %cst_42 = arith.constant dense<0xFF800000> : vector<8xf32>
    %96 = vector.multi_reduction <maximumf>, %95, %cst_42 [1] : vector<8x8xf32> to vector<8xf32>
    %97 = vector.shape_cast %96 : vector<8xf32> to vector<8x1xf32>
    %98 = vector.broadcast %97 : vector<8x1xf32> to vector<8x8xf32>
    %99 = arith.subf %95, %98 : vector<8x8xf32>
    %100 = math.exp %99 : vector<8x8xf32>
    %cst_43 = arith.constant dense<0.000000e+00> : vector<8xf32>
    %101 = vector.multi_reduction <add>, %100, %cst_43 [1] : vector<8x8xf32> to vector<8xf32>
    %102 = vector.shape_cast %101 : vector<8xf32> to vector<8x1xf32>
    %103 = tpu.reciprocal %102 {approx = true} : vector<8x1xf32> -> vector<8x1xf32>
    %104 = vector.broadcast %103 : vector<8x1xf32> to vector<8x8xf32>
    %105 = arith.mulf %100, %104 : vector<8x8xf32>
    %106 = vector.extract_strided_slice %39 {offsets = [0, 16], sizes = [8, 8], strides = [1, 1]} : vector<8x32xf32> to vector<8x8xf32>
    %cst_44 = arith.constant dense<0.000000e+00> : vector<8x8xf32>
    %107 = tpu.matmul %105, %106, %cst_44 {dimension_numbers = #tpu.dot_dimension_numbers<[1], [0], [0], [1], [0, 0, 1, 1], [], []>} : vector<8x8xf32>, vector<8x8xf32>, vector<8x8xf32> -> vector<8x8xf32>
    %108 = vector.extract_strided_slice %41 {offsets = [16, 0], sizes = [8, 32], strides = [1, 1]} : vector<32x32xf32> to vector<8x32xf32>
    %cst_45 = arith.constant dense<0.000000e+00> : vector<8x32xf32>
    %109 = tpu.matmul %107, %108, %cst_45 {dimension_numbers = #tpu.dot_dimension_numbers<[1], [0], [0], [1], [0, 0, 1, 1], [], []>} : vector<8x8xf32>, vector<8x32xf32>, vector<8x32xf32> -> vector<8x32xf32>
    %110 = arith.addf %88, %109 : vector<8x32xf32>
    %111 = vector.extract_strided_slice %37 {offsets = [0, 24], sizes = [8, 8], strides = [1, 1]} : vector<8x32xf32> to vector<8x8xf32>
    %cst_46 = arith.constant 0.353553385 : f32
    %112 = vector.broadcast %cst_46 : f32 to vector<8x8xf32>
    %113 = arith.mulf %111, %112 : vector<8x8xf32>
    %114 = vector.extract_strided_slice %38 {offsets = [0, 24], sizes = [8, 8], strides = [1, 1]} : vector<8x32xf32> to vector<8x8xf32>
    %cst_47 = arith.constant dense<0.000000e+00> : vector<8x8xf32>
    %115 = tpu.matmul %113, %114, %cst_47 {dimension_numbers = #tpu.dot_dimension_numbers<[1], [1], [0], [0], [0, 0, 1, 0], [], []>} : vector<8x8xf32>, vector<8x8xf32>, vector<8x8xf32> -> vector<8x8xf32>
    %116 = vector.broadcast %29 : vector<1x8xf32> to vector<8x8xf32>
    %117 = arith.addf %115, %116 : vector<8x8xf32>
    %cst_48 = arith.constant dense<0xFF800000> : vector<8xf32>
    %118 = vector.multi_reduction <maximumf>, %117, %cst_48 [1] : vector<8x8xf32> to vector<8xf32>
    %119 = vector.shape_cast %118 : vector<8xf32> to vector<8x1xf32>
    %120 = vector.broadcast %119 : vector<8x1xf32> to vector<8x8xf32>
    %121 = arith.subf %117, %120 : vector<8x8xf32>
    %122 = math.exp %121 : vector<8x8xf32>
    %cst_49 = arith.constant dense<0.000000e+00> : vector<8xf32>
    %123 = vector.multi_reduction <add>, %122, %cst_49 [1] : vector<8x8xf32> to vector<8xf32>
    %124 = vector.shape_cast %123 : vector<8xf32> to vector<8x1xf32>
    %125 = tpu.reciprocal %124 {approx = true} : vector<8x1xf32> -> vector<8x1xf32>
    %126 = vector.broadcast %125 : vector<8x1xf32> to vector<8x8xf32>
    %127 = arith.mulf %122, %126 : vector<8x8xf32>
    %128 = vector.extract_strided_slice %39 {offsets = [0, 24], sizes = [8, 8], strides = [1, 1]} : vector<8x32xf32> to vector<8x8xf32>
    %cst_50 = arith.constant dense<0.000000e+00> : vector<8x8xf32>
    %129 = tpu.matmul %127, %128, %cst_50 {dimension_numbers = #tpu.dot_dimension_numbers<[1], [0], [0], [1], [0, 0, 1, 1], [], []>} : vector<8x8xf32>, vector<8x8xf32>, vector<8x8xf32> -> vector<8x8xf32>
    %130 = vector.extract_strided_slice %41 {offsets = [24, 0], sizes = [8, 32], strides = [1, 1]} : vector<32x32xf32> to vector<8x32xf32>
    %cst_51 = arith.constant dense<0.000000e+00> : vector<8x32xf32>
    %131 = tpu.matmul %129, %130, %cst_51 {dimension_numbers = #tpu.dot_dimension_numbers<[1], [0], [0], [1], [0, 0, 1, 1], [], []>} : vector<8x8xf32>, vector<8x32xf32>, vector<8x32xf32> -> vector<8x32xf32>
    %132 = arith.addf %110, %131 : vector<8x32xf32>
    %133 = arith.addf %27, %132 : vector<8x32xf32>
    %c0_52 = arith.constant 0 : index
    %c0_53 = arith.constant 0 : index
    %c0_54 = arith.constant 0 : index
    %134 = vector.load %arg10[%c0_52, %c0_53, %c0_54] : memref<2x1x32xf32, #tpu.memory_space<vmem>>, vector<1x1x32xf32>
    %135 = vector.shape_cast %134 : vector<1x1x32xf32> to vector<1x32xf32>
    %c0_55 = arith.constant 0 : index
    %c0_56 = arith.constant 0 : index
    %c0_57 = arith.constant 0 : index
    %136 = vector.load %arg11[%c0_55, %c0_56, %c0_57] : memref<2x1x32xf32, #tpu.memory_space<vmem>>, vector<1x1x32xf32>
    %137 = vector.shape_cast %136 : vector<1x1x32xf32> to vector<1x32xf32>
    %cst_58 = arith.constant dense<0.000000e+00> : vector<8xf32>
    %138 = vector.multi_reduction <add>, %133, %cst_58 [1] : vector<8x32xf32> to vector<8xf32>
    %139 = vector.shape_cast %138 : vector<8xf32> to vector<8x1xf32>
    %cst_59 = arith.constant 3.200000e+01 : f32
    %140 = vector.broadcast %cst_59 : f32 to vector<8x1xf32>
    %141 = arith.divf %139, %140 : vector<8x1xf32>
    %142 = vector.broadcast %141 : vector<8x1xf32> to vector<8x32xf32>
    %143 = arith.subf %133, %142 : vector<8x32xf32>
    %144 = arith.mulf %143, %143 : vector<8x32xf32>
    %cst_60 = arith.constant dense<0.000000e+00> : vector<8xf32>
    %145 = vector.multi_reduction <add>, %144, %cst_60 [1] : vector<8x32xf32> to vector<8xf32>
    %146 = vector.shape_cast %145 : vector<8xf32> to vector<8x1xf32>
    %cst_61 = arith.constant 3.200000e+01 : f32
    %147 = vector.broadcast %cst_61 : f32 to vector<8x1xf32>
    %148 = arith.divf %146, %147 : vector<8x1xf32>
    %149 = vector.broadcast %141 : vector<8x1xf32> to vector<8x32xf32>
    %150 = arith.subf %133, %149 : vector<8x32xf32>
    %cst_62 = arith.constant 9.99999974E-6 : f32
    %151 = vector.broadcast %cst_62 : f32 to vector<8x1xf32>
    %152 = arith.addf %148, %151 : vector<8x1xf32>
    %153 = math.rsqrt %152 : vector<8x1xf32>
    %154 = vector.broadcast %153 : vector<8x1xf32> to vector<8x32xf32>
    %155 = arith.mulf %150, %154 : vector<8x32xf32>
    %156 = vector.broadcast %135 : vector<1x32xf32> to vector<8x32xf32>
    %157 = arith.mulf %155, %156 : vector<8x32xf32>
    %158 = vector.broadcast %137 : vector<1x32xf32> to vector<8x32xf32>
    %159 = arith.addf %157, %158 : vector<8x32xf32>
    %c0_63 = arith.constant 0 : index
    %c0_64 = arith.constant 0 : index
    %c0_65 = arith.constant 0 : index
    %160 = vector.load %arg12[%c0_63, %c0_64, %c0_65] : memref<2x32x64xf32, #tpu.memory_space<vmem>>, vector<1x32x64xf32>
    %161 = vector.shape_cast %160 : vector<1x32x64xf32> to vector<32x64xf32>
    %cst_66 = arith.constant dense<0.000000e+00> : vector<8x64xf32>
    %162 = tpu.matmul %159, %161, %cst_66 {dimension_numbers = #tpu.dot_dimension_numbers<[1], [0], [0], [1], [0, 0, 1, 1], [], []>} : vector<8x32xf32>, vector<32x64xf32>, vector<8x64xf32> -> vector<8x64xf32>
    %c0_67 = arith.constant 0 : index
    %c0_68 = arith.constant 0 : index
    %c0_69 = arith.constant 0 : index
    %163 = vector.load %arg13[%c0_67, %c0_68, %c0_69] : memref<2x1x64xf32, #tpu.memory_space<vmem>>, vector<1x1x64xf32>
    %164 = vector.shape_cast %163 : vector<1x1x64xf32> to vector<1x64xf32>
    %165 = vector.broadcast %164 : vector<1x64xf32> to vector<8x64xf32>
    %166 = arith.addf %162, %165 : vector<8x64xf32>
    %cst_70 = arith.constant 5.000000e-01 : f32
    %167 = vector.broadcast %cst_70 : f32 to vector<8x64xf32>
    %168 = arith.mulf %167, %166 : vector<8x64xf32>
    %cst_71 = arith.constant 0.707106769 : f32
    %169 = vector.broadcast %cst_71 : f32 to vector<8x64xf32>
    %170 = arith.mulf %166, %169 : vector<8x64xf32>
    %cst_72 = arith.constant 0.000000e+00 : f32
    %171 = vector.broadcast %cst_72 : f32 to vector<8x64xf32>
    %172 = arith.cmpf oge, %170, %171 : vector<8x64xf32>
    %cst_73 = arith.constant 1.000000e+00 : f32
    %cst_74 = arith.constant -1.000000e+00 : f32
    %173 = vector.broadcast %cst_73 : f32 to vector<8x64xf32>
    %174 = vector.broadcast %cst_74 : f32 to vector<8x64xf32>
    %175 = arith.select %172, %173, %174 : vector<8x64xi1>, vector<8x64xf32>
    %176 = math.absf %170 : vector<8x64xf32>
    %cst_75 = arith.constant 0.327591091 : f32
    %177 = vector.broadcast %cst_75 : f32 to vector<8x64xf32>
    %178 = arith.mulf %177, %176 : vector<8x64xf32>
    %cst_76 = arith.constant 1.000000e+00 : f32
    %179 = vector.broadcast %cst_76 : f32 to vector<8x64xf32>
    %180 = arith.addf %179, %178 : vector<8x64xf32>
    %cst_77 = arith.constant 1.000000e+00 : f32
    %181 = vector.broadcast %cst_77 : f32 to vector<8x64xf32>
    %182 = arith.divf %181, %180 : vector<8x64xf32>
    %cst_78 = arith.constant 1.06140542 : f32
    %183 = vector.broadcast %cst_78 : f32 to vector<8x64xf32>
    %184 = arith.mulf %183, %182 : vector<8x64xf32>
    %cst_79 = arith.constant -1.45315206 : f32
    %185 = vector.broadcast %cst_79 : f32 to vector<8x64xf32>
    %186 = arith.addf %184, %185 : vector<8x64xf32>
    %187 = arith.mulf %186, %182 : vector<8x64xf32>
    %cst_80 = arith.constant 1.42141378 : f32
    %188 = vector.broadcast %cst_80 : f32 to vector<8x64xf32>
    %189 = arith.addf %187, %188 : vector<8x64xf32>
    %190 = arith.mulf %189, %182 : vector<8x64xf32>
    %cst_81 = arith.constant -0.284496725 : f32
    %191 = vector.broadcast %cst_81 : f32 to vector<8x64xf32>
    %192 = arith.addf %190, %191 : vector<8x64xf32>
    %193 = arith.mulf %192, %182 : vector<8x64xf32>
    %cst_82 = arith.constant 0.254829586 : f32
    %194 = vector.broadcast %cst_82 : f32 to vector<8x64xf32>
    %195 = arith.addf %193, %194 : vector<8x64xf32>
    %196 = arith.mulf %195, %182 : vector<8x64xf32>
    %cst_83 = arith.constant 0.000000e+00 : f32
    %197 = vector.broadcast %cst_83 : f32 to vector<8x64xf32>
    %198 = arith.subf %197, %176 : vector<8x64xf32>
    %199 = arith.mulf %198, %176 : vector<8x64xf32>
    %200 = math.exp %199 : vector<8x64xf32>
    %201 = arith.mulf %196, %200 : vector<8x64xf32>
    %cst_84 = arith.constant 1.000000e+00 : f32
    %202 = vector.broadcast %cst_84 : f32 to vector<8x64xf32>
    %203 = arith.subf %202, %201 : vector<8x64xf32>
    %204 = arith.mulf %175, %203 : vector<8x64xf32>
    %cst_85 = arith.constant 1.000000e+00 : f32
    %205 = vector.broadcast %cst_85 : f32 to vector<8x64xf32>
    %206 = arith.addf %205, %204 : vector<8x64xf32>
    %207 = arith.mulf %168, %206 : vector<8x64xf32>
    %c0_86 = arith.constant 0 : index
    %c0_87 = arith.constant 0 : index
    %c0_88 = arith.constant 0 : index
    %208 = vector.load %arg14[%c0_86, %c0_87, %c0_88] : memref<2x64x32xf32, #tpu.memory_space<vmem>>, vector<1x64x32xf32>
    %209 = vector.shape_cast %208 : vector<1x64x32xf32> to vector<64x32xf32>
    %cst_89 = arith.constant dense<0.000000e+00> : vector<8x32xf32>
    %210 = tpu.matmul %207, %209, %cst_89 {dimension_numbers = #tpu.dot_dimension_numbers<[1], [0], [0], [1], [0, 0, 1, 1], [], []>} : vector<8x64xf32>, vector<64x32xf32>, vector<8x32xf32> -> vector<8x32xf32>
    %c0_90 = arith.constant 0 : index
    %c0_91 = arith.constant 0 : index
    %c0_92 = arith.constant 0 : index
    %211 = vector.load %arg15[%c0_90, %c0_91, %c0_92] : memref<2x1x32xf32, #tpu.memory_space<vmem>>, vector<1x1x32xf32>
    %212 = vector.shape_cast %211 : vector<1x1x32xf32> to vector<1x32xf32>
    %213 = vector.broadcast %212 : vector<1x32xf32> to vector<8x32xf32>
    %214 = arith.addf %210, %213 : vector<8x32xf32>
    %215 = arith.addf %159, %214 : vector<8x32xf32>
    %c0_93 = arith.constant 0 : index
    %c0_94 = arith.constant 0 : index
    %c0_95 = arith.constant 0 : index
    %216 = vector.load %arg16[%c0_93, %c0_94, %c0_95] : memref<2x1x32xf32, #tpu.memory_space<vmem>>, vector<1x1x32xf32>
    %217 = vector.shape_cast %216 : vector<1x1x32xf32> to vector<1x32xf32>
    %c0_96 = arith.constant 0 : index
    %c0_97 = arith.constant 0 : index
    %c0_98 = arith.constant 0 : index
    %218 = vector.load %arg17[%c0_96, %c0_97, %c0_98] : memref<2x1x32xf32, #tpu.memory_space<vmem>>, vector<1x1x32xf32>
    %219 = vector.shape_cast %218 : vector<1x1x32xf32> to vector<1x32xf32>
    %cst_99 = arith.constant dense<0.000000e+00> : vector<8xf32>
    %220 = vector.multi_reduction <add>, %215, %cst_99 [1] : vector<8x32xf32> to vector<8xf32>
    %221 = vector.shape_cast %220 : vector<8xf32> to vector<8x1xf32>
    %cst_100 = arith.constant 3.200000e+01 : f32
    %222 = vector.broadcast %cst_100 : f32 to vector<8x1xf32>
    %223 = arith.divf %221, %222 : vector<8x1xf32>
    %224 = vector.broadcast %223 : vector<8x1xf32> to vector<8x32xf32>
    %225 = arith.subf %215, %224 : vector<8x32xf32>
    %226 = arith.mulf %225, %225 : vector<8x32xf32>
    %cst_101 = arith.constant dense<0.000000e+00> : vector<8xf32>
    %227 = vector.multi_reduction <add>, %226, %cst_101 [1] : vector<8x32xf32> to vector<8xf32>
    %228 = vector.shape_cast %227 : vector<8xf32> to vector<8x1xf32>
    %cst_102 = arith.constant 3.200000e+01 : f32
    %229 = vector.broadcast %cst_102 : f32 to vector<8x1xf32>
    %230 = arith.divf %228, %229 : vector<8x1xf32>
    %231 = vector.broadcast %223 : vector<8x1xf32> to vector<8x32xf32>
    %232 = arith.subf %215, %231 : vector<8x32xf32>
    %cst_103 = arith.constant 9.99999974E-6 : f32
    %233 = vector.broadcast %cst_103 : f32 to vector<8x1xf32>
    %234 = arith.addf %230, %233 : vector<8x1xf32>
    %235 = math.rsqrt %234 : vector<8x1xf32>
    %236 = vector.broadcast %235 : vector<8x1xf32> to vector<8x32xf32>
    %237 = arith.mulf %232, %236 : vector<8x32xf32>
    %238 = vector.broadcast %217 : vector<1x32xf32> to vector<8x32xf32>
    %239 = arith.mulf %237, %238 : vector<8x32xf32>
    %240 = vector.broadcast %219 : vector<1x32xf32> to vector<8x32xf32>
    %241 = arith.addf %239, %240 : vector<8x32xf32>
    %c1 = arith.constant 1 : index
    %c0_104 = arith.constant 0 : index
    %c0_105 = arith.constant 0 : index
    %242 = vector.load %arg6[%c1, %c0_104, %c0_105] : memref<2x32x96xf32, #tpu.memory_space<vmem>>, vector<1x32x96xf32>
    %243 = vector.shape_cast %242 : vector<1x32x96xf32> to vector<32x96xf32>
    %cst_106 = arith.constant dense<0.000000e+00> : vector<8x96xf32>
    %244 = tpu.matmul %241, %243, %cst_106 {dimension_numbers = #tpu.dot_dimension_numbers<[1], [0], [0], [1], [0, 0, 1, 1], [], []>} : vector<8x32xf32>, vector<32x96xf32>, vector<8x96xf32> -> vector<8x96xf32>
    %c1_107 = arith.constant 1 : index
    %c0_108 = arith.constant 0 : index
    %c0_109 = arith.constant 0 : index
    %245 = vector.load %arg7[%c1_107, %c0_108, %c0_109] : memref<2x1x96xf32, #tpu.memory_space<vmem>>, vector<1x1x96xf32>
    %246 = vector.shape_cast %245 : vector<1x1x96xf32> to vector<1x96xf32>
    %247 = vector.broadcast %246 : vector<1x96xf32> to vector<8x96xf32>
    %248 = arith.addf %244, %247 : vector<8x96xf32>
    %249 = vector.extract_strided_slice %248 {offsets = [0, 0], sizes = [8, 32], strides = [1, 1]} : vector<8x96xf32> to vector<8x32xf32>
    %250 = vector.extract_strided_slice %248 {offsets = [0, 32], sizes = [8, 32], strides = [1, 1]} : vector<8x96xf32> to vector<8x32xf32>
    %251 = vector.extract_strided_slice %248 {offsets = [0, 64], sizes = [8, 32], strides = [1, 1]} : vector<8x96xf32> to vector<8x32xf32>
    %c1_110 = arith.constant 1 : index
    %c0_111 = arith.constant 0 : index
    %c0_112 = arith.constant 0 : index
    %252 = vector.load %arg8[%c1_110, %c0_111, %c0_112] : memref<2x32x32xf32, #tpu.memory_space<vmem>>, vector<1x32x32xf32>
    %253 = vector.shape_cast %252 : vector<1x32x32xf32> to vector<32x32xf32>
    %c1_113 = arith.constant 1 : index
    %c0_114 = arith.constant 0 : index
    %c0_115 = arith.constant 0 : index
    %254 = vector.load %arg9[%c1_113, %c0_114, %c0_115] : memref<2x1x32xf32, #tpu.memory_space<vmem>>, vector<1x1x32xf32>
    %255 = vector.shape_cast %254 : vector<1x1x32xf32> to vector<1x32xf32>
    %256 = vector.extract_strided_slice %249 {offsets = [0, 0], sizes = [8, 8], strides = [1, 1]} : vector<8x32xf32> to vector<8x8xf32>
    %cst_116 = arith.constant 0.353553385 : f32
    %257 = vector.broadcast %cst_116 : f32 to vector<8x8xf32>
    %258 = arith.mulf %256, %257 : vector<8x8xf32>
    %259 = vector.extract_strided_slice %250 {offsets = [0, 0], sizes = [8, 8], strides = [1, 1]} : vector<8x32xf32> to vector<8x8xf32>
    %cst_117 = arith.constant dense<0.000000e+00> : vector<8x8xf32>
    %260 = tpu.matmul %258, %259, %cst_117 {dimension_numbers = #tpu.dot_dimension_numbers<[1], [1], [0], [0], [0, 0, 1, 0], [], []>} : vector<8x8xf32>, vector<8x8xf32>, vector<8x8xf32> -> vector<8x8xf32>
    %261 = vector.broadcast %29 : vector<1x8xf32> to vector<8x8xf32>
    %262 = arith.addf %260, %261 : vector<8x8xf32>
    %cst_118 = arith.constant dense<0xFF800000> : vector<8xf32>
    %263 = vector.multi_reduction <maximumf>, %262, %cst_118 [1] : vector<8x8xf32> to vector<8xf32>
    %264 = vector.shape_cast %263 : vector<8xf32> to vector<8x1xf32>
    %265 = vector.broadcast %264 : vector<8x1xf32> to vector<8x8xf32>
    %266 = arith.subf %262, %265 : vector<8x8xf32>
    %267 = math.exp %266 : vector<8x8xf32>
    %cst_119 = arith.constant dense<0.000000e+00> : vector<8xf32>
    %268 = vector.multi_reduction <add>, %267, %cst_119 [1] : vector<8x8xf32> to vector<8xf32>
    %269 = vector.shape_cast %268 : vector<8xf32> to vector<8x1xf32>
    %270 = tpu.reciprocal %269 {approx = true} : vector<8x1xf32> -> vector<8x1xf32>
    %271 = vector.broadcast %270 : vector<8x1xf32> to vector<8x8xf32>
    %272 = arith.mulf %267, %271 : vector<8x8xf32>
    %273 = vector.extract_strided_slice %251 {offsets = [0, 0], sizes = [8, 8], strides = [1, 1]} : vector<8x32xf32> to vector<8x8xf32>
    %cst_120 = arith.constant dense<0.000000e+00> : vector<8x8xf32>
    %274 = tpu.matmul %272, %273, %cst_120 {dimension_numbers = #tpu.dot_dimension_numbers<[1], [0], [0], [1], [0, 0, 1, 1], [], []>} : vector<8x8xf32>, vector<8x8xf32>, vector<8x8xf32> -> vector<8x8xf32>
    %275 = vector.extract_strided_slice %253 {offsets = [0, 0], sizes = [8, 32], strides = [1, 1]} : vector<32x32xf32> to vector<8x32xf32>
    %cst_121 = arith.constant dense<0.000000e+00> : vector<8x32xf32>
    %276 = tpu.matmul %274, %275, %cst_121 {dimension_numbers = #tpu.dot_dimension_numbers<[1], [0], [0], [1], [0, 0, 1, 1], [], []>} : vector<8x8xf32>, vector<8x32xf32>, vector<8x32xf32> -> vector<8x32xf32>
    %277 = vector.broadcast %255 : vector<1x32xf32> to vector<8x32xf32>
    %278 = arith.addf %277, %276 : vector<8x32xf32>
    %279 = vector.extract_strided_slice %249 {offsets = [0, 8], sizes = [8, 8], strides = [1, 1]} : vector<8x32xf32> to vector<8x8xf32>
    %cst_122 = arith.constant 0.353553385 : f32
    %280 = vector.broadcast %cst_122 : f32 to vector<8x8xf32>
    %281 = arith.mulf %279, %280 : vector<8x8xf32>
    %282 = vector.extract_strided_slice %250 {offsets = [0, 8], sizes = [8, 8], strides = [1, 1]} : vector<8x32xf32> to vector<8x8xf32>
    %cst_123 = arith.constant dense<0.000000e+00> : vector<8x8xf32>
    %283 = tpu.matmul %281, %282, %cst_123 {dimension_numbers = #tpu.dot_dimension_numbers<[1], [1], [0], [0], [0, 0, 1, 0], [], []>} : vector<8x8xf32>, vector<8x8xf32>, vector<8x8xf32> -> vector<8x8xf32>
    %284 = vector.broadcast %29 : vector<1x8xf32> to vector<8x8xf32>
    %285 = arith.addf %283, %284 : vector<8x8xf32>
    %cst_124 = arith.constant dense<0xFF800000> : vector<8xf32>
    %286 = vector.multi_reduction <maximumf>, %285, %cst_124 [1] : vector<8x8xf32> to vector<8xf32>
    %287 = vector.shape_cast %286 : vector<8xf32> to vector<8x1xf32>
    %288 = vector.broadcast %287 : vector<8x1xf32> to vector<8x8xf32>
    %289 = arith.subf %285, %288 : vector<8x8xf32>
    %290 = math.exp %289 : vector<8x8xf32>
    %cst_125 = arith.constant dense<0.000000e+00> : vector<8xf32>
    %291 = vector.multi_reduction <add>, %290, %cst_125 [1] : vector<8x8xf32> to vector<8xf32>
    %292 = vector.shape_cast %291 : vector<8xf32> to vector<8x1xf32>
    %293 = tpu.reciprocal %292 {approx = true} : vector<8x1xf32> -> vector<8x1xf32>
    %294 = vector.broadcast %293 : vector<8x1xf32> to vector<8x8xf32>
    %295 = arith.mulf %290, %294 : vector<8x8xf32>
    %296 = vector.extract_strided_slice %251 {offsets = [0, 8], sizes = [8, 8], strides = [1, 1]} : vector<8x32xf32> to vector<8x8xf32>
    %cst_126 = arith.constant dense<0.000000e+00> : vector<8x8xf32>
    %297 = tpu.matmul %295, %296, %cst_126 {dimension_numbers = #tpu.dot_dimension_numbers<[1], [0], [0], [1], [0, 0, 1, 1], [], []>} : vector<8x8xf32>, vector<8x8xf32>, vector<8x8xf32> -> vector<8x8xf32>
    %298 = vector.extract_strided_slice %253 {offsets = [8, 0], sizes = [8, 32], strides = [1, 1]} : vector<32x32xf32> to vector<8x32xf32>
    %cst_127 = arith.constant dense<0.000000e+00> : vector<8x32xf32>
    %299 = tpu.matmul %297, %298, %cst_127 {dimension_numbers = #tpu.dot_dimension_numbers<[1], [0], [0], [1], [0, 0, 1, 1], [], []>} : vector<8x8xf32>, vector<8x32xf32>, vector<8x32xf32> -> vector<8x32xf32>
    %300 = arith.addf %278, %299 : vector<8x32xf32>
    %301 = vector.extract_strided_slice %249 {offsets = [0, 16], sizes = [8, 8], strides = [1, 1]} : vector<8x32xf32> to vector<8x8xf32>
    %cst_128 = arith.constant 0.353553385 : f32
    %302 = vector.broadcast %cst_128 : f32 to vector<8x8xf32>
    %303 = arith.mulf %301, %302 : vector<8x8xf32>
    %304 = vector.extract_strided_slice %250 {offsets = [0, 16], sizes = [8, 8], strides = [1, 1]} : vector<8x32xf32> to vector<8x8xf32>
    %cst_129 = arith.constant dense<0.000000e+00> : vector<8x8xf32>
    %305 = tpu.matmul %303, %304, %cst_129 {dimension_numbers = #tpu.dot_dimension_numbers<[1], [1], [0], [0], [0, 0, 1, 0], [], []>} : vector<8x8xf32>, vector<8x8xf32>, vector<8x8xf32> -> vector<8x8xf32>
    %306 = vector.broadcast %29 : vector<1x8xf32> to vector<8x8xf32>
    %307 = arith.addf %305, %306 : vector<8x8xf32>
    %cst_130 = arith.constant dense<0xFF800000> : vector<8xf32>
    %308 = vector.multi_reduction <maximumf>, %307, %cst_130 [1] : vector<8x8xf32> to vector<8xf32>
    %309 = vector.shape_cast %308 : vector<8xf32> to vector<8x1xf32>
    %310 = vector.broadcast %309 : vector<8x1xf32> to vector<8x8xf32>
    %311 = arith.subf %307, %310 : vector<8x8xf32>
    %312 = math.exp %311 : vector<8x8xf32>
    %cst_131 = arith.constant dense<0.000000e+00> : vector<8xf32>
    %313 = vector.multi_reduction <add>, %312, %cst_131 [1] : vector<8x8xf32> to vector<8xf32>
    %314 = vector.shape_cast %313 : vector<8xf32> to vector<8x1xf32>
    %315 = tpu.reciprocal %314 {approx = true} : vector<8x1xf32> -> vector<8x1xf32>
    %316 = vector.broadcast %315 : vector<8x1xf32> to vector<8x8xf32>
    %317 = arith.mulf %312, %316 : vector<8x8xf32>
    %318 = vector.extract_strided_slice %251 {offsets = [0, 16], sizes = [8, 8], strides = [1, 1]} : vector<8x32xf32> to vector<8x8xf32>
    %cst_132 = arith.constant dense<0.000000e+00> : vector<8x8xf32>
    %319 = tpu.matmul %317, %318, %cst_132 {dimension_numbers = #tpu.dot_dimension_numbers<[1], [0], [0], [1], [0, 0, 1, 1], [], []>} : vector<8x8xf32>, vector<8x8xf32>, vector<8x8xf32> -> vector<8x8xf32>
    %320 = vector.extract_strided_slice %253 {offsets = [16, 0], sizes = [8, 32], strides = [1, 1]} : vector<32x32xf32> to vector<8x32xf32>
    %cst_133 = arith.constant dense<0.000000e+00> : vector<8x32xf32>
    %321 = tpu.matmul %319, %320, %cst_133 {dimension_numbers = #tpu.dot_dimension_numbers<[1], [0], [0], [1], [0, 0, 1, 1], [], []>} : vector<8x8xf32>, vector<8x32xf32>, vector<8x32xf32> -> vector<8x32xf32>
    %322 = arith.addf %300, %321 : vector<8x32xf32>
    %323 = vector.extract_strided_slice %249 {offsets = [0, 24], sizes = [8, 8], strides = [1, 1]} : vector<8x32xf32> to vector<8x8xf32>
    %cst_134 = arith.constant 0.353553385 : f32
    %324 = vector.broadcast %cst_134 : f32 to vector<8x8xf32>
    %325 = arith.mulf %323, %324 : vector<8x8xf32>
    %326 = vector.extract_strided_slice %250 {offsets = [0, 24], sizes = [8, 8], strides = [1, 1]} : vector<8x32xf32> to vector<8x8xf32>
    %cst_135 = arith.constant dense<0.000000e+00> : vector<8x8xf32>
    %327 = tpu.matmul %325, %326, %cst_135 {dimension_numbers = #tpu.dot_dimension_numbers<[1], [1], [0], [0], [0, 0, 1, 0], [], []>} : vector<8x8xf32>, vector<8x8xf32>, vector<8x8xf32> -> vector<8x8xf32>
    %328 = vector.broadcast %29 : vector<1x8xf32> to vector<8x8xf32>
    %329 = arith.addf %327, %328 : vector<8x8xf32>
    %cst_136 = arith.constant dense<0xFF800000> : vector<8xf32>
    %330 = vector.multi_reduction <maximumf>, %329, %cst_136 [1] : vector<8x8xf32> to vector<8xf32>
    %331 = vector.shape_cast %330 : vector<8xf32> to vector<8x1xf32>
    %332 = vector.broadcast %331 : vector<8x1xf32> to vector<8x8xf32>
    %333 = arith.subf %329, %332 : vector<8x8xf32>
    %334 = math.exp %333 : vector<8x8xf32>
    %cst_137 = arith.constant dense<0.000000e+00> : vector<8xf32>
    %335 = vector.multi_reduction <add>, %334, %cst_137 [1] : vector<8x8xf32> to vector<8xf32>
    %336 = vector.shape_cast %335 : vector<8xf32> to vector<8x1xf32>
    %337 = tpu.reciprocal %336 {approx = true} : vector<8x1xf32> -> vector<8x1xf32>
    %338 = vector.broadcast %337 : vector<8x1xf32> to vector<8x8xf32>
    %339 = arith.mulf %334, %338 : vector<8x8xf32>
    %340 = vector.extract_strided_slice %251 {offsets = [0, 24], sizes = [8, 8], strides = [1, 1]} : vector<8x32xf32> to vector<8x8xf32>
    %cst_138 = arith.constant dense<0.000000e+00> : vector<8x8xf32>
    %341 = tpu.matmul %339, %340, %cst_138 {dimension_numbers = #tpu.dot_dimension_numbers<[1], [0], [0], [1], [0, 0, 1, 1], [], []>} : vector<8x8xf32>, vector<8x8xf32>, vector<8x8xf32> -> vector<8x8xf32>
    %342 = vector.extract_strided_slice %253 {offsets = [24, 0], sizes = [8, 32], strides = [1, 1]} : vector<32x32xf32> to vector<8x32xf32>
    %cst_139 = arith.constant dense<0.000000e+00> : vector<8x32xf32>
    %343 = tpu.matmul %341, %342, %cst_139 {dimension_numbers = #tpu.dot_dimension_numbers<[1], [0], [0], [1], [0, 0, 1, 1], [], []>} : vector<8x8xf32>, vector<8x32xf32>, vector<8x32xf32> -> vector<8x32xf32>
    %344 = arith.addf %322, %343 : vector<8x32xf32>
    %345 = arith.addf %241, %344 : vector<8x32xf32>
    %c1_140 = arith.constant 1 : index
    %c0_141 = arith.constant 0 : index
    %c0_142 = arith.constant 0 : index
    %346 = vector.load %arg10[%c1_140, %c0_141, %c0_142] : memref<2x1x32xf32, #tpu.memory_space<vmem>>, vector<1x1x32xf32>
    %347 = vector.shape_cast %346 : vector<1x1x32xf32> to vector<1x32xf32>
    %c1_143 = arith.constant 1 : index
    %c0_144 = arith.constant 0 : index
    %c0_145 = arith.constant 0 : index
    %348 = vector.load %arg11[%c1_143, %c0_144, %c0_145] : memref<2x1x32xf32, #tpu.memory_space<vmem>>, vector<1x1x32xf32>
    %349 = vector.shape_cast %348 : vector<1x1x32xf32> to vector<1x32xf32>
    %cst_146 = arith.constant dense<0.000000e+00> : vector<8xf32>
    %350 = vector.multi_reduction <add>, %345, %cst_146 [1] : vector<8x32xf32> to vector<8xf32>
    %351 = vector.shape_cast %350 : vector<8xf32> to vector<8x1xf32>
    %cst_147 = arith.constant 3.200000e+01 : f32
    %352 = vector.broadcast %cst_147 : f32 to vector<8x1xf32>
    %353 = arith.divf %351, %352 : vector<8x1xf32>
    %354 = vector.broadcast %353 : vector<8x1xf32> to vector<8x32xf32>
    %355 = arith.subf %345, %354 : vector<8x32xf32>
    %356 = arith.mulf %355, %355 : vector<8x32xf32>
    %cst_148 = arith.constant dense<0.000000e+00> : vector<8xf32>
    %357 = vector.multi_reduction <add>, %356, %cst_148 [1] : vector<8x32xf32> to vector<8xf32>
    %358 = vector.shape_cast %357 : vector<8xf32> to vector<8x1xf32>
    %cst_149 = arith.constant 3.200000e+01 : f32
    %359 = vector.broadcast %cst_149 : f32 to vector<8x1xf32>
    %360 = arith.divf %358, %359 : vector<8x1xf32>
    %361 = vector.broadcast %353 : vector<8x1xf32> to vector<8x32xf32>
    %362 = arith.subf %345, %361 : vector<8x32xf32>
    %cst_150 = arith.constant 9.99999974E-6 : f32
    %363 = vector.broadcast %cst_150 : f32 to vector<8x1xf32>
    %364 = arith.addf %360, %363 : vector<8x1xf32>
    %365 = math.rsqrt %364 : vector<8x1xf32>
    %366 = vector.broadcast %365 : vector<8x1xf32> to vector<8x32xf32>
    %367 = arith.mulf %362, %366 : vector<8x32xf32>
    %368 = vector.broadcast %347 : vector<1x32xf32> to vector<8x32xf32>
    %369 = arith.mulf %367, %368 : vector<8x32xf32>
    %370 = vector.broadcast %349 : vector<1x32xf32> to vector<8x32xf32>
    %371 = arith.addf %369, %370 : vector<8x32xf32>
    %c1_151 = arith.constant 1 : index
    %c0_152 = arith.constant 0 : index
    %c0_153 = arith.constant 0 : index
    %372 = vector.load %arg12[%c1_151, %c0_152, %c0_153] : memref<2x32x64xf32, #tpu.memory_space<vmem>>, vector<1x32x64xf32>
    %373 = vector.shape_cast %372 : vector<1x32x64xf32> to vector<32x64xf32>
    %cst_154 = arith.constant dense<0.000000e+00> : vector<8x64xf32>
    %374 = tpu.matmul %371, %373, %cst_154 {dimension_numbers = #tpu.dot_dimension_numbers<[1], [0], [0], [1], [0, 0, 1, 1], [], []>} : vector<8x32xf32>, vector<32x64xf32>, vector<8x64xf32> -> vector<8x64xf32>
    %c1_155 = arith.constant 1 : index
    %c0_156 = arith.constant 0 : index
    %c0_157 = arith.constant 0 : index
    %375 = vector.load %arg13[%c1_155, %c0_156, %c0_157] : memref<2x1x64xf32, #tpu.memory_space<vmem>>, vector<1x1x64xf32>
    %376 = vector.shape_cast %375 : vector<1x1x64xf32> to vector<1x64xf32>
    %377 = vector.broadcast %376 : vector<1x64xf32> to vector<8x64xf32>
    %378 = arith.addf %374, %377 : vector<8x64xf32>
    %cst_158 = arith.constant 5.000000e-01 : f32
    %379 = vector.broadcast %cst_158 : f32 to vector<8x64xf32>
    %380 = arith.mulf %379, %378 : vector<8x64xf32>
    %cst_159 = arith.constant 0.707106769 : f32
    %381 = vector.broadcast %cst_159 : f32 to vector<8x64xf32>
    %382 = arith.mulf %378, %381 : vector<8x64xf32>
    %cst_160 = arith.constant 0.000000e+00 : f32
    %383 = vector.broadcast %cst_160 : f32 to vector<8x64xf32>
    %384 = arith.cmpf oge, %382, %383 : vector<8x64xf32>
    %cst_161 = arith.constant 1.000000e+00 : f32
    %cst_162 = arith.constant -1.000000e+00 : f32
    %385 = vector.broadcast %cst_161 : f32 to vector<8x64xf32>
    %386 = vector.broadcast %cst_162 : f32 to vector<8x64xf32>
    %387 = arith.select %384, %385, %386 : vector<8x64xi1>, vector<8x64xf32>
    %388 = math.absf %382 : vector<8x64xf32>
    %cst_163 = arith.constant 0.327591091 : f32
    %389 = vector.broadcast %cst_163 : f32 to vector<8x64xf32>
    %390 = arith.mulf %389, %388 : vector<8x64xf32>
    %cst_164 = arith.constant 1.000000e+00 : f32
    %391 = vector.broadcast %cst_164 : f32 to vector<8x64xf32>
    %392 = arith.addf %391, %390 : vector<8x64xf32>
    %cst_165 = arith.constant 1.000000e+00 : f32
    %393 = vector.broadcast %cst_165 : f32 to vector<8x64xf32>
    %394 = arith.divf %393, %392 : vector<8x64xf32>
    %cst_166 = arith.constant 1.06140542 : f32
    %395 = vector.broadcast %cst_166 : f32 to vector<8x64xf32>
    %396 = arith.mulf %395, %394 : vector<8x64xf32>
    %cst_167 = arith.constant -1.45315206 : f32
    %397 = vector.broadcast %cst_167 : f32 to vector<8x64xf32>
    %398 = arith.addf %396, %397 : vector<8x64xf32>
    %399 = arith.mulf %398, %394 : vector<8x64xf32>
    %cst_168 = arith.constant 1.42141378 : f32
    %400 = vector.broadcast %cst_168 : f32 to vector<8x64xf32>
    %401 = arith.addf %399, %400 : vector<8x64xf32>
    %402 = arith.mulf %401, %394 : vector<8x64xf32>
    %cst_169 = arith.constant -0.284496725 : f32
    %403 = vector.broadcast %cst_169 : f32 to vector<8x64xf32>
    %404 = arith.addf %402, %403 : vector<8x64xf32>
    %405 = arith.mulf %404, %394 : vector<8x64xf32>
    %cst_170 = arith.constant 0.254829586 : f32
    %406 = vector.broadcast %cst_170 : f32 to vector<8x64xf32>
    %407 = arith.addf %405, %406 : vector<8x64xf32>
    %408 = arith.mulf %407, %394 : vector<8x64xf32>
    %cst_171 = arith.constant 0.000000e+00 : f32
    %409 = vector.broadcast %cst_171 : f32 to vector<8x64xf32>
    %410 = arith.subf %409, %388 : vector<8x64xf32>
    %411 = arith.mulf %410, %388 : vector<8x64xf32>
    %412 = math.exp %411 : vector<8x64xf32>
    %413 = arith.mulf %408, %412 : vector<8x64xf32>
    %cst_172 = arith.constant 1.000000e+00 : f32
    %414 = vector.broadcast %cst_172 : f32 to vector<8x64xf32>
    %415 = arith.subf %414, %413 : vector<8x64xf32>
    %416 = arith.mulf %387, %415 : vector<8x64xf32>
    %cst_173 = arith.constant 1.000000e+00 : f32
    %417 = vector.broadcast %cst_173 : f32 to vector<8x64xf32>
    %418 = arith.addf %417, %416 : vector<8x64xf32>
    %419 = arith.mulf %380, %418 : vector<8x64xf32>
    %c1_174 = arith.constant 1 : index
    %c0_175 = arith.constant 0 : index
    %c0_176 = arith.constant 0 : index
    %420 = vector.load %arg14[%c1_174, %c0_175, %c0_176] : memref<2x64x32xf32, #tpu.memory_space<vmem>>, vector<1x64x32xf32>
    %421 = vector.shape_cast %420 : vector<1x64x32xf32> to vector<64x32xf32>
    %cst_177 = arith.constant dense<0.000000e+00> : vector<8x32xf32>
    %422 = tpu.matmul %419, %421, %cst_177 {dimension_numbers = #tpu.dot_dimension_numbers<[1], [0], [0], [1], [0, 0, 1, 1], [], []>} : vector<8x64xf32>, vector<64x32xf32>, vector<8x32xf32> -> vector<8x32xf32>
    %c1_178 = arith.constant 1 : index
    %c0_179 = arith.constant 0 : index
    %c0_180 = arith.constant 0 : index
    %423 = vector.load %arg15[%c1_178, %c0_179, %c0_180] : memref<2x1x32xf32, #tpu.memory_space<vmem>>, vector<1x1x32xf32>
    %424 = vector.shape_cast %423 : vector<1x1x32xf32> to vector<1x32xf32>
    %425 = vector.broadcast %424 : vector<1x32xf32> to vector<8x32xf32>
    %426 = arith.addf %422, %425 : vector<8x32xf32>
    %427 = arith.addf %371, %426 : vector<8x32xf32>
    %c1_181 = arith.constant 1 : index
    %c0_182 = arith.constant 0 : index
    %c0_183 = arith.constant 0 : index
    %428 = vector.load %arg16[%c1_181, %c0_182, %c0_183] : memref<2x1x32xf32, #tpu.memory_space<vmem>>, vector<1x1x32xf32>
    %429 = vector.shape_cast %428 : vector<1x1x32xf32> to vector<1x32xf32>
    %c1_184 = arith.constant 1 : index
    %c0_185 = arith.constant 0 : index
    %c0_186 = arith.constant 0 : index
    %430 = vector.load %arg17[%c1_184, %c0_185, %c0_186] : memref<2x1x32xf32, #tpu.memory_space<vmem>>, vector<1x1x32xf32>
    %431 = vector.shape_cast %430 : vector<1x1x32xf32> to vector<1x32xf32>
    %cst_187 = arith.constant dense<0.000000e+00> : vector<8xf32>
    %432 = vector.multi_reduction <add>, %427, %cst_187 [1] : vector<8x32xf32> to vector<8xf32>
    %433 = vector.shape_cast %432 : vector<8xf32> to vector<8x1xf32>
    %cst_188 = arith.constant 3.200000e+01 : f32
    %434 = vector.broadcast %cst_188 : f32 to vector<8x1xf32>
    %435 = arith.divf %433, %434 : vector<8x1xf32>
    %436 = vector.broadcast %435 : vector<8x1xf32> to vector<8x32xf32>
    %437 = arith.subf %427, %436 : vector<8x32xf32>
    %438 = arith.mulf %437, %437 : vector<8x32xf32>
    %cst_189 = arith.constant dense<0.000000e+00> : vector<8xf32>
    %439 = vector.multi_reduction <add>, %438, %cst_189 [1] : vector<8x32xf32> to vector<8xf32>
    %440 = vector.shape_cast %439 : vector<8xf32> to vector<8x1xf32>
    %cst_190 = arith.constant 3.200000e+01 : f32
    %441 = vector.broadcast %cst_190 : f32 to vector<8x1xf32>
    %442 = arith.divf %440, %441 : vector<8x1xf32>
    %443 = vector.broadcast %435 : vector<8x1xf32> to vector<8x32xf32>
    %444 = arith.subf %427, %443 : vector<8x32xf32>
    %cst_191 = arith.constant 9.99999974E-6 : f32
    %445 = vector.broadcast %cst_191 : f32 to vector<8x1xf32>
    %446 = arith.addf %442, %445 : vector<8x1xf32>
    %447 = math.rsqrt %446 : vector<8x1xf32>
    %448 = vector.broadcast %447 : vector<8x1xf32> to vector<8x32xf32>
    %449 = arith.mulf %444, %448 : vector<8x32xf32>
    %450 = vector.broadcast %429 : vector<1x32xf32> to vector<8x32xf32>
    %451 = arith.mulf %449, %450 : vector<8x32xf32>
    %452 = vector.broadcast %431 : vector<1x32xf32> to vector<8x32xf32>
    %453 = arith.addf %451, %452 : vector<8x32xf32>
    %c0_192 = arith.constant 0 : index
    %c0_193 = arith.constant 0 : index
    %c0_194 = arith.constant 0 : index
    %454 = vector.load %arg18[%c0_192, %c0_193, %c0_194] : memref<1x8x32xf32, #tpu.memory_space<vmem>>, vector<1x8x32xf32>
    %455 = vector.shape_cast %454 : vector<1x8x32xf32> to vector<8x32xf32>
    %456 = vector.shape_cast %453 : vector<8x32xf32> to vector<1x8x32xf32>
    tpu.vector_store %arg18[%c0_192, %c0_193, %c0_194], %456 {strides = array<i32>} : memref<1x8x32xf32, #tpu.memory_space<vmem>>, vector<1x8x32xf32>,
    return
  }
  func.func @transform_0(%arg0: i32) -> (i32, i32, i32) {
    %c0_i32 = arith.constant 0 : i32
    %c0_i32_0 = arith.constant 0 : i32
    %c0_i32_1 = arith.constant 0 : i32
    return %arg0, %c0_i32, %c0_i32_0 : i32, i32, i32
  }
  func.func @transform_1(%arg0: i32) -> (i32, i32) {
    %c0_i32 = arith.constant 0 : i32
    %c0_i32_0 = arith.constant 0 : i32
    %c0_i32_1 = arith.constant 0 : i32
    return %c0_i32, %c0_i32_0 : i32, i32
  }
  func.func @transform_2(%arg0: i32) -> (i32, i32) {
    %c0_i32 = arith.constant 0 : i32
    %c0_i32_0 = arith.constant 0 : i32
    %c0_i32_1 = arith.constant 0 : i32
    return %c0_i32, %c0_i32_0 : i32, i32
  }
  func.func @transform_3(%arg0: i32) -> (i32, i32) {
    %c0_i32 = arith.constant 0 : i32
    %c0_i32_0 = arith.constant 0 : i32
    %c0_i32_1 = arith.constant 0 : i32
    return %c0_i32, %c0_i32_0 : i32, i32
  }
  func.func @transform_4(%arg0: i32) -> (i32, i32, i32) {
    %c0_i32 = arith.constant 0 : i32
    %c0_i32_0 = arith.constant 0 : i32
    %c0_i32_1 = arith.constant 0 : i32
    return %arg0, %c0_i32, %c0_i32_0 : i32, i32, i32
  }
  func.func @transform_5(%arg0: i32) -> (i32, i32, i32) {
    %c0_i32 = arith.constant 0 : i32
    %c0_i32_0 = arith.constant 0 : i32
    %c0_i32_1 = arith.constant 0 : i32
    %c0_i32_2 = arith.constant 0 : i32
    return %c0_i32, %c0_i32_0, %c0_i32_1 : i32, i32, i32
  }
  func.func @transform_6(%arg0: i32) -> (i32, i32, i32) {
    %c0_i32 = arith.constant 0 : i32
    %c0_i32_0 = arith.constant 0 : i32
    %c0_i32_1 = arith.constant 0 : i32
    %c0_i32_2 = arith.constant 0 : i32
    return %c0_i32, %c0_i32_0, %c0_i32_1 : i32, i32, i32
  }
  func.func @transform_7(%arg0: i32) -> (i32, i32, i32) {
    %c0_i32 = arith.constant 0 : i32
    %c0_i32_0 = arith.constant 0 : i32
    %c0_i32_1 = arith.constant 0 : i32
    %c0_i32_2 = arith.constant 0 : i32
    return %c0_i32, %c0_i32_0, %c0_i32_1 : i32, i32, i32
  }
  func.func @transform_8(%arg0: i32) -> (i32, i32, i32) {
    %c0_i32 = arith.constant 0 : i32
    %c0_i32_0 = arith.constant 0 : i32
    %c0_i32_1 = arith.constant 0 : i32
    %c0_i32_2 = arith.constant 0 : i32
    return %c0_i32, %c0_i32_0, %c0_i32_1 : i32, i32, i32
  }
  func.func @transform_9(%arg0: i32) -> (i32, i32, i32) {
    %c0_i32 = arith.constant 0 : i32
    %c0_i32_0 = arith.constant 0 : i32
    %c0_i32_1 = arith.constant 0 : i32
    %c0_i32_2 = arith.constant 0 : i32
    return %c0_i32, %c0_i32_0, %c0_i32_1 : i32, i32, i32
  }
  func.func @transform_10(%arg0: i32) -> (i32, i32, i32) {
    %c0_i32 = arith.constant 0 : i32
    %c0_i32_0 = arith.constant 0 : i32
    %c0_i32_1 = arith.constant 0 : i32
    %c0_i32_2 = arith.constant 0 : i32
    return %c0_i32, %c0_i32_0, %c0_i32_1 : i32, i32, i32
  }
  func.func @transform_11(%arg0: i32) -> (i32, i32, i32) {
    %c0_i32 = arith.constant 0 : i32
    %c0_i32_0 = arith.constant 0 : i32
    %c0_i32_1 = arith.constant 0 : i32
    %c0_i32_2 = arith.constant 0 : i32
    return %c0_i32, %c0_i32_0, %c0_i32_1 : i32, i32, i32
  }
  func.func @transform_12(%arg0: i32) -> (i32, i32, i32) {
    %c0_i32 = arith.constant 0 : i32
    %c0_i32_0 = arith.constant 0 : i32
    %c0_i32_1 = arith.constant 0 : i32
    %c0_i32_2 = arith.constant 0 : i32
    return %c0_i32, %c0_i32_0, %c0_i32_1 : i32, i32, i32
  }
  func.func @transform_13(%arg0: i32) -> (i32, i32, i32) {
    %c0_i32 = arith.constant 0 : i32
    %c0_i32_0 = arith.constant 0 : i32
    %c0_i32_1 = arith.constant 0 : i32
    %c0_i32_2 = arith.constant 0 : i32
    return %c0_i32, %c0_i32_0, %c0_i32_1 : i32, i32, i32
  }
  func.func @transform_14(%arg0: i32) -> (i32, i32, i32) {
    %c0_i32 = arith.constant 0 : i32
    %c0_i32_0 = arith.constant 0 : i32
    %c0_i32_1 = arith.constant 0 : i32
    %c0_i32_2 = arith.constant 0 : i32
    return %c0_i32, %c0_i32_0, %c0_i32_1 : i32, i32, i32
  }
  func.func @transform_15(%arg0: i32) -> (i32, i32, i32) {
    %c0_i32 = arith.constant 0 : i32
    %c0_i32_0 = arith.constant 0 : i32
    %c0_i32_1 = arith.constant 0 : i32
    %c0_i32_2 = arith.constant 0 : i32
    return %c0_i32, %c0_i32_0, %c0_i32_1 : i32, i32, i32
  }
  func.func @transform_16(%arg0: i32) -> (i32, i32, i32) {
    %c0_i32 = arith.constant 0 : i32
    %c0_i32_0 = arith.constant 0 : i32
    %c0_i32_1 = arith.constant 0 : i32
    %c0_i32_2 = arith.constant 0 : i32
    return %c0_i32, %c0_i32_0, %c0_i32_1 : i32, i32, i32
  }
  func.func @transform_17(%arg0: i32) -> (i32, i32, i32) {
    %c0_i32 = arith.constant 0 : i32
    %c0_i32_0 = arith.constant 0 : i32
    %c0_i32_1 = arith.constant 0 : i32
    return %arg0, %c0_i32, %c0_i32_0 : i32, i32, i32
  }
}

module attributes {stable_mosaic.version = 11 : i64} {
  func.func @_decoder_kernel(%arg0: i32, %arg1: memref<1x8x32xf32, #tpu.memory_space<vmem>>, %arg2: memref<8x32xf32, #tpu.memory_space<vmem>>, %arg3: memref<1x32xf32, #tpu.memory_space<vmem>>, %arg4: memref<1x32xf32, #tpu.memory_space<vmem>>, %arg5: memref<1x8x32xf32, #tpu.memory_space<vmem>>, %arg6: memref<1x1x8xf32, #tpu.memory_space<vmem>>, %arg7: memref<1x1x8xf32, #tpu.memory_space<vmem>>, %arg8: memref<2x32x96xf32, #tpu.memory_space<vmem>>, %arg9: memref<2x1x96xf32, #tpu.memory_space<vmem>>, %arg10: memref<2x32x32xf32, #tpu.memory_space<vmem>>, %arg11: memref<2x1x32xf32, #tpu.memory_space<vmem>>, %arg12: memref<2x1x32xf32, #tpu.memory_space<vmem>>, %arg13: memref<2x1x32xf32, #tpu.memory_space<vmem>>, %arg14: memref<2x32x32xf32, #tpu.memory_space<vmem>>, %arg15: memref<2x1x32xf32, #tpu.memory_space<vmem>>, %arg16: memref<2x32x64xf32, #tpu.memory_space<vmem>>, %arg17: memref<2x1x64xf32, #tpu.memory_space<vmem>>, %arg18: memref<2x32x32xf32, #tpu.memory_space<vmem>>, %arg19: memref<2x1x32xf32, #tpu.memory_space<vmem>>, %arg20: memref<2x1x32xf32, #tpu.memory_space<vmem>>, %arg21: memref<2x1x32xf32, #tpu.memory_space<vmem>>, %arg22: memref<2x32x64xf32, #tpu.memory_space<vmem>>, %arg23: memref<2x1x64xf32, #tpu.memory_space<vmem>>, %arg24: memref<2x64x32xf32, #tpu.memory_space<vmem>>, %arg25: memref<2x1x32xf32, #tpu.memory_space<vmem>>, %arg26: memref<2x1x32xf32, #tpu.memory_space<vmem>>, %arg27: memref<2x1x32xf32, #tpu.memory_space<vmem>>, %arg28: memref<128x32xf32, #tpu.memory_space<vmem>>, %arg29: memref<1x128xf32, #tpu.memory_space<vmem>>, %arg30: memref<1x8x128xf32, #tpu.memory_space<vmem>>) attributes {dimension_semantics = [#tpu.dimension_semantics<parallel>], iteration_bounds = array<i64: 2>, scalar_prefetch = 0 : i64, scratch_operands = 0 : i64, tpu.core_type = #tpu.core_type<tc>, window_params = [{transform_indices = @transform_0, window_bounds = array<i64: 1, 8, 32>}, {pipeline_mode = #tpu.pipeline_mode<synchronous>, transform_indices = @transform_1, window_bounds = array<i64: 8, 32>}, {pipeline_mode = #tpu.pipeline_mode<synchronous>, transform_indices = @transform_2, window_bounds = array<i64: 1, 32>}, {pipeline_mode = #tpu.pipeline_mode<synchronous>, transform_indices = @transform_3, window_bounds = array<i64: 1, 32>}, {transform_indices = @transform_4, window_bounds = array<i64: 1, 8, 32>}, {transform_indices = @transform_5, window_bounds = array<i64: 1, 1, 8>}, {transform_indices = @transform_6, window_bounds = array<i64: 1, 1, 8>}, {pipeline_mode = #tpu.pipeline_mode<synchronous>, transform_indices = @transform_7, window_bounds = array<i64: 2, 32, 96>}, {pipeline_mode = #tpu.pipeline_mode<synchronous>, transform_indices = @transform_8, window_bounds = array<i64: 2, 1, 96>}, {pipeline_mode = #tpu.pipeline_mode<synchronous>, transform_indices = @transform_9, window_bounds = array<i64: 2, 32, 32>}, {pipeline_mode = #tpu.pipeline_mode<synchronous>, transform_indices = @transform_10, window_bounds = array<i64: 2, 1, 32>}, {pipeline_mode = #tpu.pipeline_mode<synchronous>, transform_indices = @transform_11, window_bounds = array<i64: 2, 1, 32>}, {pipeline_mode = #tpu.pipeline_mode<synchronous>, transform_indices = @transform_12, window_bounds = array<i64: 2, 1, 32>}, {pipeline_mode = #tpu.pipeline_mode<synchronous>, transform_indices = @transform_13, window_bounds = array<i64: 2, 32, 32>}, {pipeline_mode = #tpu.pipeline_mode<synchronous>, transform_indices = @transform_14, window_bounds = array<i64: 2, 1, 32>}, {pipeline_mode = #tpu.pipeline_mode<synchronous>, transform_indices = @transform_15, window_bounds = array<i64: 2, 32, 64>}, {pipeline_mode = #tpu.pipeline_mode<synchronous>, transform_indices = @transform_16, window_bounds = array<i64: 2, 1, 64>}, {pipeline_mode = #tpu.pipeline_mode<synchronous>, transform_indices = @transform_17, window_bounds = array<i64: 2, 32, 32>}, {pipeline_mode = #tpu.pipeline_mode<synchronous>, transform_indices = @transform_18, window_bounds = array<i64: 2, 1, 32>}, {pipeline_mode = #tpu.pipeline_mode<synchronous>, transform_indices = @transform_19, window_bounds = array<i64: 2, 1, 32>}, {pipeline_mode = #tpu.pipeline_mode<synchronous>, transform_indices = @transform_20, window_bounds = array<i64: 2, 1, 32>}, {pipeline_mode = #tpu.pipeline_mode<synchronous>, transform_indices = @transform_21, window_bounds = array<i64: 2, 32, 64>}, {pipeline_mode = #tpu.pipeline_mode<synchronous>, transform_indices = @transform_22, window_bounds = array<i64: 2, 1, 64>}, {pipeline_mode = #tpu.pipeline_mode<synchronous>, transform_indices = @transform_23, window_bounds = array<i64: 2, 64, 32>}, {pipeline_mode = #tpu.pipeline_mode<synchronous>, transform_indices = @transform_24, window_bounds = array<i64: 2, 1, 32>}, {pipeline_mode = #tpu.pipeline_mode<synchronous>, transform_indices = @transform_25, window_bounds = array<i64: 2, 1, 32>}, {pipeline_mode = #tpu.pipeline_mode<synchronous>, transform_indices = @transform_26, window_bounds = array<i64: 2, 1, 32>}, {pipeline_mode = #tpu.pipeline_mode<synchronous>, transform_indices = @transform_27, window_bounds = array<i64: 128, 32>}, {pipeline_mode = #tpu.pipeline_mode<synchronous>, transform_indices = @transform_28, window_bounds = array<i64: 1, 128>}, {transform_indices = @transform_29, window_bounds = array<i64: 1, 8, 128>}]} {
    %c0 = arith.constant 0 : index
    %c0_0 = arith.constant 0 : index
    %c0_1 = arith.constant 0 : index
    %0 = vector.load %arg1[%c0, %c0_0, %c0_1] : memref<1x8x32xf32, #tpu.memory_space<vmem>>, vector<1x8x32xf32>
    %1 = vector.shape_cast %0 : vector<1x8x32xf32> to vector<8x32xf32>
    %c0_2 = arith.constant 0 : index
    %c0_3 = arith.constant 0 : index
    %2 = vector.load %arg2[%c0_2, %c0_3] : memref<8x32xf32, #tpu.memory_space<vmem>>, vector<8x32xf32>
    %3 = arith.addf %1, %2 : vector<8x32xf32>
    %c0_4 = arith.constant 0 : index
    %c0_5 = arith.constant 0 : index
    %4 = vector.load %arg3[%c0_4, %c0_5] : memref<1x32xf32, #tpu.memory_space<vmem>>, vector<1x32xf32>
    %c0_6 = arith.constant 0 : index
    %c0_7 = arith.constant 0 : index
    %5 = vector.load %arg4[%c0_6, %c0_7] : memref<1x32xf32, #tpu.memory_space<vmem>>, vector<1x32xf32>
    %cst = arith.constant dense<0.000000e+00> : vector<8xf32>
    %6 = vector.multi_reduction <add>, %3, %cst [1] : vector<8x32xf32> to vector<8xf32>
    %7 = vector.shape_cast %6 : vector<8xf32> to vector<8x1xf32>
    %cst_8 = arith.constant 3.200000e+01 : f32
    %8 = vector.broadcast %cst_8 : f32 to vector<8x1xf32>
    %9 = arith.divf %7, %8 : vector<8x1xf32>
    %10 = vector.broadcast %9 : vector<8x1xf32> to vector<8x32xf32>
    %11 = arith.subf %3, %10 : vector<8x32xf32>
    %12 = arith.mulf %11, %11 : vector<8x32xf32>
    %cst_9 = arith.constant dense<0.000000e+00> : vector<8xf32>
    %13 = vector.multi_reduction <add>, %12, %cst_9 [1] : vector<8x32xf32> to vector<8xf32>
    %14 = vector.shape_cast %13 : vector<8xf32> to vector<8x1xf32>
    %cst_10 = arith.constant 3.200000e+01 : f32
    %15 = vector.broadcast %cst_10 : f32 to vector<8x1xf32>
    %16 = arith.divf %14, %15 : vector<8x1xf32>
    %17 = vector.broadcast %9 : vector<8x1xf32> to vector<8x32xf32>
    %18 = arith.subf %3, %17 : vector<8x32xf32>
    %cst_11 = arith.constant 9.99999974E-6 : f32
    %19 = vector.broadcast %cst_11 : f32 to vector<8x1xf32>
    %20 = arith.addf %16, %19 : vector<8x1xf32>
    %21 = math.rsqrt %20 : vector<8x1xf32>
    %22 = vector.broadcast %21 : vector<8x1xf32> to vector<8x32xf32>
    %23 = arith.mulf %18, %22 : vector<8x32xf32>
    %24 = vector.broadcast %4 : vector<1x32xf32> to vector<8x32xf32>
    %25 = arith.mulf %23, %24 : vector<8x32xf32>
    %26 = vector.broadcast %5 : vector<1x32xf32> to vector<8x32xf32>
    %27 = arith.addf %25, %26 : vector<8x32xf32>
    %c0_12 = arith.constant 0 : index
    %c0_13 = arith.constant 0 : index
    %c0_14 = arith.constant 0 : index
    %28 = vector.load %arg5[%c0_12, %c0_13, %c0_14] : memref<1x8x32xf32, #tpu.memory_space<vmem>>, vector<1x8x32xf32>
    %29 = vector.shape_cast %28 : vector<1x8x32xf32> to vector<8x32xf32>
    %30 = tpu.iota {dimensions = array<i32: 0>} : vector<8x8xi32>
    %31 = tpu.iota {dimensions = array<i32: 1>} : vector<8x8xi32>
    %32 = arith.cmpi sge, %30, %31 : vector<8x8xi32>
    %cst_15 = arith.constant 0.000000e+00 : f32
    %cst_16 = arith.constant -1.000000e+09 : f32
    %33 = vector.broadcast %cst_15 : f32 to vector<8x8xf32>
    %34 = vector.broadcast %cst_16 : f32 to vector<8x8xf32>
    %35 = arith.select %32, %33, %34 : vector<8x8xi1>, vector<8x8xf32>
    %c0_17 = arith.constant 0 : index
    %c0_18 = arith.constant 0 : index
    %c0_19 = arith.constant 0 : index
    %36 = vector.load %arg6[%c0_17, %c0_18, %c0_19] : memref<1x1x8xf32, #tpu.memory_space<vmem>>, vector<1x1x8xf32>
    %37 = vector.shape_cast %36 : vector<1x1x8xf32> to vector<1x8xf32>
    %38 = vector.broadcast %37 : vector<1x8xf32> to vector<8x8xf32>
    %39 = arith.addf %35, %38 : vector<8x8xf32>
    %c0_20 = arith.constant 0 : index
    %c0_21 = arith.constant 0 : index
    %c0_22 = arith.constant 0 : index
    %40 = vector.load %arg7[%c0_20, %c0_21, %c0_22] : memref<1x1x8xf32, #tpu.memory_space<vmem>>, vector<1x1x8xf32>
    %41 = vector.shape_cast %40 : vector<1x1x8xf32> to vector<1x8xf32>
    %c0_23 = arith.constant 0 : index
    %c0_24 = arith.constant 0 : index
    %c0_25 = arith.constant 0 : index
    %42 = vector.load %arg8[%c0_23, %c0_24, %c0_25] : memref<2x32x96xf32, #tpu.memory_space<vmem>>, vector<1x32x96xf32>
    %43 = vector.shape_cast %42 : vector<1x32x96xf32> to vector<32x96xf32>
    %cst_26 = arith.constant dense<0.000000e+00> : vector<8x96xf32>
    %44 = tpu.matmul %27, %43, %cst_26 {dimension_numbers = #tpu.dot_dimension_numbers<[1], [0], [0], [1], [0, 0, 1, 1], [], []>} : vector<8x32xf32>, vector<32x96xf32>, vector<8x96xf32> -> vector<8x96xf32>
    %c0_27 = arith.constant 0 : index
    %c0_28 = arith.constant 0 : index
    %c0_29 = arith.constant 0 : index
    %45 = vector.load %arg9[%c0_27, %c0_28, %c0_29] : memref<2x1x96xf32, #tpu.memory_space<vmem>>, vector<1x1x96xf32>
    %46 = vector.shape_cast %45 : vector<1x1x96xf32> to vector<1x96xf32>
    %47 = vector.broadcast %46 : vector<1x96xf32> to vector<8x96xf32>
    %48 = arith.addf %44, %47 : vector<8x96xf32>
    %49 = vector.extract_strided_slice %48 {offsets = [0, 0], sizes = [8, 32], strides = [1, 1]} : vector<8x96xf32> to vector<8x32xf32>
    %50 = vector.extract_strided_slice %48 {offsets = [0, 32], sizes = [8, 32], strides = [1, 1]} : vector<8x96xf32> to vector<8x32xf32>
    %51 = vector.extract_strided_slice %48 {offsets = [0, 64], sizes = [8, 32], strides = [1, 1]} : vector<8x96xf32> to vector<8x32xf32>
    %c0_30 = arith.constant 0 : index
    %c0_31 = arith.constant 0 : index
    %c0_32 = arith.constant 0 : index
    %52 = vector.load %arg10[%c0_30, %c0_31, %c0_32] : memref<2x32x32xf32, #tpu.memory_space<vmem>>, vector<1x32x32xf32>
    %53 = vector.shape_cast %52 : vector<1x32x32xf32> to vector<32x32xf32>
    %c0_33 = arith.constant 0 : index
    %c0_34 = arith.constant 0 : index
    %c0_35 = arith.constant 0 : index
    %54 = vector.load %arg11[%c0_33, %c0_34, %c0_35] : memref<2x1x32xf32, #tpu.memory_space<vmem>>, vector<1x1x32xf32>
    %55 = vector.shape_cast %54 : vector<1x1x32xf32> to vector<1x32xf32>
    %56 = vector.extract_strided_slice %49 {offsets = [0, 0], sizes = [8, 8], strides = [1, 1]} : vector<8x32xf32> to vector<8x8xf32>
    %cst_36 = arith.constant 0.353553385 : f32
    %57 = vector.broadcast %cst_36 : f32 to vector<8x8xf32>
    %58 = arith.mulf %56, %57 : vector<8x8xf32>
    %59 = vector.extract_strided_slice %50 {offsets = [0, 0], sizes = [8, 8], strides = [1, 1]} : vector<8x32xf32> to vector<8x8xf32>
    %cst_37 = arith.constant dense<0.000000e+00> : vector<8x8xf32>
    %60 = tpu.matmul %58, %59, %cst_37 {dimension_numbers = #tpu.dot_dimension_numbers<[1], [1], [0], [0], [0, 0, 1, 0], [], []>} : vector<8x8xf32>, vector<8x8xf32>, vector<8x8xf32> -> vector<8x8xf32>
    %61 = arith.addf %60, %39 : vector<8x8xf32>
    %cst_38 = arith.constant dense<0xFF800000> : vector<8xf32>
    %62 = vector.multi_reduction <maximumf>, %61, %cst_38 [1] : vector<8x8xf32> to vector<8xf32>
    %63 = vector.shape_cast %62 : vector<8xf32> to vector<8x1xf32>
    %64 = vector.broadcast %63 : vector<8x1xf32> to vector<8x8xf32>
    %65 = arith.subf %61, %64 : vector<8x8xf32>
    %66 = math.exp %65 : vector<8x8xf32>
    %cst_39 = arith.constant dense<0.000000e+00> : vector<8xf32>
    %67 = vector.multi_reduction <add>, %66, %cst_39 [1] : vector<8x8xf32> to vector<8xf32>
    %68 = vector.shape_cast %67 : vector<8xf32> to vector<8x1xf32>
    %69 = tpu.reciprocal %68 {approx = true} : vector<8x1xf32> -> vector<8x1xf32>
    %70 = vector.broadcast %69 : vector<8x1xf32> to vector<8x8xf32>
    %71 = arith.mulf %66, %70 : vector<8x8xf32>
    %72 = vector.extract_strided_slice %51 {offsets = [0, 0], sizes = [8, 8], strides = [1, 1]} : vector<8x32xf32> to vector<8x8xf32>
    %cst_40 = arith.constant dense<0.000000e+00> : vector<8x8xf32>
    %73 = tpu.matmul %71, %72, %cst_40 {dimension_numbers = #tpu.dot_dimension_numbers<[1], [0], [0], [1], [0, 0, 1, 1], [], []>} : vector<8x8xf32>, vector<8x8xf32>, vector<8x8xf32> -> vector<8x8xf32>
    %74 = vector.extract_strided_slice %53 {offsets = [0, 0], sizes = [8, 32], strides = [1, 1]} : vector<32x32xf32> to vector<8x32xf32>
    %cst_41 = arith.constant dense<0.000000e+00> : vector<8x32xf32>
    %75 = tpu.matmul %73, %74, %cst_41 {dimension_numbers = #tpu.dot_dimension_numbers<[1], [0], [0], [1], [0, 0, 1, 1], [], []>} : vector<8x8xf32>, vector<8x32xf32>, vector<8x32xf32> -> vector<8x32xf32>
    %76 = vector.broadcast %55 : vector<1x32xf32> to vector<8x32xf32>
    %77 = arith.addf %76, %75 : vector<8x32xf32>
    %78 = vector.extract_strided_slice %49 {offsets = [0, 8], sizes = [8, 8], strides = [1, 1]} : vector<8x32xf32> to vector<8x8xf32>
    %cst_42 = arith.constant 0.353553385 : f32
    %79 = vector.broadcast %cst_42 : f32 to vector<8x8xf32>
    %80 = arith.mulf %78, %79 : vector<8x8xf32>
    %81 = vector.extract_strided_slice %50 {offsets = [0, 8], sizes = [8, 8], strides = [1, 1]} : vector<8x32xf32> to vector<8x8xf32>
    %cst_43 = arith.constant dense<0.000000e+00> : vector<8x8xf32>
    %82 = tpu.matmul %80, %81, %cst_43 {dimension_numbers = #tpu.dot_dimension_numbers<[1], [1], [0], [0], [0, 0, 1, 0], [], []>} : vector<8x8xf32>, vector<8x8xf32>, vector<8x8xf32> -> vector<8x8xf32>
    %83 = arith.addf %82, %39 : vector<8x8xf32>
    %cst_44 = arith.constant dense<0xFF800000> : vector<8xf32>
    %84 = vector.multi_reduction <maximumf>, %83, %cst_44 [1] : vector<8x8xf32> to vector<8xf32>
    %85 = vector.shape_cast %84 : vector<8xf32> to vector<8x1xf32>
    %86 = vector.broadcast %85 : vector<8x1xf32> to vector<8x8xf32>
    %87 = arith.subf %83, %86 : vector<8x8xf32>
    %88 = math.exp %87 : vector<8x8xf32>
    %cst_45 = arith.constant dense<0.000000e+00> : vector<8xf32>
    %89 = vector.multi_reduction <add>, %88, %cst_45 [1] : vector<8x8xf32> to vector<8xf32>
    %90 = vector.shape_cast %89 : vector<8xf32> to vector<8x1xf32>
    %91 = tpu.reciprocal %90 {approx = true} : vector<8x1xf32> -> vector<8x1xf32>
    %92 = vector.broadcast %91 : vector<8x1xf32> to vector<8x8xf32>
    %93 = arith.mulf %88, %92 : vector<8x8xf32>
    %94 = vector.extract_strided_slice %51 {offsets = [0, 8], sizes = [8, 8], strides = [1, 1]} : vector<8x32xf32> to vector<8x8xf32>
    %cst_46 = arith.constant dense<0.000000e+00> : vector<8x8xf32>
    %95 = tpu.matmul %93, %94, %cst_46 {dimension_numbers = #tpu.dot_dimension_numbers<[1], [0], [0], [1], [0, 0, 1, 1], [], []>} : vector<8x8xf32>, vector<8x8xf32>, vector<8x8xf32> -> vector<8x8xf32>
    %96 = vector.extract_strided_slice %53 {offsets = [8, 0], sizes = [8, 32], strides = [1, 1]} : vector<32x32xf32> to vector<8x32xf32>
    %cst_47 = arith.constant dense<0.000000e+00> : vector<8x32xf32>
    %97 = tpu.matmul %95, %96, %cst_47 {dimension_numbers = #tpu.dot_dimension_numbers<[1], [0], [0], [1], [0, 0, 1, 1], [], []>} : vector<8x8xf32>, vector<8x32xf32>, vector<8x32xf32> -> vector<8x32xf32>
    %98 = arith.addf %77, %97 : vector<8x32xf32>
    %99 = vector.extract_strided_slice %49 {offsets = [0, 16], sizes = [8, 8], strides = [1, 1]} : vector<8x32xf32> to vector<8x8xf32>
    %cst_48 = arith.constant 0.353553385 : f32
    %100 = vector.broadcast %cst_48 : f32 to vector<8x8xf32>
    %101 = arith.mulf %99, %100 : vector<8x8xf32>
    %102 = vector.extract_strided_slice %50 {offsets = [0, 16], sizes = [8, 8], strides = [1, 1]} : vector<8x32xf32> to vector<8x8xf32>
    %cst_49 = arith.constant dense<0.000000e+00> : vector<8x8xf32>
    %103 = tpu.matmul %101, %102, %cst_49 {dimension_numbers = #tpu.dot_dimension_numbers<[1], [1], [0], [0], [0, 0, 1, 0], [], []>} : vector<8x8xf32>, vector<8x8xf32>, vector<8x8xf32> -> vector<8x8xf32>
    %104 = arith.addf %103, %39 : vector<8x8xf32>
    %cst_50 = arith.constant dense<0xFF800000> : vector<8xf32>
    %105 = vector.multi_reduction <maximumf>, %104, %cst_50 [1] : vector<8x8xf32> to vector<8xf32>
    %106 = vector.shape_cast %105 : vector<8xf32> to vector<8x1xf32>
    %107 = vector.broadcast %106 : vector<8x1xf32> to vector<8x8xf32>
    %108 = arith.subf %104, %107 : vector<8x8xf32>
    %109 = math.exp %108 : vector<8x8xf32>
    %cst_51 = arith.constant dense<0.000000e+00> : vector<8xf32>
    %110 = vector.multi_reduction <add>, %109, %cst_51 [1] : vector<8x8xf32> to vector<8xf32>
    %111 = vector.shape_cast %110 : vector<8xf32> to vector<8x1xf32>
    %112 = tpu.reciprocal %111 {approx = true} : vector<8x1xf32> -> vector<8x1xf32>
    %113 = vector.broadcast %112 : vector<8x1xf32> to vector<8x8xf32>
    %114 = arith.mulf %109, %113 : vector<8x8xf32>
    %115 = vector.extract_strided_slice %51 {offsets = [0, 16], sizes = [8, 8], strides = [1, 1]} : vector<8x32xf32> to vector<8x8xf32>
    %cst_52 = arith.constant dense<0.000000e+00> : vector<8x8xf32>
    %116 = tpu.matmul %114, %115, %cst_52 {dimension_numbers = #tpu.dot_dimension_numbers<[1], [0], [0], [1], [0, 0, 1, 1], [], []>} : vector<8x8xf32>, vector<8x8xf32>, vector<8x8xf32> -> vector<8x8xf32>
    %117 = vector.extract_strided_slice %53 {offsets = [16, 0], sizes = [8, 32], strides = [1, 1]} : vector<32x32xf32> to vector<8x32xf32>
    %cst_53 = arith.constant dense<0.000000e+00> : vector<8x32xf32>
    %118 = tpu.matmul %116, %117, %cst_53 {dimension_numbers = #tpu.dot_dimension_numbers<[1], [0], [0], [1], [0, 0, 1, 1], [], []>} : vector<8x8xf32>, vector<8x32xf32>, vector<8x32xf32> -> vector<8x32xf32>
    %119 = arith.addf %98, %118 : vector<8x32xf32>
    %120 = vector.extract_strided_slice %49 {offsets = [0, 24], sizes = [8, 8], strides = [1, 1]} : vector<8x32xf32> to vector<8x8xf32>
    %cst_54 = arith.constant 0.353553385 : f32
    %121 = vector.broadcast %cst_54 : f32 to vector<8x8xf32>
    %122 = arith.mulf %120, %121 : vector<8x8xf32>
    %123 = vector.extract_strided_slice %50 {offsets = [0, 24], sizes = [8, 8], strides = [1, 1]} : vector<8x32xf32> to vector<8x8xf32>
    %cst_55 = arith.constant dense<0.000000e+00> : vector<8x8xf32>
    %124 = tpu.matmul %122, %123, %cst_55 {dimension_numbers = #tpu.dot_dimension_numbers<[1], [1], [0], [0], [0, 0, 1, 0], [], []>} : vector<8x8xf32>, vector<8x8xf32>, vector<8x8xf32> -> vector<8x8xf32>
    %125 = arith.addf %124, %39 : vector<8x8xf32>
    %cst_56 = arith.constant dense<0xFF800000> : vector<8xf32>
    %126 = vector.multi_reduction <maximumf>, %125, %cst_56 [1] : vector<8x8xf32> to vector<8xf32>
    %127 = vector.shape_cast %126 : vector<8xf32> to vector<8x1xf32>
    %128 = vector.broadcast %127 : vector<8x1xf32> to vector<8x8xf32>
    %129 = arith.subf %125, %128 : vector<8x8xf32>
    %130 = math.exp %129 : vector<8x8xf32>
    %cst_57 = arith.constant dense<0.000000e+00> : vector<8xf32>
    %131 = vector.multi_reduction <add>, %130, %cst_57 [1] : vector<8x8xf32> to vector<8xf32>
    %132 = vector.shape_cast %131 : vector<8xf32> to vector<8x1xf32>
    %133 = tpu.reciprocal %132 {approx = true} : vector<8x1xf32> -> vector<8x1xf32>
    %134 = vector.broadcast %133 : vector<8x1xf32> to vector<8x8xf32>
    %135 = arith.mulf %130, %134 : vector<8x8xf32>
    %136 = vector.extract_strided_slice %51 {offsets = [0, 24], sizes = [8, 8], strides = [1, 1]} : vector<8x32xf32> to vector<8x8xf32>
    %cst_58 = arith.constant dense<0.000000e+00> : vector<8x8xf32>
    %137 = tpu.matmul %135, %136, %cst_58 {dimension_numbers = #tpu.dot_dimension_numbers<[1], [0], [0], [1], [0, 0, 1, 1], [], []>} : vector<8x8xf32>, vector<8x8xf32>, vector<8x8xf32> -> vector<8x8xf32>
    %138 = vector.extract_strided_slice %53 {offsets = [24, 0], sizes = [8, 32], strides = [1, 1]} : vector<32x32xf32> to vector<8x32xf32>
    %cst_59 = arith.constant dense<0.000000e+00> : vector<8x32xf32>
    %139 = tpu.matmul %137, %138, %cst_59 {dimension_numbers = #tpu.dot_dimension_numbers<[1], [0], [0], [1], [0, 0, 1, 1], [], []>} : vector<8x8xf32>, vector<8x32xf32>, vector<8x32xf32> -> vector<8x32xf32>
    %140 = arith.addf %119, %139 : vector<8x32xf32>
    %141 = arith.addf %27, %140 : vector<8x32xf32>
    %c0_60 = arith.constant 0 : index
    %c0_61 = arith.constant 0 : index
    %c0_62 = arith.constant 0 : index
    %142 = vector.load %arg12[%c0_60, %c0_61, %c0_62] : memref<2x1x32xf32, #tpu.memory_space<vmem>>, vector<1x1x32xf32>
    %143 = vector.shape_cast %142 : vector<1x1x32xf32> to vector<1x32xf32>
    %c0_63 = arith.constant 0 : index
    %c0_64 = arith.constant 0 : index
    %c0_65 = arith.constant 0 : index
    %144 = vector.load %arg13[%c0_63, %c0_64, %c0_65] : memref<2x1x32xf32, #tpu.memory_space<vmem>>, vector<1x1x32xf32>
    %145 = vector.shape_cast %144 : vector<1x1x32xf32> to vector<1x32xf32>
    %cst_66 = arith.constant dense<0.000000e+00> : vector<8xf32>
    %146 = vector.multi_reduction <add>, %141, %cst_66 [1] : vector<8x32xf32> to vector<8xf32>
    %147 = vector.shape_cast %146 : vector<8xf32> to vector<8x1xf32>
    %cst_67 = arith.constant 3.200000e+01 : f32
    %148 = vector.broadcast %cst_67 : f32 to vector<8x1xf32>
    %149 = arith.divf %147, %148 : vector<8x1xf32>
    %150 = vector.broadcast %149 : vector<8x1xf32> to vector<8x32xf32>
    %151 = arith.subf %141, %150 : vector<8x32xf32>
    %152 = arith.mulf %151, %151 : vector<8x32xf32>
    %cst_68 = arith.constant dense<0.000000e+00> : vector<8xf32>
    %153 = vector.multi_reduction <add>, %152, %cst_68 [1] : vector<8x32xf32> to vector<8xf32>
    %154 = vector.shape_cast %153 : vector<8xf32> to vector<8x1xf32>
    %cst_69 = arith.constant 3.200000e+01 : f32
    %155 = vector.broadcast %cst_69 : f32 to vector<8x1xf32>
    %156 = arith.divf %154, %155 : vector<8x1xf32>
    %157 = vector.broadcast %149 : vector<8x1xf32> to vector<8x32xf32>
    %158 = arith.subf %141, %157 : vector<8x32xf32>
    %cst_70 = arith.constant 9.99999974E-6 : f32
    %159 = vector.broadcast %cst_70 : f32 to vector<8x1xf32>
    %160 = arith.addf %156, %159 : vector<8x1xf32>
    %161 = math.rsqrt %160 : vector<8x1xf32>
    %162 = vector.broadcast %161 : vector<8x1xf32> to vector<8x32xf32>
    %163 = arith.mulf %158, %162 : vector<8x32xf32>
    %164 = vector.broadcast %143 : vector<1x32xf32> to vector<8x32xf32>
    %165 = arith.mulf %163, %164 : vector<8x32xf32>
    %166 = vector.broadcast %145 : vector<1x32xf32> to vector<8x32xf32>
    %167 = arith.addf %165, %166 : vector<8x32xf32>
    %c0_71 = arith.constant 0 : index
    %c0_72 = arith.constant 0 : index
    %c0_73 = arith.constant 0 : index
    %168 = vector.load %arg14[%c0_71, %c0_72, %c0_73] : memref<2x32x32xf32, #tpu.memory_space<vmem>>, vector<1x32x32xf32>
    %169 = vector.shape_cast %168 : vector<1x32x32xf32> to vector<32x32xf32>
    %cst_74 = arith.constant dense<0.000000e+00> : vector<8x32xf32>
    %170 = tpu.matmul %167, %169, %cst_74 {dimension_numbers = #tpu.dot_dimension_numbers<[1], [0], [0], [1], [0, 0, 1, 1], [], []>} : vector<8x32xf32>, vector<32x32xf32>, vector<8x32xf32> -> vector<8x32xf32>
    %c0_75 = arith.constant 0 : index
    %c0_76 = arith.constant 0 : index
    %c0_77 = arith.constant 0 : index
    %171 = vector.load %arg15[%c0_75, %c0_76, %c0_77] : memref<2x1x32xf32, #tpu.memory_space<vmem>>, vector<1x1x32xf32>
    %172 = vector.shape_cast %171 : vector<1x1x32xf32> to vector<1x32xf32>
    %173 = vector.broadcast %172 : vector<1x32xf32> to vector<8x32xf32>
    %174 = arith.addf %170, %173 : vector<8x32xf32>
    %c0_78 = arith.constant 0 : index
    %c0_79 = arith.constant 0 : index
    %c0_80 = arith.constant 0 : index
    %175 = vector.load %arg16[%c0_78, %c0_79, %c0_80] : memref<2x32x64xf32, #tpu.memory_space<vmem>>, vector<1x32x64xf32>
    %176 = vector.shape_cast %175 : vector<1x32x64xf32> to vector<32x64xf32>
    %cst_81 = arith.constant dense<0.000000e+00> : vector<8x64xf32>
    %177 = tpu.matmul %29, %176, %cst_81 {dimension_numbers = #tpu.dot_dimension_numbers<[1], [0], [0], [1], [0, 0, 1, 1], [], []>} : vector<8x32xf32>, vector<32x64xf32>, vector<8x64xf32> -> vector<8x64xf32>
    %c0_82 = arith.constant 0 : index
    %c0_83 = arith.constant 0 : index
    %c0_84 = arith.constant 0 : index
    %178 = vector.load %arg17[%c0_82, %c0_83, %c0_84] : memref<2x1x64xf32, #tpu.memory_space<vmem>>, vector<1x1x64xf32>
    %179 = vector.shape_cast %178 : vector<1x1x64xf32> to vector<1x64xf32>
    %180 = vector.broadcast %179 : vector<1x64xf32> to vector<8x64xf32>
    %181 = arith.addf %177, %180 : vector<8x64xf32>
    %182 = vector.extract_strided_slice %181 {offsets = [0, 0], sizes = [8, 32], strides = [1, 1]} : vector<8x64xf32> to vector<8x32xf32>
    %183 = vector.extract_strided_slice %181 {offsets = [0, 32], sizes = [8, 32], strides = [1, 1]} : vector<8x64xf32> to vector<8x32xf32>
    %c0_85 = arith.constant 0 : index
    %c0_86 = arith.constant 0 : index
    %c0_87 = arith.constant 0 : index
    %184 = vector.load %arg18[%c0_85, %c0_86, %c0_87] : memref<2x32x32xf32, #tpu.memory_space<vmem>>, vector<1x32x32xf32>
    %185 = vector.shape_cast %184 : vector<1x32x32xf32> to vector<32x32xf32>
    %c0_88 = arith.constant 0 : index
    %c0_89 = arith.constant 0 : index
    %c0_90 = arith.constant 0 : index
    %186 = vector.load %arg19[%c0_88, %c0_89, %c0_90] : memref<2x1x32xf32, #tpu.memory_space<vmem>>, vector<1x1x32xf32>
    %187 = vector.shape_cast %186 : vector<1x1x32xf32> to vector<1x32xf32>
    %188 = vector.extract_strided_slice %174 {offsets = [0, 0], sizes = [8, 8], strides = [1, 1]} : vector<8x32xf32> to vector<8x8xf32>
    %cst_91 = arith.constant 0.353553385 : f32
    %189 = vector.broadcast %cst_91 : f32 to vector<8x8xf32>
    %190 = arith.mulf %188, %189 : vector<8x8xf32>
    %191 = vector.extract_strided_slice %182 {offsets = [0, 0], sizes = [8, 8], strides = [1, 1]} : vector<8x32xf32> to vector<8x8xf32>
    %cst_92 = arith.constant dense<0.000000e+00> : vector<8x8xf32>
    %192 = tpu.matmul %190, %191, %cst_92 {dimension_numbers = #tpu.dot_dimension_numbers<[1], [1], [0], [0], [0, 0, 1, 0], [], []>} : vector<8x8xf32>, vector<8x8xf32>, vector<8x8xf32> -> vector<8x8xf32>
    %193 = vector.broadcast %41 : vector<1x8xf32> to vector<8x8xf32>
    %194 = arith.addf %192, %193 : vector<8x8xf32>
    %cst_93 = arith.constant dense<0xFF800000> : vector<8xf32>
    %195 = vector.multi_reduction <maximumf>, %194, %cst_93 [1] : vector<8x8xf32> to vector<8xf32>
    %196 = vector.shape_cast %195 : vector<8xf32> to vector<8x1xf32>
    %197 = vector.broadcast %196 : vector<8x1xf32> to vector<8x8xf32>
    %198 = arith.subf %194, %197 : vector<8x8xf32>
    %199 = math.exp %198 : vector<8x8xf32>
    %cst_94 = arith.constant dense<0.000000e+00> : vector<8xf32>
    %200 = vector.multi_reduction <add>, %199, %cst_94 [1] : vector<8x8xf32> to vector<8xf32>
    %201 = vector.shape_cast %200 : vector<8xf32> to vector<8x1xf32>
    %202 = tpu.reciprocal %201 {approx = true} : vector<8x1xf32> -> vector<8x1xf32>
    %203 = vector.broadcast %202 : vector<8x1xf32> to vector<8x8xf32>
    %204 = arith.mulf %199, %203 : vector<8x8xf32>
    %205 = vector.extract_strided_slice %183 {offsets = [0, 0], sizes = [8, 8], strides = [1, 1]} : vector<8x32xf32> to vector<8x8xf32>
    %cst_95 = arith.constant dense<0.000000e+00> : vector<8x8xf32>
    %206 = tpu.matmul %204, %205, %cst_95 {dimension_numbers = #tpu.dot_dimension_numbers<[1], [0], [0], [1], [0, 0, 1, 1], [], []>} : vector<8x8xf32>, vector<8x8xf32>, vector<8x8xf32> -> vector<8x8xf32>
    %207 = vector.extract_strided_slice %185 {offsets = [0, 0], sizes = [8, 32], strides = [1, 1]} : vector<32x32xf32> to vector<8x32xf32>
    %cst_96 = arith.constant dense<0.000000e+00> : vector<8x32xf32>
    %208 = tpu.matmul %206, %207, %cst_96 {dimension_numbers = #tpu.dot_dimension_numbers<[1], [0], [0], [1], [0, 0, 1, 1], [], []>} : vector<8x8xf32>, vector<8x32xf32>, vector<8x32xf32> -> vector<8x32xf32>
    %209 = vector.broadcast %187 : vector<1x32xf32> to vector<8x32xf32>
    %210 = arith.addf %209, %208 : vector<8x32xf32>
    %211 = vector.extract_strided_slice %174 {offsets = [0, 8], sizes = [8, 8], strides = [1, 1]} : vector<8x32xf32> to vector<8x8xf32>
    %cst_97 = arith.constant 0.353553385 : f32
    %212 = vector.broadcast %cst_97 : f32 to vector<8x8xf32>
    %213 = arith.mulf %211, %212 : vector<8x8xf32>
    %214 = vector.extract_strided_slice %182 {offsets = [0, 8], sizes = [8, 8], strides = [1, 1]} : vector<8x32xf32> to vector<8x8xf32>
    %cst_98 = arith.constant dense<0.000000e+00> : vector<8x8xf32>
    %215 = tpu.matmul %213, %214, %cst_98 {dimension_numbers = #tpu.dot_dimension_numbers<[1], [1], [0], [0], [0, 0, 1, 0], [], []>} : vector<8x8xf32>, vector<8x8xf32>, vector<8x8xf32> -> vector<8x8xf32>
    %216 = vector.broadcast %41 : vector<1x8xf32> to vector<8x8xf32>
    %217 = arith.addf %215, %216 : vector<8x8xf32>
    %cst_99 = arith.constant dense<0xFF800000> : vector<8xf32>
    %218 = vector.multi_reduction <maximumf>, %217, %cst_99 [1] : vector<8x8xf32> to vector<8xf32>
    %219 = vector.shape_cast %218 : vector<8xf32> to vector<8x1xf32>
    %220 = vector.broadcast %219 : vector<8x1xf32> to vector<8x8xf32>
    %221 = arith.subf %217, %220 : vector<8x8xf32>
    %222 = math.exp %221 : vector<8x8xf32>
    %cst_100 = arith.constant dense<0.000000e+00> : vector<8xf32>
    %223 = vector.multi_reduction <add>, %222, %cst_100 [1] : vector<8x8xf32> to vector<8xf32>
    %224 = vector.shape_cast %223 : vector<8xf32> to vector<8x1xf32>
    %225 = tpu.reciprocal %224 {approx = true} : vector<8x1xf32> -> vector<8x1xf32>
    %226 = vector.broadcast %225 : vector<8x1xf32> to vector<8x8xf32>
    %227 = arith.mulf %222, %226 : vector<8x8xf32>
    %228 = vector.extract_strided_slice %183 {offsets = [0, 8], sizes = [8, 8], strides = [1, 1]} : vector<8x32xf32> to vector<8x8xf32>
    %cst_101 = arith.constant dense<0.000000e+00> : vector<8x8xf32>
    %229 = tpu.matmul %227, %228, %cst_101 {dimension_numbers = #tpu.dot_dimension_numbers<[1], [0], [0], [1], [0, 0, 1, 1], [], []>} : vector<8x8xf32>, vector<8x8xf32>, vector<8x8xf32> -> vector<8x8xf32>
    %230 = vector.extract_strided_slice %185 {offsets = [8, 0], sizes = [8, 32], strides = [1, 1]} : vector<32x32xf32> to vector<8x32xf32>
    %cst_102 = arith.constant dense<0.000000e+00> : vector<8x32xf32>
    %231 = tpu.matmul %229, %230, %cst_102 {dimension_numbers = #tpu.dot_dimension_numbers<[1], [0], [0], [1], [0, 0, 1, 1], [], []>} : vector<8x8xf32>, vector<8x32xf32>, vector<8x32xf32> -> vector<8x32xf32>
    %232 = arith.addf %210, %231 : vector<8x32xf32>
    %233 = vector.extract_strided_slice %174 {offsets = [0, 16], sizes = [8, 8], strides = [1, 1]} : vector<8x32xf32> to vector<8x8xf32>
    %cst_103 = arith.constant 0.353553385 : f32
    %234 = vector.broadcast %cst_103 : f32 to vector<8x8xf32>
    %235 = arith.mulf %233, %234 : vector<8x8xf32>
    %236 = vector.extract_strided_slice %182 {offsets = [0, 16], sizes = [8, 8], strides = [1, 1]} : vector<8x32xf32> to vector<8x8xf32>
    %cst_104 = arith.constant dense<0.000000e+00> : vector<8x8xf32>
    %237 = tpu.matmul %235, %236, %cst_104 {dimension_numbers = #tpu.dot_dimension_numbers<[1], [1], [0], [0], [0, 0, 1, 0], [], []>} : vector<8x8xf32>, vector<8x8xf32>, vector<8x8xf32> -> vector<8x8xf32>
    %238 = vector.broadcast %41 : vector<1x8xf32> to vector<8x8xf32>
    %239 = arith.addf %237, %238 : vector<8x8xf32>
    %cst_105 = arith.constant dense<0xFF800000> : vector<8xf32>
    %240 = vector.multi_reduction <maximumf>, %239, %cst_105 [1] : vector<8x8xf32> to vector<8xf32>
    %241 = vector.shape_cast %240 : vector<8xf32> to vector<8x1xf32>
    %242 = vector.broadcast %241 : vector<8x1xf32> to vector<8x8xf32>
    %243 = arith.subf %239, %242 : vector<8x8xf32>
    %244 = math.exp %243 : vector<8x8xf32>
    %cst_106 = arith.constant dense<0.000000e+00> : vector<8xf32>
    %245 = vector.multi_reduction <add>, %244, %cst_106 [1] : vector<8x8xf32> to vector<8xf32>
    %246 = vector.shape_cast %245 : vector<8xf32> to vector<8x1xf32>
    %247 = tpu.reciprocal %246 {approx = true} : vector<8x1xf32> -> vector<8x1xf32>
    %248 = vector.broadcast %247 : vector<8x1xf32> to vector<8x8xf32>
    %249 = arith.mulf %244, %248 : vector<8x8xf32>
    %250 = vector.extract_strided_slice %183 {offsets = [0, 16], sizes = [8, 8], strides = [1, 1]} : vector<8x32xf32> to vector<8x8xf32>
    %cst_107 = arith.constant dense<0.000000e+00> : vector<8x8xf32>
    %251 = tpu.matmul %249, %250, %cst_107 {dimension_numbers = #tpu.dot_dimension_numbers<[1], [0], [0], [1], [0, 0, 1, 1], [], []>} : vector<8x8xf32>, vector<8x8xf32>, vector<8x8xf32> -> vector<8x8xf32>
    %252 = vector.extract_strided_slice %185 {offsets = [16, 0], sizes = [8, 32], strides = [1, 1]} : vector<32x32xf32> to vector<8x32xf32>
    %cst_108 = arith.constant dense<0.000000e+00> : vector<8x32xf32>
    %253 = tpu.matmul %251, %252, %cst_108 {dimension_numbers = #tpu.dot_dimension_numbers<[1], [0], [0], [1], [0, 0, 1, 1], [], []>} : vector<8x8xf32>, vector<8x32xf32>, vector<8x32xf32> -> vector<8x32xf32>
    %254 = arith.addf %232, %253 : vector<8x32xf32>
    %255 = vector.extract_strided_slice %174 {offsets = [0, 24], sizes = [8, 8], strides = [1, 1]} : vector<8x32xf32> to vector<8x8xf32>
    %cst_109 = arith.constant 0.353553385 : f32
    %256 = vector.broadcast %cst_109 : f32 to vector<8x8xf32>
    %257 = arith.mulf %255, %256 : vector<8x8xf32>
    %258 = vector.extract_strided_slice %182 {offsets = [0, 24], sizes = [8, 8], strides = [1, 1]} : vector<8x32xf32> to vector<8x8xf32>
    %cst_110 = arith.constant dense<0.000000e+00> : vector<8x8xf32>
    %259 = tpu.matmul %257, %258, %cst_110 {dimension_numbers = #tpu.dot_dimension_numbers<[1], [1], [0], [0], [0, 0, 1, 0], [], []>} : vector<8x8xf32>, vector<8x8xf32>, vector<8x8xf32> -> vector<8x8xf32>
    %260 = vector.broadcast %41 : vector<1x8xf32> to vector<8x8xf32>
    %261 = arith.addf %259, %260 : vector<8x8xf32>
    %cst_111 = arith.constant dense<0xFF800000> : vector<8xf32>
    %262 = vector.multi_reduction <maximumf>, %261, %cst_111 [1] : vector<8x8xf32> to vector<8xf32>
    %263 = vector.shape_cast %262 : vector<8xf32> to vector<8x1xf32>
    %264 = vector.broadcast %263 : vector<8x1xf32> to vector<8x8xf32>
    %265 = arith.subf %261, %264 : vector<8x8xf32>
    %266 = math.exp %265 : vector<8x8xf32>
    %cst_112 = arith.constant dense<0.000000e+00> : vector<8xf32>
    %267 = vector.multi_reduction <add>, %266, %cst_112 [1] : vector<8x8xf32> to vector<8xf32>
    %268 = vector.shape_cast %267 : vector<8xf32> to vector<8x1xf32>
    %269 = tpu.reciprocal %268 {approx = true} : vector<8x1xf32> -> vector<8x1xf32>
    %270 = vector.broadcast %269 : vector<8x1xf32> to vector<8x8xf32>
    %271 = arith.mulf %266, %270 : vector<8x8xf32>
    %272 = vector.extract_strided_slice %183 {offsets = [0, 24], sizes = [8, 8], strides = [1, 1]} : vector<8x32xf32> to vector<8x8xf32>
    %cst_113 = arith.constant dense<0.000000e+00> : vector<8x8xf32>
    %273 = tpu.matmul %271, %272, %cst_113 {dimension_numbers = #tpu.dot_dimension_numbers<[1], [0], [0], [1], [0, 0, 1, 1], [], []>} : vector<8x8xf32>, vector<8x8xf32>, vector<8x8xf32> -> vector<8x8xf32>
    %274 = vector.extract_strided_slice %185 {offsets = [24, 0], sizes = [8, 32], strides = [1, 1]} : vector<32x32xf32> to vector<8x32xf32>
    %cst_114 = arith.constant dense<0.000000e+00> : vector<8x32xf32>
    %275 = tpu.matmul %273, %274, %cst_114 {dimension_numbers = #tpu.dot_dimension_numbers<[1], [0], [0], [1], [0, 0, 1, 1], [], []>} : vector<8x8xf32>, vector<8x32xf32>, vector<8x32xf32> -> vector<8x32xf32>
    %276 = arith.addf %254, %275 : vector<8x32xf32>
    %277 = arith.addf %167, %276 : vector<8x32xf32>
    %c0_115 = arith.constant 0 : index
    %c0_116 = arith.constant 0 : index
    %c0_117 = arith.constant 0 : index
    %278 = vector.load %arg20[%c0_115, %c0_116, %c0_117] : memref<2x1x32xf32, #tpu.memory_space<vmem>>, vector<1x1x32xf32>
    %279 = vector.shape_cast %278 : vector<1x1x32xf32> to vector<1x32xf32>
    %c0_118 = arith.constant 0 : index
    %c0_119 = arith.constant 0 : index
    %c0_120 = arith.constant 0 : index
    %280 = vector.load %arg21[%c0_118, %c0_119, %c0_120] : memref<2x1x32xf32, #tpu.memory_space<vmem>>, vector<1x1x32xf32>
    %281 = vector.shape_cast %280 : vector<1x1x32xf32> to vector<1x32xf32>
    %cst_121 = arith.constant dense<0.000000e+00> : vector<8xf32>
    %282 = vector.multi_reduction <add>, %277, %cst_121 [1] : vector<8x32xf32> to vector<8xf32>
    %283 = vector.shape_cast %282 : vector<8xf32> to vector<8x1xf32>
    %cst_122 = arith.constant 3.200000e+01 : f32
    %284 = vector.broadcast %cst_122 : f32 to vector<8x1xf32>
    %285 = arith.divf %283, %284 : vector<8x1xf32>
    %286 = vector.broadcast %285 : vector<8x1xf32> to vector<8x32xf32>
    %287 = arith.subf %277, %286 : vector<8x32xf32>
    %288 = arith.mulf %287, %287 : vector<8x32xf32>
    %cst_123 = arith.constant dense<0.000000e+00> : vector<8xf32>
    %289 = vector.multi_reduction <add>, %288, %cst_123 [1] : vector<8x32xf32> to vector<8xf32>
    %290 = vector.shape_cast %289 : vector<8xf32> to vector<8x1xf32>
    %cst_124 = arith.constant 3.200000e+01 : f32
    %291 = vector.broadcast %cst_124 : f32 to vector<8x1xf32>
    %292 = arith.divf %290, %291 : vector<8x1xf32>
    %293 = vector.broadcast %285 : vector<8x1xf32> to vector<8x32xf32>
    %294 = arith.subf %277, %293 : vector<8x32xf32>
    %cst_125 = arith.constant 9.99999974E-6 : f32
    %295 = vector.broadcast %cst_125 : f32 to vector<8x1xf32>
    %296 = arith.addf %292, %295 : vector<8x1xf32>
    %297 = math.rsqrt %296 : vector<8x1xf32>
    %298 = vector.broadcast %297 : vector<8x1xf32> to vector<8x32xf32>
    %299 = arith.mulf %294, %298 : vector<8x32xf32>
    %300 = vector.broadcast %279 : vector<1x32xf32> to vector<8x32xf32>
    %301 = arith.mulf %299, %300 : vector<8x32xf32>
    %302 = vector.broadcast %281 : vector<1x32xf32> to vector<8x32xf32>
    %303 = arith.addf %301, %302 : vector<8x32xf32>
    %c0_126 = arith.constant 0 : index
    %c0_127 = arith.constant 0 : index
    %c0_128 = arith.constant 0 : index
    %304 = vector.load %arg22[%c0_126, %c0_127, %c0_128] : memref<2x32x64xf32, #tpu.memory_space<vmem>>, vector<1x32x64xf32>
    %305 = vector.shape_cast %304 : vector<1x32x64xf32> to vector<32x64xf32>
    %cst_129 = arith.constant dense<0.000000e+00> : vector<8x64xf32>
    %306 = tpu.matmul %303, %305, %cst_129 {dimension_numbers = #tpu.dot_dimension_numbers<[1], [0], [0], [1], [0, 0, 1, 1], [], []>} : vector<8x32xf32>, vector<32x64xf32>, vector<8x64xf32> -> vector<8x64xf32>
    %c0_130 = arith.constant 0 : index
    %c0_131 = arith.constant 0 : index
    %c0_132 = arith.constant 0 : index
    %307 = vector.load %arg23[%c0_130, %c0_131, %c0_132] : memref<2x1x64xf32, #tpu.memory_space<vmem>>, vector<1x1x64xf32>
    %308 = vector.shape_cast %307 : vector<1x1x64xf32> to vector<1x64xf32>
    %309 = vector.broadcast %308 : vector<1x64xf32> to vector<8x64xf32>
    %310 = arith.addf %306, %309 : vector<8x64xf32>
    %cst_133 = arith.constant 5.000000e-01 : f32
    %311 = vector.broadcast %cst_133 : f32 to vector<8x64xf32>
    %312 = arith.mulf %311, %310 : vector<8x64xf32>
    %cst_134 = arith.constant 0.707106769 : f32
    %313 = vector.broadcast %cst_134 : f32 to vector<8x64xf32>
    %314 = arith.mulf %310, %313 : vector<8x64xf32>
    %cst_135 = arith.constant 0.000000e+00 : f32
    %315 = vector.broadcast %cst_135 : f32 to vector<8x64xf32>
    %316 = arith.cmpf oge, %314, %315 : vector<8x64xf32>
    %cst_136 = arith.constant 1.000000e+00 : f32
    %cst_137 = arith.constant -1.000000e+00 : f32
    %317 = vector.broadcast %cst_136 : f32 to vector<8x64xf32>
    %318 = vector.broadcast %cst_137 : f32 to vector<8x64xf32>
    %319 = arith.select %316, %317, %318 : vector<8x64xi1>, vector<8x64xf32>
    %320 = math.absf %314 : vector<8x64xf32>
    %cst_138 = arith.constant 0.327591091 : f32
    %321 = vector.broadcast %cst_138 : f32 to vector<8x64xf32>
    %322 = arith.mulf %321, %320 : vector<8x64xf32>
    %cst_139 = arith.constant 1.000000e+00 : f32
    %323 = vector.broadcast %cst_139 : f32 to vector<8x64xf32>
    %324 = arith.addf %323, %322 : vector<8x64xf32>
    %cst_140 = arith.constant 1.000000e+00 : f32
    %325 = vector.broadcast %cst_140 : f32 to vector<8x64xf32>
    %326 = arith.divf %325, %324 : vector<8x64xf32>
    %cst_141 = arith.constant 1.06140542 : f32
    %327 = vector.broadcast %cst_141 : f32 to vector<8x64xf32>
    %328 = arith.mulf %327, %326 : vector<8x64xf32>
    %cst_142 = arith.constant -1.45315206 : f32
    %329 = vector.broadcast %cst_142 : f32 to vector<8x64xf32>
    %330 = arith.addf %328, %329 : vector<8x64xf32>
    %331 = arith.mulf %330, %326 : vector<8x64xf32>
    %cst_143 = arith.constant 1.42141378 : f32
    %332 = vector.broadcast %cst_143 : f32 to vector<8x64xf32>
    %333 = arith.addf %331, %332 : vector<8x64xf32>
    %334 = arith.mulf %333, %326 : vector<8x64xf32>
    %cst_144 = arith.constant -0.284496725 : f32
    %335 = vector.broadcast %cst_144 : f32 to vector<8x64xf32>
    %336 = arith.addf %334, %335 : vector<8x64xf32>
    %337 = arith.mulf %336, %326 : vector<8x64xf32>
    %cst_145 = arith.constant 0.254829586 : f32
    %338 = vector.broadcast %cst_145 : f32 to vector<8x64xf32>
    %339 = arith.addf %337, %338 : vector<8x64xf32>
    %340 = arith.mulf %339, %326 : vector<8x64xf32>
    %cst_146 = arith.constant 0.000000e+00 : f32
    %341 = vector.broadcast %cst_146 : f32 to vector<8x64xf32>
    %342 = arith.subf %341, %320 : vector<8x64xf32>
    %343 = arith.mulf %342, %320 : vector<8x64xf32>
    %344 = math.exp %343 : vector<8x64xf32>
    %345 = arith.mulf %340, %344 : vector<8x64xf32>
    %cst_147 = arith.constant 1.000000e+00 : f32
    %346 = vector.broadcast %cst_147 : f32 to vector<8x64xf32>
    %347 = arith.subf %346, %345 : vector<8x64xf32>
    %348 = arith.mulf %319, %347 : vector<8x64xf32>
    %cst_148 = arith.constant 1.000000e+00 : f32
    %349 = vector.broadcast %cst_148 : f32 to vector<8x64xf32>
    %350 = arith.addf %349, %348 : vector<8x64xf32>
    %351 = arith.mulf %312, %350 : vector<8x64xf32>
    %c0_149 = arith.constant 0 : index
    %c0_150 = arith.constant 0 : index
    %c0_151 = arith.constant 0 : index
    %352 = vector.load %arg24[%c0_149, %c0_150, %c0_151] : memref<2x64x32xf32, #tpu.memory_space<vmem>>, vector<1x64x32xf32>
    %353 = vector.shape_cast %352 : vector<1x64x32xf32> to vector<64x32xf32>
    %cst_152 = arith.constant dense<0.000000e+00> : vector<8x32xf32>
    %354 = tpu.matmul %351, %353, %cst_152 {dimension_numbers = #tpu.dot_dimension_numbers<[1], [0], [0], [1], [0, 0, 1, 1], [], []>} : vector<8x64xf32>, vector<64x32xf32>, vector<8x32xf32> -> vector<8x32xf32>
    %c0_153 = arith.constant 0 : index
    %c0_154 = arith.constant 0 : index
    %c0_155 = arith.constant 0 : index
    %355 = vector.load %arg25[%c0_153, %c0_154, %c0_155] : memref<2x1x32xf32, #tpu.memory_space<vmem>>, vector<1x1x32xf32>
    %356 = vector.shape_cast %355 : vector<1x1x32xf32> to vector<1x32xf32>
    %357 = vector.broadcast %356 : vector<1x32xf32> to vector<8x32xf32>
    %358 = arith.addf %354, %357 : vector<8x32xf32>
    %359 = arith.addf %303, %358 : vector<8x32xf32>
    %c0_156 = arith.constant 0 : index
    %c0_157 = arith.constant 0 : index
    %c0_158 = arith.constant 0 : index
    %360 = vector.load %arg26[%c0_156, %c0_157, %c0_158] : memref<2x1x32xf32, #tpu.memory_space<vmem>>, vector<1x1x32xf32>
    %361 = vector.shape_cast %360 : vector<1x1x32xf32> to vector<1x32xf32>
    %c0_159 = arith.constant 0 : index
    %c0_160 = arith.constant 0 : index
    %c0_161 = arith.constant 0 : index
    %362 = vector.load %arg27[%c0_159, %c0_160, %c0_161] : memref<2x1x32xf32, #tpu.memory_space<vmem>>, vector<1x1x32xf32>
    %363 = vector.shape_cast %362 : vector<1x1x32xf32> to vector<1x32xf32>
    %cst_162 = arith.constant dense<0.000000e+00> : vector<8xf32>
    %364 = vector.multi_reduction <add>, %359, %cst_162 [1] : vector<8x32xf32> to vector<8xf32>
    %365 = vector.shape_cast %364 : vector<8xf32> to vector<8x1xf32>
    %cst_163 = arith.constant 3.200000e+01 : f32
    %366 = vector.broadcast %cst_163 : f32 to vector<8x1xf32>
    %367 = arith.divf %365, %366 : vector<8x1xf32>
    %368 = vector.broadcast %367 : vector<8x1xf32> to vector<8x32xf32>
    %369 = arith.subf %359, %368 : vector<8x32xf32>
    %370 = arith.mulf %369, %369 : vector<8x32xf32>
    %cst_164 = arith.constant dense<0.000000e+00> : vector<8xf32>
    %371 = vector.multi_reduction <add>, %370, %cst_164 [1] : vector<8x32xf32> to vector<8xf32>
    %372 = vector.shape_cast %371 : vector<8xf32> to vector<8x1xf32>
    %cst_165 = arith.constant 3.200000e+01 : f32
    %373 = vector.broadcast %cst_165 : f32 to vector<8x1xf32>
    %374 = arith.divf %372, %373 : vector<8x1xf32>
    %375 = vector.broadcast %367 : vector<8x1xf32> to vector<8x32xf32>
    %376 = arith.subf %359, %375 : vector<8x32xf32>
    %cst_166 = arith.constant 9.99999974E-6 : f32
    %377 = vector.broadcast %cst_166 : f32 to vector<8x1xf32>
    %378 = arith.addf %374, %377 : vector<8x1xf32>
    %379 = math.rsqrt %378 : vector<8x1xf32>
    %380 = vector.broadcast %379 : vector<8x1xf32> to vector<8x32xf32>
    %381 = arith.mulf %376, %380 : vector<8x32xf32>
    %382 = vector.broadcast %361 : vector<1x32xf32> to vector<8x32xf32>
    %383 = arith.mulf %381, %382 : vector<8x32xf32>
    %384 = vector.broadcast %363 : vector<1x32xf32> to vector<8x32xf32>
    %385 = arith.addf %383, %384 : vector<8x32xf32>
    %c1 = arith.constant 1 : index
    %c0_167 = arith.constant 0 : index
    %c0_168 = arith.constant 0 : index
    %386 = vector.load %arg8[%c1, %c0_167, %c0_168] : memref<2x32x96xf32, #tpu.memory_space<vmem>>, vector<1x32x96xf32>
    %387 = vector.shape_cast %386 : vector<1x32x96xf32> to vector<32x96xf32>
    %cst_169 = arith.constant dense<0.000000e+00> : vector<8x96xf32>
    %388 = tpu.matmul %385, %387, %cst_169 {dimension_numbers = #tpu.dot_dimension_numbers<[1], [0], [0], [1], [0, 0, 1, 1], [], []>} : vector<8x32xf32>, vector<32x96xf32>, vector<8x96xf32> -> vector<8x96xf32>
    %c1_170 = arith.constant 1 : index
    %c0_171 = arith.constant 0 : index
    %c0_172 = arith.constant 0 : index
    %389 = vector.load %arg9[%c1_170, %c0_171, %c0_172] : memref<2x1x96xf32, #tpu.memory_space<vmem>>, vector<1x1x96xf32>
    %390 = vector.shape_cast %389 : vector<1x1x96xf32> to vector<1x96xf32>
    %391 = vector.broadcast %390 : vector<1x96xf32> to vector<8x96xf32>
    %392 = arith.addf %388, %391 : vector<8x96xf32>
    %393 = vector.extract_strided_slice %392 {offsets = [0, 0], sizes = [8, 32], strides = [1, 1]} : vector<8x96xf32> to vector<8x32xf32>
    %394 = vector.extract_strided_slice %392 {offsets = [0, 32], sizes = [8, 32], strides = [1, 1]} : vector<8x96xf32> to vector<8x32xf32>
    %395 = vector.extract_strided_slice %392 {offsets = [0, 64], sizes = [8, 32], strides = [1, 1]} : vector<8x96xf32> to vector<8x32xf32>
    %c1_173 = arith.constant 1 : index
    %c0_174 = arith.constant 0 : index
    %c0_175 = arith.constant 0 : index
    %396 = vector.load %arg10[%c1_173, %c0_174, %c0_175] : memref<2x32x32xf32, #tpu.memory_space<vmem>>, vector<1x32x32xf32>
    %397 = vector.shape_cast %396 : vector<1x32x32xf32> to vector<32x32xf32>
    %c1_176 = arith.constant 1 : index
    %c0_177 = arith.constant 0 : index
    %c0_178 = arith.constant 0 : index
    %398 = vector.load %arg11[%c1_176, %c0_177, %c0_178] : memref<2x1x32xf32, #tpu.memory_space<vmem>>, vector<1x1x32xf32>
    %399 = vector.shape_cast %398 : vector<1x1x32xf32> to vector<1x32xf32>
    %400 = vector.extract_strided_slice %393 {offsets = [0, 0], sizes = [8, 8], strides = [1, 1]} : vector<8x32xf32> to vector<8x8xf32>
    %cst_179 = arith.constant 0.353553385 : f32
    %401 = vector.broadcast %cst_179 : f32 to vector<8x8xf32>
    %402 = arith.mulf %400, %401 : vector<8x8xf32>
    %403 = vector.extract_strided_slice %394 {offsets = [0, 0], sizes = [8, 8], strides = [1, 1]} : vector<8x32xf32> to vector<8x8xf32>
    %cst_180 = arith.constant dense<0.000000e+00> : vector<8x8xf32>
    %404 = tpu.matmul %402, %403, %cst_180 {dimension_numbers = #tpu.dot_dimension_numbers<[1], [1], [0], [0], [0, 0, 1, 0], [], []>} : vector<8x8xf32>, vector<8x8xf32>, vector<8x8xf32> -> vector<8x8xf32>
    %405 = arith.addf %404, %39 : vector<8x8xf32>
    %cst_181 = arith.constant dense<0xFF800000> : vector<8xf32>
    %406 = vector.multi_reduction <maximumf>, %405, %cst_181 [1] : vector<8x8xf32> to vector<8xf32>
    %407 = vector.shape_cast %406 : vector<8xf32> to vector<8x1xf32>
    %408 = vector.broadcast %407 : vector<8x1xf32> to vector<8x8xf32>
    %409 = arith.subf %405, %408 : vector<8x8xf32>
    %410 = math.exp %409 : vector<8x8xf32>
    %cst_182 = arith.constant dense<0.000000e+00> : vector<8xf32>
    %411 = vector.multi_reduction <add>, %410, %cst_182 [1] : vector<8x8xf32> to vector<8xf32>
    %412 = vector.shape_cast %411 : vector<8xf32> to vector<8x1xf32>
    %413 = tpu.reciprocal %412 {approx = true} : vector<8x1xf32> -> vector<8x1xf32>
    %414 = vector.broadcast %413 : vector<8x1xf32> to vector<8x8xf32>
    %415 = arith.mulf %410, %414 : vector<8x8xf32>
    %416 = vector.extract_strided_slice %395 {offsets = [0, 0], sizes = [8, 8], strides = [1, 1]} : vector<8x32xf32> to vector<8x8xf32>
    %cst_183 = arith.constant dense<0.000000e+00> : vector<8x8xf32>
    %417 = tpu.matmul %415, %416, %cst_183 {dimension_numbers = #tpu.dot_dimension_numbers<[1], [0], [0], [1], [0, 0, 1, 1], [], []>} : vector<8x8xf32>, vector<8x8xf32>, vector<8x8xf32> -> vector<8x8xf32>
    %418 = vector.extract_strided_slice %397 {offsets = [0, 0], sizes = [8, 32], strides = [1, 1]} : vector<32x32xf32> to vector<8x32xf32>
    %cst_184 = arith.constant dense<0.000000e+00> : vector<8x32xf32>
    %419 = tpu.matmul %417, %418, %cst_184 {dimension_numbers = #tpu.dot_dimension_numbers<[1], [0], [0], [1], [0, 0, 1, 1], [], []>} : vector<8x8xf32>, vector<8x32xf32>, vector<8x32xf32> -> vector<8x32xf32>
    %420 = vector.broadcast %399 : vector<1x32xf32> to vector<8x32xf32>
    %421 = arith.addf %420, %419 : vector<8x32xf32>
    %422 = vector.extract_strided_slice %393 {offsets = [0, 8], sizes = [8, 8], strides = [1, 1]} : vector<8x32xf32> to vector<8x8xf32>
    %cst_185 = arith.constant 0.353553385 : f32
    %423 = vector.broadcast %cst_185 : f32 to vector<8x8xf32>
    %424 = arith.mulf %422, %423 : vector<8x8xf32>
    %425 = vector.extract_strided_slice %394 {offsets = [0, 8], sizes = [8, 8], strides = [1, 1]} : vector<8x32xf32> to vector<8x8xf32>
    %cst_186 = arith.constant dense<0.000000e+00> : vector<8x8xf32>
    %426 = tpu.matmul %424, %425, %cst_186 {dimension_numbers = #tpu.dot_dimension_numbers<[1], [1], [0], [0], [0, 0, 1, 0], [], []>} : vector<8x8xf32>, vector<8x8xf32>, vector<8x8xf32> -> vector<8x8xf32>
    %427 = arith.addf %426, %39 : vector<8x8xf32>
    %cst_187 = arith.constant dense<0xFF800000> : vector<8xf32>
    %428 = vector.multi_reduction <maximumf>, %427, %cst_187 [1] : vector<8x8xf32> to vector<8xf32>
    %429 = vector.shape_cast %428 : vector<8xf32> to vector<8x1xf32>
    %430 = vector.broadcast %429 : vector<8x1xf32> to vector<8x8xf32>
    %431 = arith.subf %427, %430 : vector<8x8xf32>
    %432 = math.exp %431 : vector<8x8xf32>
    %cst_188 = arith.constant dense<0.000000e+00> : vector<8xf32>
    %433 = vector.multi_reduction <add>, %432, %cst_188 [1] : vector<8x8xf32> to vector<8xf32>
    %434 = vector.shape_cast %433 : vector<8xf32> to vector<8x1xf32>
    %435 = tpu.reciprocal %434 {approx = true} : vector<8x1xf32> -> vector<8x1xf32>
    %436 = vector.broadcast %435 : vector<8x1xf32> to vector<8x8xf32>
    %437 = arith.mulf %432, %436 : vector<8x8xf32>
    %438 = vector.extract_strided_slice %395 {offsets = [0, 8], sizes = [8, 8], strides = [1, 1]} : vector<8x32xf32> to vector<8x8xf32>
    %cst_189 = arith.constant dense<0.000000e+00> : vector<8x8xf32>
    %439 = tpu.matmul %437, %438, %cst_189 {dimension_numbers = #tpu.dot_dimension_numbers<[1], [0], [0], [1], [0, 0, 1, 1], [], []>} : vector<8x8xf32>, vector<8x8xf32>, vector<8x8xf32> -> vector<8x8xf32>
    %440 = vector.extract_strided_slice %397 {offsets = [8, 0], sizes = [8, 32], strides = [1, 1]} : vector<32x32xf32> to vector<8x32xf32>
    %cst_190 = arith.constant dense<0.000000e+00> : vector<8x32xf32>
    %441 = tpu.matmul %439, %440, %cst_190 {dimension_numbers = #tpu.dot_dimension_numbers<[1], [0], [0], [1], [0, 0, 1, 1], [], []>} : vector<8x8xf32>, vector<8x32xf32>, vector<8x32xf32> -> vector<8x32xf32>
    %442 = arith.addf %421, %441 : vector<8x32xf32>
    %443 = vector.extract_strided_slice %393 {offsets = [0, 16], sizes = [8, 8], strides = [1, 1]} : vector<8x32xf32> to vector<8x8xf32>
    %cst_191 = arith.constant 0.353553385 : f32
    %444 = vector.broadcast %cst_191 : f32 to vector<8x8xf32>
    %445 = arith.mulf %443, %444 : vector<8x8xf32>
    %446 = vector.extract_strided_slice %394 {offsets = [0, 16], sizes = [8, 8], strides = [1, 1]} : vector<8x32xf32> to vector<8x8xf32>
    %cst_192 = arith.constant dense<0.000000e+00> : vector<8x8xf32>
    %447 = tpu.matmul %445, %446, %cst_192 {dimension_numbers = #tpu.dot_dimension_numbers<[1], [1], [0], [0], [0, 0, 1, 0], [], []>} : vector<8x8xf32>, vector<8x8xf32>, vector<8x8xf32> -> vector<8x8xf32>
    %448 = arith.addf %447, %39 : vector<8x8xf32>
    %cst_193 = arith.constant dense<0xFF800000> : vector<8xf32>
    %449 = vector.multi_reduction <maximumf>, %448, %cst_193 [1] : vector<8x8xf32> to vector<8xf32>
    %450 = vector.shape_cast %449 : vector<8xf32> to vector<8x1xf32>
    %451 = vector.broadcast %450 : vector<8x1xf32> to vector<8x8xf32>
    %452 = arith.subf %448, %451 : vector<8x8xf32>
    %453 = math.exp %452 : vector<8x8xf32>
    %cst_194 = arith.constant dense<0.000000e+00> : vector<8xf32>
    %454 = vector.multi_reduction <add>, %453, %cst_194 [1] : vector<8x8xf32> to vector<8xf32>
    %455 = vector.shape_cast %454 : vector<8xf32> to vector<8x1xf32>
    %456 = tpu.reciprocal %455 {approx = true} : vector<8x1xf32> -> vector<8x1xf32>
    %457 = vector.broadcast %456 : vector<8x1xf32> to vector<8x8xf32>
    %458 = arith.mulf %453, %457 : vector<8x8xf32>
    %459 = vector.extract_strided_slice %395 {offsets = [0, 16], sizes = [8, 8], strides = [1, 1]} : vector<8x32xf32> to vector<8x8xf32>
    %cst_195 = arith.constant dense<0.000000e+00> : vector<8x8xf32>
    %460 = tpu.matmul %458, %459, %cst_195 {dimension_numbers = #tpu.dot_dimension_numbers<[1], [0], [0], [1], [0, 0, 1, 1], [], []>} : vector<8x8xf32>, vector<8x8xf32>, vector<8x8xf32> -> vector<8x8xf32>
    %461 = vector.extract_strided_slice %397 {offsets = [16, 0], sizes = [8, 32], strides = [1, 1]} : vector<32x32xf32> to vector<8x32xf32>
    %cst_196 = arith.constant dense<0.000000e+00> : vector<8x32xf32>
    %462 = tpu.matmul %460, %461, %cst_196 {dimension_numbers = #tpu.dot_dimension_numbers<[1], [0], [0], [1], [0, 0, 1, 1], [], []>} : vector<8x8xf32>, vector<8x32xf32>, vector<8x32xf32> -> vector<8x32xf32>
    %463 = arith.addf %442, %462 : vector<8x32xf32>
    %464 = vector.extract_strided_slice %393 {offsets = [0, 24], sizes = [8, 8], strides = [1, 1]} : vector<8x32xf32> to vector<8x8xf32>
    %cst_197 = arith.constant 0.353553385 : f32
    %465 = vector.broadcast %cst_197 : f32 to vector<8x8xf32>
    %466 = arith.mulf %464, %465 : vector<8x8xf32>
    %467 = vector.extract_strided_slice %394 {offsets = [0, 24], sizes = [8, 8], strides = [1, 1]} : vector<8x32xf32> to vector<8x8xf32>
    %cst_198 = arith.constant dense<0.000000e+00> : vector<8x8xf32>
    %468 = tpu.matmul %466, %467, %cst_198 {dimension_numbers = #tpu.dot_dimension_numbers<[1], [1], [0], [0], [0, 0, 1, 0], [], []>} : vector<8x8xf32>, vector<8x8xf32>, vector<8x8xf32> -> vector<8x8xf32>
    %469 = arith.addf %468, %39 : vector<8x8xf32>
    %cst_199 = arith.constant dense<0xFF800000> : vector<8xf32>
    %470 = vector.multi_reduction <maximumf>, %469, %cst_199 [1] : vector<8x8xf32> to vector<8xf32>
    %471 = vector.shape_cast %470 : vector<8xf32> to vector<8x1xf32>
    %472 = vector.broadcast %471 : vector<8x1xf32> to vector<8x8xf32>
    %473 = arith.subf %469, %472 : vector<8x8xf32>
    %474 = math.exp %473 : vector<8x8xf32>
    %cst_200 = arith.constant dense<0.000000e+00> : vector<8xf32>
    %475 = vector.multi_reduction <add>, %474, %cst_200 [1] : vector<8x8xf32> to vector<8xf32>
    %476 = vector.shape_cast %475 : vector<8xf32> to vector<8x1xf32>
    %477 = tpu.reciprocal %476 {approx = true} : vector<8x1xf32> -> vector<8x1xf32>
    %478 = vector.broadcast %477 : vector<8x1xf32> to vector<8x8xf32>
    %479 = arith.mulf %474, %478 : vector<8x8xf32>
    %480 = vector.extract_strided_slice %395 {offsets = [0, 24], sizes = [8, 8], strides = [1, 1]} : vector<8x32xf32> to vector<8x8xf32>
    %cst_201 = arith.constant dense<0.000000e+00> : vector<8x8xf32>
    %481 = tpu.matmul %479, %480, %cst_201 {dimension_numbers = #tpu.dot_dimension_numbers<[1], [0], [0], [1], [0, 0, 1, 1], [], []>} : vector<8x8xf32>, vector<8x8xf32>, vector<8x8xf32> -> vector<8x8xf32>
    %482 = vector.extract_strided_slice %397 {offsets = [24, 0], sizes = [8, 32], strides = [1, 1]} : vector<32x32xf32> to vector<8x32xf32>
    %cst_202 = arith.constant dense<0.000000e+00> : vector<8x32xf32>
    %483 = tpu.matmul %481, %482, %cst_202 {dimension_numbers = #tpu.dot_dimension_numbers<[1], [0], [0], [1], [0, 0, 1, 1], [], []>} : vector<8x8xf32>, vector<8x32xf32>, vector<8x32xf32> -> vector<8x32xf32>
    %484 = arith.addf %463, %483 : vector<8x32xf32>
    %485 = arith.addf %385, %484 : vector<8x32xf32>
    %c1_203 = arith.constant 1 : index
    %c0_204 = arith.constant 0 : index
    %c0_205 = arith.constant 0 : index
    %486 = vector.load %arg12[%c1_203, %c0_204, %c0_205] : memref<2x1x32xf32, #tpu.memory_space<vmem>>, vector<1x1x32xf32>
    %487 = vector.shape_cast %486 : vector<1x1x32xf32> to vector<1x32xf32>
    %c1_206 = arith.constant 1 : index
    %c0_207 = arith.constant 0 : index
    %c0_208 = arith.constant 0 : index
    %488 = vector.load %arg13[%c1_206, %c0_207, %c0_208] : memref<2x1x32xf32, #tpu.memory_space<vmem>>, vector<1x1x32xf32>
    %489 = vector.shape_cast %488 : vector<1x1x32xf32> to vector<1x32xf32>
    %cst_209 = arith.constant dense<0.000000e+00> : vector<8xf32>
    %490 = vector.multi_reduction <add>, %485, %cst_209 [1] : vector<8x32xf32> to vector<8xf32>
    %491 = vector.shape_cast %490 : vector<8xf32> to vector<8x1xf32>
    %cst_210 = arith.constant 3.200000e+01 : f32
    %492 = vector.broadcast %cst_210 : f32 to vector<8x1xf32>
    %493 = arith.divf %491, %492 : vector<8x1xf32>
    %494 = vector.broadcast %493 : vector<8x1xf32> to vector<8x32xf32>
    %495 = arith.subf %485, %494 : vector<8x32xf32>
    %496 = arith.mulf %495, %495 : vector<8x32xf32>
    %cst_211 = arith.constant dense<0.000000e+00> : vector<8xf32>
    %497 = vector.multi_reduction <add>, %496, %cst_211 [1] : vector<8x32xf32> to vector<8xf32>
    %498 = vector.shape_cast %497 : vector<8xf32> to vector<8x1xf32>
    %cst_212 = arith.constant 3.200000e+01 : f32
    %499 = vector.broadcast %cst_212 : f32 to vector<8x1xf32>
    %500 = arith.divf %498, %499 : vector<8x1xf32>
    %501 = vector.broadcast %493 : vector<8x1xf32> to vector<8x32xf32>
    %502 = arith.subf %485, %501 : vector<8x32xf32>
    %cst_213 = arith.constant 9.99999974E-6 : f32
    %503 = vector.broadcast %cst_213 : f32 to vector<8x1xf32>
    %504 = arith.addf %500, %503 : vector<8x1xf32>
    %505 = math.rsqrt %504 : vector<8x1xf32>
    %506 = vector.broadcast %505 : vector<8x1xf32> to vector<8x32xf32>
    %507 = arith.mulf %502, %506 : vector<8x32xf32>
    %508 = vector.broadcast %487 : vector<1x32xf32> to vector<8x32xf32>
    %509 = arith.mulf %507, %508 : vector<8x32xf32>
    %510 = vector.broadcast %489 : vector<1x32xf32> to vector<8x32xf32>
    %511 = arith.addf %509, %510 : vector<8x32xf32>
    %c1_214 = arith.constant 1 : index
    %c0_215 = arith.constant 0 : index
    %c0_216 = arith.constant 0 : index
    %512 = vector.load %arg14[%c1_214, %c0_215, %c0_216] : memref<2x32x32xf32, #tpu.memory_space<vmem>>, vector<1x32x32xf32>
    %513 = vector.shape_cast %512 : vector<1x32x32xf32> to vector<32x32xf32>
    %cst_217 = arith.constant dense<0.000000e+00> : vector<8x32xf32>
    %514 = tpu.matmul %511, %513, %cst_217 {dimension_numbers = #tpu.dot_dimension_numbers<[1], [0], [0], [1], [0, 0, 1, 1], [], []>} : vector<8x32xf32>, vector<32x32xf32>, vector<8x32xf32> -> vector<8x32xf32>
    %c1_218 = arith.constant 1 : index
    %c0_219 = arith.constant 0 : index
    %c0_220 = arith.constant 0 : index
    %515 = vector.load %arg15[%c1_218, %c0_219, %c0_220] : memref<2x1x32xf32, #tpu.memory_space<vmem>>, vector<1x1x32xf32>
    %516 = vector.shape_cast %515 : vector<1x1x32xf32> to vector<1x32xf32>
    %517 = vector.broadcast %516 : vector<1x32xf32> to vector<8x32xf32>
    %518 = arith.addf %514, %517 : vector<8x32xf32>
    %c1_221 = arith.constant 1 : index
    %c0_222 = arith.constant 0 : index
    %c0_223 = arith.constant 0 : index
    %519 = vector.load %arg16[%c1_221, %c0_222, %c0_223] : memref<2x32x64xf32, #tpu.memory_space<vmem>>, vector<1x32x64xf32>
    %520 = vector.shape_cast %519 : vector<1x32x64xf32> to vector<32x64xf32>
    %cst_224 = arith.constant dense<0.000000e+00> : vector<8x64xf32>
    %521 = tpu.matmul %29, %520, %cst_224 {dimension_numbers = #tpu.dot_dimension_numbers<[1], [0], [0], [1], [0, 0, 1, 1], [], []>} : vector<8x32xf32>, vector<32x64xf32>, vector<8x64xf32> -> vector<8x64xf32>
    %c1_225 = arith.constant 1 : index
    %c0_226 = arith.constant 0 : index
    %c0_227 = arith.constant 0 : index
    %522 = vector.load %arg17[%c1_225, %c0_226, %c0_227] : memref<2x1x64xf32, #tpu.memory_space<vmem>>, vector<1x1x64xf32>
    %523 = vector.shape_cast %522 : vector<1x1x64xf32> to vector<1x64xf32>
    %524 = vector.broadcast %523 : vector<1x64xf32> to vector<8x64xf32>
    %525 = arith.addf %521, %524 : vector<8x64xf32>
    %526 = vector.extract_strided_slice %525 {offsets = [0, 0], sizes = [8, 32], strides = [1, 1]} : vector<8x64xf32> to vector<8x32xf32>
    %527 = vector.extract_strided_slice %525 {offsets = [0, 32], sizes = [8, 32], strides = [1, 1]} : vector<8x64xf32> to vector<8x32xf32>
    %c1_228 = arith.constant 1 : index
    %c0_229 = arith.constant 0 : index
    %c0_230 = arith.constant 0 : index
    %528 = vector.load %arg18[%c1_228, %c0_229, %c0_230] : memref<2x32x32xf32, #tpu.memory_space<vmem>>, vector<1x32x32xf32>
    %529 = vector.shape_cast %528 : vector<1x32x32xf32> to vector<32x32xf32>
    %c1_231 = arith.constant 1 : index
    %c0_232 = arith.constant 0 : index
    %c0_233 = arith.constant 0 : index
    %530 = vector.load %arg19[%c1_231, %c0_232, %c0_233] : memref<2x1x32xf32, #tpu.memory_space<vmem>>, vector<1x1x32xf32>
    %531 = vector.shape_cast %530 : vector<1x1x32xf32> to vector<1x32xf32>
    %532 = vector.extract_strided_slice %518 {offsets = [0, 0], sizes = [8, 8], strides = [1, 1]} : vector<8x32xf32> to vector<8x8xf32>
    %cst_234 = arith.constant 0.353553385 : f32
    %533 = vector.broadcast %cst_234 : f32 to vector<8x8xf32>
    %534 = arith.mulf %532, %533 : vector<8x8xf32>
    %535 = vector.extract_strided_slice %526 {offsets = [0, 0], sizes = [8, 8], strides = [1, 1]} : vector<8x32xf32> to vector<8x8xf32>
    %cst_235 = arith.constant dense<0.000000e+00> : vector<8x8xf32>
    %536 = tpu.matmul %534, %535, %cst_235 {dimension_numbers = #tpu.dot_dimension_numbers<[1], [1], [0], [0], [0, 0, 1, 0], [], []>} : vector<8x8xf32>, vector<8x8xf32>, vector<8x8xf32> -> vector<8x8xf32>
    %537 = vector.broadcast %41 : vector<1x8xf32> to vector<8x8xf32>
    %538 = arith.addf %536, %537 : vector<8x8xf32>
    %cst_236 = arith.constant dense<0xFF800000> : vector<8xf32>
    %539 = vector.multi_reduction <maximumf>, %538, %cst_236 [1] : vector<8x8xf32> to vector<8xf32>
    %540 = vector.shape_cast %539 : vector<8xf32> to vector<8x1xf32>
    %541 = vector.broadcast %540 : vector<8x1xf32> to vector<8x8xf32>
    %542 = arith.subf %538, %541 : vector<8x8xf32>
    %543 = math.exp %542 : vector<8x8xf32>
    %cst_237 = arith.constant dense<0.000000e+00> : vector<8xf32>
    %544 = vector.multi_reduction <add>, %543, %cst_237 [1] : vector<8x8xf32> to vector<8xf32>
    %545 = vector.shape_cast %544 : vector<8xf32> to vector<8x1xf32>
    %546 = tpu.reciprocal %545 {approx = true} : vector<8x1xf32> -> vector<8x1xf32>
    %547 = vector.broadcast %546 : vector<8x1xf32> to vector<8x8xf32>
    %548 = arith.mulf %543, %547 : vector<8x8xf32>
    %549 = vector.extract_strided_slice %527 {offsets = [0, 0], sizes = [8, 8], strides = [1, 1]} : vector<8x32xf32> to vector<8x8xf32>
    %cst_238 = arith.constant dense<0.000000e+00> : vector<8x8xf32>
    %550 = tpu.matmul %548, %549, %cst_238 {dimension_numbers = #tpu.dot_dimension_numbers<[1], [0], [0], [1], [0, 0, 1, 1], [], []>} : vector<8x8xf32>, vector<8x8xf32>, vector<8x8xf32> -> vector<8x8xf32>
    %551 = vector.extract_strided_slice %529 {offsets = [0, 0], sizes = [8, 32], strides = [1, 1]} : vector<32x32xf32> to vector<8x32xf32>
    %cst_239 = arith.constant dense<0.000000e+00> : vector<8x32xf32>
    %552 = tpu.matmul %550, %551, %cst_239 {dimension_numbers = #tpu.dot_dimension_numbers<[1], [0], [0], [1], [0, 0, 1, 1], [], []>} : vector<8x8xf32>, vector<8x32xf32>, vector<8x32xf32> -> vector<8x32xf32>
    %553 = vector.broadcast %531 : vector<1x32xf32> to vector<8x32xf32>
    %554 = arith.addf %553, %552 : vector<8x32xf32>
    %555 = vector.extract_strided_slice %518 {offsets = [0, 8], sizes = [8, 8], strides = [1, 1]} : vector<8x32xf32> to vector<8x8xf32>
    %cst_240 = arith.constant 0.353553385 : f32
    %556 = vector.broadcast %cst_240 : f32 to vector<8x8xf32>
    %557 = arith.mulf %555, %556 : vector<8x8xf32>
    %558 = vector.extract_strided_slice %526 {offsets = [0, 8], sizes = [8, 8], strides = [1, 1]} : vector<8x32xf32> to vector<8x8xf32>
    %cst_241 = arith.constant dense<0.000000e+00> : vector<8x8xf32>
    %559 = tpu.matmul %557, %558, %cst_241 {dimension_numbers = #tpu.dot_dimension_numbers<[1], [1], [0], [0], [0, 0, 1, 0], [], []>} : vector<8x8xf32>, vector<8x8xf32>, vector<8x8xf32> -> vector<8x8xf32>
    %560 = vector.broadcast %41 : vector<1x8xf32> to vector<8x8xf32>
    %561 = arith.addf %559, %560 : vector<8x8xf32>
    %cst_242 = arith.constant dense<0xFF800000> : vector<8xf32>
    %562 = vector.multi_reduction <maximumf>, %561, %cst_242 [1] : vector<8x8xf32> to vector<8xf32>
    %563 = vector.shape_cast %562 : vector<8xf32> to vector<8x1xf32>
    %564 = vector.broadcast %563 : vector<8x1xf32> to vector<8x8xf32>
    %565 = arith.subf %561, %564 : vector<8x8xf32>
    %566 = math.exp %565 : vector<8x8xf32>
    %cst_243 = arith.constant dense<0.000000e+00> : vector<8xf32>
    %567 = vector.multi_reduction <add>, %566, %cst_243 [1] : vector<8x8xf32> to vector<8xf32>
    %568 = vector.shape_cast %567 : vector<8xf32> to vector<8x1xf32>
    %569 = tpu.reciprocal %568 {approx = true} : vector<8x1xf32> -> vector<8x1xf32>
    %570 = vector.broadcast %569 : vector<8x1xf32> to vector<8x8xf32>
    %571 = arith.mulf %566, %570 : vector<8x8xf32>
    %572 = vector.extract_strided_slice %527 {offsets = [0, 8], sizes = [8, 8], strides = [1, 1]} : vector<8x32xf32> to vector<8x8xf32>
    %cst_244 = arith.constant dense<0.000000e+00> : vector<8x8xf32>
    %573 = tpu.matmul %571, %572, %cst_244 {dimension_numbers = #tpu.dot_dimension_numbers<[1], [0], [0], [1], [0, 0, 1, 1], [], []>} : vector<8x8xf32>, vector<8x8xf32>, vector<8x8xf32> -> vector<8x8xf32>
    %574 = vector.extract_strided_slice %529 {offsets = [8, 0], sizes = [8, 32], strides = [1, 1]} : vector<32x32xf32> to vector<8x32xf32>
    %cst_245 = arith.constant dense<0.000000e+00> : vector<8x32xf32>
    %575 = tpu.matmul %573, %574, %cst_245 {dimension_numbers = #tpu.dot_dimension_numbers<[1], [0], [0], [1], [0, 0, 1, 1], [], []>} : vector<8x8xf32>, vector<8x32xf32>, vector<8x32xf32> -> vector<8x32xf32>
    %576 = arith.addf %554, %575 : vector<8x32xf32>
    %577 = vector.extract_strided_slice %518 {offsets = [0, 16], sizes = [8, 8], strides = [1, 1]} : vector<8x32xf32> to vector<8x8xf32>
    %cst_246 = arith.constant 0.353553385 : f32
    %578 = vector.broadcast %cst_246 : f32 to vector<8x8xf32>
    %579 = arith.mulf %577, %578 : vector<8x8xf32>
    %580 = vector.extract_strided_slice %526 {offsets = [0, 16], sizes = [8, 8], strides = [1, 1]} : vector<8x32xf32> to vector<8x8xf32>
    %cst_247 = arith.constant dense<0.000000e+00> : vector<8x8xf32>
    %581 = tpu.matmul %579, %580, %cst_247 {dimension_numbers = #tpu.dot_dimension_numbers<[1], [1], [0], [0], [0, 0, 1, 0], [], []>} : vector<8x8xf32>, vector<8x8xf32>, vector<8x8xf32> -> vector<8x8xf32>
    %582 = vector.broadcast %41 : vector<1x8xf32> to vector<8x8xf32>
    %583 = arith.addf %581, %582 : vector<8x8xf32>
    %cst_248 = arith.constant dense<0xFF800000> : vector<8xf32>
    %584 = vector.multi_reduction <maximumf>, %583, %cst_248 [1] : vector<8x8xf32> to vector<8xf32>
    %585 = vector.shape_cast %584 : vector<8xf32> to vector<8x1xf32>
    %586 = vector.broadcast %585 : vector<8x1xf32> to vector<8x8xf32>
    %587 = arith.subf %583, %586 : vector<8x8xf32>
    %588 = math.exp %587 : vector<8x8xf32>
    %cst_249 = arith.constant dense<0.000000e+00> : vector<8xf32>
    %589 = vector.multi_reduction <add>, %588, %cst_249 [1] : vector<8x8xf32> to vector<8xf32>
    %590 = vector.shape_cast %589 : vector<8xf32> to vector<8x1xf32>
    %591 = tpu.reciprocal %590 {approx = true} : vector<8x1xf32> -> vector<8x1xf32>
    %592 = vector.broadcast %591 : vector<8x1xf32> to vector<8x8xf32>
    %593 = arith.mulf %588, %592 : vector<8x8xf32>
    %594 = vector.extract_strided_slice %527 {offsets = [0, 16], sizes = [8, 8], strides = [1, 1]} : vector<8x32xf32> to vector<8x8xf32>
    %cst_250 = arith.constant dense<0.000000e+00> : vector<8x8xf32>
    %595 = tpu.matmul %593, %594, %cst_250 {dimension_numbers = #tpu.dot_dimension_numbers<[1], [0], [0], [1], [0, 0, 1, 1], [], []>} : vector<8x8xf32>, vector<8x8xf32>, vector<8x8xf32> -> vector<8x8xf32>
    %596 = vector.extract_strided_slice %529 {offsets = [16, 0], sizes = [8, 32], strides = [1, 1]} : vector<32x32xf32> to vector<8x32xf32>
    %cst_251 = arith.constant dense<0.000000e+00> : vector<8x32xf32>
    %597 = tpu.matmul %595, %596, %cst_251 {dimension_numbers = #tpu.dot_dimension_numbers<[1], [0], [0], [1], [0, 0, 1, 1], [], []>} : vector<8x8xf32>, vector<8x32xf32>, vector<8x32xf32> -> vector<8x32xf32>
    %598 = arith.addf %576, %597 : vector<8x32xf32>
    %599 = vector.extract_strided_slice %518 {offsets = [0, 24], sizes = [8, 8], strides = [1, 1]} : vector<8x32xf32> to vector<8x8xf32>
    %cst_252 = arith.constant 0.353553385 : f32
    %600 = vector.broadcast %cst_252 : f32 to vector<8x8xf32>
    %601 = arith.mulf %599, %600 : vector<8x8xf32>
    %602 = vector.extract_strided_slice %526 {offsets = [0, 24], sizes = [8, 8], strides = [1, 1]} : vector<8x32xf32> to vector<8x8xf32>
    %cst_253 = arith.constant dense<0.000000e+00> : vector<8x8xf32>
    %603 = tpu.matmul %601, %602, %cst_253 {dimension_numbers = #tpu.dot_dimension_numbers<[1], [1], [0], [0], [0, 0, 1, 0], [], []>} : vector<8x8xf32>, vector<8x8xf32>, vector<8x8xf32> -> vector<8x8xf32>
    %604 = vector.broadcast %41 : vector<1x8xf32> to vector<8x8xf32>
    %605 = arith.addf %603, %604 : vector<8x8xf32>
    %cst_254 = arith.constant dense<0xFF800000> : vector<8xf32>
    %606 = vector.multi_reduction <maximumf>, %605, %cst_254 [1] : vector<8x8xf32> to vector<8xf32>
    %607 = vector.shape_cast %606 : vector<8xf32> to vector<8x1xf32>
    %608 = vector.broadcast %607 : vector<8x1xf32> to vector<8x8xf32>
    %609 = arith.subf %605, %608 : vector<8x8xf32>
    %610 = math.exp %609 : vector<8x8xf32>
    %cst_255 = arith.constant dense<0.000000e+00> : vector<8xf32>
    %611 = vector.multi_reduction <add>, %610, %cst_255 [1] : vector<8x8xf32> to vector<8xf32>
    %612 = vector.shape_cast %611 : vector<8xf32> to vector<8x1xf32>
    %613 = tpu.reciprocal %612 {approx = true} : vector<8x1xf32> -> vector<8x1xf32>
    %614 = vector.broadcast %613 : vector<8x1xf32> to vector<8x8xf32>
    %615 = arith.mulf %610, %614 : vector<8x8xf32>
    %616 = vector.extract_strided_slice %527 {offsets = [0, 24], sizes = [8, 8], strides = [1, 1]} : vector<8x32xf32> to vector<8x8xf32>
    %cst_256 = arith.constant dense<0.000000e+00> : vector<8x8xf32>
    %617 = tpu.matmul %615, %616, %cst_256 {dimension_numbers = #tpu.dot_dimension_numbers<[1], [0], [0], [1], [0, 0, 1, 1], [], []>} : vector<8x8xf32>, vector<8x8xf32>, vector<8x8xf32> -> vector<8x8xf32>
    %618 = vector.extract_strided_slice %529 {offsets = [24, 0], sizes = [8, 32], strides = [1, 1]} : vector<32x32xf32> to vector<8x32xf32>
    %cst_257 = arith.constant dense<0.000000e+00> : vector<8x32xf32>
    %619 = tpu.matmul %617, %618, %cst_257 {dimension_numbers = #tpu.dot_dimension_numbers<[1], [0], [0], [1], [0, 0, 1, 1], [], []>} : vector<8x8xf32>, vector<8x32xf32>, vector<8x32xf32> -> vector<8x32xf32>
    %620 = arith.addf %598, %619 : vector<8x32xf32>
    %621 = arith.addf %511, %620 : vector<8x32xf32>
    %c1_258 = arith.constant 1 : index
    %c0_259 = arith.constant 0 : index
    %c0_260 = arith.constant 0 : index
    %622 = vector.load %arg20[%c1_258, %c0_259, %c0_260] : memref<2x1x32xf32, #tpu.memory_space<vmem>>, vector<1x1x32xf32>
    %623 = vector.shape_cast %622 : vector<1x1x32xf32> to vector<1x32xf32>
    %c1_261 = arith.constant 1 : index
    %c0_262 = arith.constant 0 : index
    %c0_263 = arith.constant 0 : index
    %624 = vector.load %arg21[%c1_261, %c0_262, %c0_263] : memref<2x1x32xf32, #tpu.memory_space<vmem>>, vector<1x1x32xf32>
    %625 = vector.shape_cast %624 : vector<1x1x32xf32> to vector<1x32xf32>
    %cst_264 = arith.constant dense<0.000000e+00> : vector<8xf32>
    %626 = vector.multi_reduction <add>, %621, %cst_264 [1] : vector<8x32xf32> to vector<8xf32>
    %627 = vector.shape_cast %626 : vector<8xf32> to vector<8x1xf32>
    %cst_265 = arith.constant 3.200000e+01 : f32
    %628 = vector.broadcast %cst_265 : f32 to vector<8x1xf32>
    %629 = arith.divf %627, %628 : vector<8x1xf32>
    %630 = vector.broadcast %629 : vector<8x1xf32> to vector<8x32xf32>
    %631 = arith.subf %621, %630 : vector<8x32xf32>
    %632 = arith.mulf %631, %631 : vector<8x32xf32>
    %cst_266 = arith.constant dense<0.000000e+00> : vector<8xf32>
    %633 = vector.multi_reduction <add>, %632, %cst_266 [1] : vector<8x32xf32> to vector<8xf32>
    %634 = vector.shape_cast %633 : vector<8xf32> to vector<8x1xf32>
    %cst_267 = arith.constant 3.200000e+01 : f32
    %635 = vector.broadcast %cst_267 : f32 to vector<8x1xf32>
    %636 = arith.divf %634, %635 : vector<8x1xf32>
    %637 = vector.broadcast %629 : vector<8x1xf32> to vector<8x32xf32>
    %638 = arith.subf %621, %637 : vector<8x32xf32>
    %cst_268 = arith.constant 9.99999974E-6 : f32
    %639 = vector.broadcast %cst_268 : f32 to vector<8x1xf32>
    %640 = arith.addf %636, %639 : vector<8x1xf32>
    %641 = math.rsqrt %640 : vector<8x1xf32>
    %642 = vector.broadcast %641 : vector<8x1xf32> to vector<8x32xf32>
    %643 = arith.mulf %638, %642 : vector<8x32xf32>
    %644 = vector.broadcast %623 : vector<1x32xf32> to vector<8x32xf32>
    %645 = arith.mulf %643, %644 : vector<8x32xf32>
    %646 = vector.broadcast %625 : vector<1x32xf32> to vector<8x32xf32>
    %647 = arith.addf %645, %646 : vector<8x32xf32>
    %c1_269 = arith.constant 1 : index
    %c0_270 = arith.constant 0 : index
    %c0_271 = arith.constant 0 : index
    %648 = vector.load %arg22[%c1_269, %c0_270, %c0_271] : memref<2x32x64xf32, #tpu.memory_space<vmem>>, vector<1x32x64xf32>
    %649 = vector.shape_cast %648 : vector<1x32x64xf32> to vector<32x64xf32>
    %cst_272 = arith.constant dense<0.000000e+00> : vector<8x64xf32>
    %650 = tpu.matmul %647, %649, %cst_272 {dimension_numbers = #tpu.dot_dimension_numbers<[1], [0], [0], [1], [0, 0, 1, 1], [], []>} : vector<8x32xf32>, vector<32x64xf32>, vector<8x64xf32> -> vector<8x64xf32>
    %c1_273 = arith.constant 1 : index
    %c0_274 = arith.constant 0 : index
    %c0_275 = arith.constant 0 : index
    %651 = vector.load %arg23[%c1_273, %c0_274, %c0_275] : memref<2x1x64xf32, #tpu.memory_space<vmem>>, vector<1x1x64xf32>
    %652 = vector.shape_cast %651 : vector<1x1x64xf32> to vector<1x64xf32>
    %653 = vector.broadcast %652 : vector<1x64xf32> to vector<8x64xf32>
    %654 = arith.addf %650, %653 : vector<8x64xf32>
    %cst_276 = arith.constant 5.000000e-01 : f32
    %655 = vector.broadcast %cst_276 : f32 to vector<8x64xf32>
    %656 = arith.mulf %655, %654 : vector<8x64xf32>
    %cst_277 = arith.constant 0.707106769 : f32
    %657 = vector.broadcast %cst_277 : f32 to vector<8x64xf32>
    %658 = arith.mulf %654, %657 : vector<8x64xf32>
    %cst_278 = arith.constant 0.000000e+00 : f32
    %659 = vector.broadcast %cst_278 : f32 to vector<8x64xf32>
    %660 = arith.cmpf oge, %658, %659 : vector<8x64xf32>
    %cst_279 = arith.constant 1.000000e+00 : f32
    %cst_280 = arith.constant -1.000000e+00 : f32
    %661 = vector.broadcast %cst_279 : f32 to vector<8x64xf32>
    %662 = vector.broadcast %cst_280 : f32 to vector<8x64xf32>
    %663 = arith.select %660, %661, %662 : vector<8x64xi1>, vector<8x64xf32>
    %664 = math.absf %658 : vector<8x64xf32>
    %cst_281 = arith.constant 0.327591091 : f32
    %665 = vector.broadcast %cst_281 : f32 to vector<8x64xf32>
    %666 = arith.mulf %665, %664 : vector<8x64xf32>
    %cst_282 = arith.constant 1.000000e+00 : f32
    %667 = vector.broadcast %cst_282 : f32 to vector<8x64xf32>
    %668 = arith.addf %667, %666 : vector<8x64xf32>
    %cst_283 = arith.constant 1.000000e+00 : f32
    %669 = vector.broadcast %cst_283 : f32 to vector<8x64xf32>
    %670 = arith.divf %669, %668 : vector<8x64xf32>
    %cst_284 = arith.constant 1.06140542 : f32
    %671 = vector.broadcast %cst_284 : f32 to vector<8x64xf32>
    %672 = arith.mulf %671, %670 : vector<8x64xf32>
    %cst_285 = arith.constant -1.45315206 : f32
    %673 = vector.broadcast %cst_285 : f32 to vector<8x64xf32>
    %674 = arith.addf %672, %673 : vector<8x64xf32>
    %675 = arith.mulf %674, %670 : vector<8x64xf32>
    %cst_286 = arith.constant 1.42141378 : f32
    %676 = vector.broadcast %cst_286 : f32 to vector<8x64xf32>
    %677 = arith.addf %675, %676 : vector<8x64xf32>
    %678 = arith.mulf %677, %670 : vector<8x64xf32>
    %cst_287 = arith.constant -0.284496725 : f32
    %679 = vector.broadcast %cst_287 : f32 to vector<8x64xf32>
    %680 = arith.addf %678, %679 : vector<8x64xf32>
    %681 = arith.mulf %680, %670 : vector<8x64xf32>
    %cst_288 = arith.constant 0.254829586 : f32
    %682 = vector.broadcast %cst_288 : f32 to vector<8x64xf32>
    %683 = arith.addf %681, %682 : vector<8x64xf32>
    %684 = arith.mulf %683, %670 : vector<8x64xf32>
    %cst_289 = arith.constant 0.000000e+00 : f32
    %685 = vector.broadcast %cst_289 : f32 to vector<8x64xf32>
    %686 = arith.subf %685, %664 : vector<8x64xf32>
    %687 = arith.mulf %686, %664 : vector<8x64xf32>
    %688 = math.exp %687 : vector<8x64xf32>
    %689 = arith.mulf %684, %688 : vector<8x64xf32>
    %cst_290 = arith.constant 1.000000e+00 : f32
    %690 = vector.broadcast %cst_290 : f32 to vector<8x64xf32>
    %691 = arith.subf %690, %689 : vector<8x64xf32>
    %692 = arith.mulf %663, %691 : vector<8x64xf32>
    %cst_291 = arith.constant 1.000000e+00 : f32
    %693 = vector.broadcast %cst_291 : f32 to vector<8x64xf32>
    %694 = arith.addf %693, %692 : vector<8x64xf32>
    %695 = arith.mulf %656, %694 : vector<8x64xf32>
    %c1_292 = arith.constant 1 : index
    %c0_293 = arith.constant 0 : index
    %c0_294 = arith.constant 0 : index
    %696 = vector.load %arg24[%c1_292, %c0_293, %c0_294] : memref<2x64x32xf32, #tpu.memory_space<vmem>>, vector<1x64x32xf32>
    %697 = vector.shape_cast %696 : vector<1x64x32xf32> to vector<64x32xf32>
    %cst_295 = arith.constant dense<0.000000e+00> : vector<8x32xf32>
    %698 = tpu.matmul %695, %697, %cst_295 {dimension_numbers = #tpu.dot_dimension_numbers<[1], [0], [0], [1], [0, 0, 1, 1], [], []>} : vector<8x64xf32>, vector<64x32xf32>, vector<8x32xf32> -> vector<8x32xf32>
    %c1_296 = arith.constant 1 : index
    %c0_297 = arith.constant 0 : index
    %c0_298 = arith.constant 0 : index
    %699 = vector.load %arg25[%c1_296, %c0_297, %c0_298] : memref<2x1x32xf32, #tpu.memory_space<vmem>>, vector<1x1x32xf32>
    %700 = vector.shape_cast %699 : vector<1x1x32xf32> to vector<1x32xf32>
    %701 = vector.broadcast %700 : vector<1x32xf32> to vector<8x32xf32>
    %702 = arith.addf %698, %701 : vector<8x32xf32>
    %703 = arith.addf %647, %702 : vector<8x32xf32>
    %c1_299 = arith.constant 1 : index
    %c0_300 = arith.constant 0 : index
    %c0_301 = arith.constant 0 : index
    %704 = vector.load %arg26[%c1_299, %c0_300, %c0_301] : memref<2x1x32xf32, #tpu.memory_space<vmem>>, vector<1x1x32xf32>
    %705 = vector.shape_cast %704 : vector<1x1x32xf32> to vector<1x32xf32>
    %c1_302 = arith.constant 1 : index
    %c0_303 = arith.constant 0 : index
    %c0_304 = arith.constant 0 : index
    %706 = vector.load %arg27[%c1_302, %c0_303, %c0_304] : memref<2x1x32xf32, #tpu.memory_space<vmem>>, vector<1x1x32xf32>
    %707 = vector.shape_cast %706 : vector<1x1x32xf32> to vector<1x32xf32>
    %cst_305 = arith.constant dense<0.000000e+00> : vector<8xf32>
    %708 = vector.multi_reduction <add>, %703, %cst_305 [1] : vector<8x32xf32> to vector<8xf32>
    %709 = vector.shape_cast %708 : vector<8xf32> to vector<8x1xf32>
    %cst_306 = arith.constant 3.200000e+01 : f32
    %710 = vector.broadcast %cst_306 : f32 to vector<8x1xf32>
    %711 = arith.divf %709, %710 : vector<8x1xf32>
    %712 = vector.broadcast %711 : vector<8x1xf32> to vector<8x32xf32>
    %713 = arith.subf %703, %712 : vector<8x32xf32>
    %714 = arith.mulf %713, %713 : vector<8x32xf32>
    %cst_307 = arith.constant dense<0.000000e+00> : vector<8xf32>
    %715 = vector.multi_reduction <add>, %714, %cst_307 [1] : vector<8x32xf32> to vector<8xf32>
    %716 = vector.shape_cast %715 : vector<8xf32> to vector<8x1xf32>
    %cst_308 = arith.constant 3.200000e+01 : f32
    %717 = vector.broadcast %cst_308 : f32 to vector<8x1xf32>
    %718 = arith.divf %716, %717 : vector<8x1xf32>
    %719 = vector.broadcast %711 : vector<8x1xf32> to vector<8x32xf32>
    %720 = arith.subf %703, %719 : vector<8x32xf32>
    %cst_309 = arith.constant 9.99999974E-6 : f32
    %721 = vector.broadcast %cst_309 : f32 to vector<8x1xf32>
    %722 = arith.addf %718, %721 : vector<8x1xf32>
    %723 = math.rsqrt %722 : vector<8x1xf32>
    %724 = vector.broadcast %723 : vector<8x1xf32> to vector<8x32xf32>
    %725 = arith.mulf %720, %724 : vector<8x32xf32>
    %726 = vector.broadcast %705 : vector<1x32xf32> to vector<8x32xf32>
    %727 = arith.mulf %725, %726 : vector<8x32xf32>
    %728 = vector.broadcast %707 : vector<1x32xf32> to vector<8x32xf32>
    %729 = arith.addf %727, %728 : vector<8x32xf32>
    %c0_310 = arith.constant 0 : index
    %c0_311 = arith.constant 0 : index
    %730 = vector.load %arg28[%c0_310, %c0_311] : memref<128x32xf32, #tpu.memory_space<vmem>>, vector<128x32xf32>
    %cst_312 = arith.constant dense<0.000000e+00> : vector<8x128xf32>
    %731 = tpu.matmul %729, %730, %cst_312 {dimension_numbers = #tpu.dot_dimension_numbers<[1], [1], [0], [0], [0, 0, 1, 0], [], []>} : vector<8x32xf32>, vector<128x32xf32>, vector<8x128xf32> -> vector<8x128xf32>
    %c0_313 = arith.constant 0 : index
    %c0_314 = arith.constant 0 : index
    %732 = vector.load %arg29[%c0_313, %c0_314] : memref<1x128xf32, #tpu.memory_space<vmem>>, vector<1x128xf32>
    %733 = vector.broadcast %732 : vector<1x128xf32> to vector<8x128xf32>
    %734 = arith.addf %731, %733 : vector<8x128xf32>
    %c0_315 = arith.constant 0 : index
    %c0_316 = arith.constant 0 : index
    %c0_317 = arith.constant 0 : index
    %735 = vector.load %arg30[%c0_315, %c0_316, %c0_317] : memref<1x8x128xf32, #tpu.memory_space<vmem>>, vector<1x8x128xf32>
    %736 = vector.shape_cast %735 : vector<1x8x128xf32> to vector<8x128xf32>
    %737 = vector.shape_cast %734 : vector<8x128xf32> to vector<1x8x128xf32>
    tpu.vector_store %arg30[%c0_315, %c0_316, %c0_317], %737 {strides = array<i32>} : memref<1x8x128xf32, #tpu.memory_space<vmem>>, vector<1x8x128xf32>,
    return
  }
  func.func @transform_0(%arg0: i32) -> (i32, i32, i32) {
    %c0_i32 = arith.constant 0 : i32
    %c0_i32_0 = arith.constant 0 : i32
    %c0_i32_1 = arith.constant 0 : i32
    return %arg0, %c0_i32, %c0_i32_0 : i32, i32, i32
  }
  func.func @transform_1(%arg0: i32) -> (i32, i32) {
    %c0_i32 = arith.constant 0 : i32
    %c0_i32_0 = arith.constant 0 : i32
    %c0_i32_1 = arith.constant 0 : i32
    return %c0_i32, %c0_i32_0 : i32, i32
  }
  func.func @transform_2(%arg0: i32) -> (i32, i32) {
    %c0_i32 = arith.constant 0 : i32
    %c0_i32_0 = arith.constant 0 : i32
    %c0_i32_1 = arith.constant 0 : i32
    return %c0_i32, %c0_i32_0 : i32, i32
  }
  func.func @transform_3(%arg0: i32) -> (i32, i32) {
    %c0_i32 = arith.constant 0 : i32
    %c0_i32_0 = arith.constant 0 : i32
    %c0_i32_1 = arith.constant 0 : i32
    return %c0_i32, %c0_i32_0 : i32, i32
  }
  func.func @transform_4(%arg0: i32) -> (i32, i32, i32) {
    %c0_i32 = arith.constant 0 : i32
    %c0_i32_0 = arith.constant 0 : i32
    %c0_i32_1 = arith.constant 0 : i32
    return %arg0, %c0_i32, %c0_i32_0 : i32, i32, i32
  }
  func.func @transform_5(%arg0: i32) -> (i32, i32, i32) {
    %c0_i32 = arith.constant 0 : i32
    %c0_i32_0 = arith.constant 0 : i32
    %c0_i32_1 = arith.constant 0 : i32
    return %arg0, %c0_i32, %c0_i32_0 : i32, i32, i32
  }
  func.func @transform_6(%arg0: i32) -> (i32, i32, i32) {
    %c0_i32 = arith.constant 0 : i32
    %c0_i32_0 = arith.constant 0 : i32
    %c0_i32_1 = arith.constant 0 : i32
    return %arg0, %c0_i32, %c0_i32_0 : i32, i32, i32
  }
  func.func @transform_7(%arg0: i32) -> (i32, i32, i32) {
    %c0_i32 = arith.constant 0 : i32
    %c0_i32_0 = arith.constant 0 : i32
    %c0_i32_1 = arith.constant 0 : i32
    %c0_i32_2 = arith.constant 0 : i32
    return %c0_i32, %c0_i32_0, %c0_i32_1 : i32, i32, i32
  }
  func.func @transform_8(%arg0: i32) -> (i32, i32, i32) {
    %c0_i32 = arith.constant 0 : i32
    %c0_i32_0 = arith.constant 0 : i32
    %c0_i32_1 = arith.constant 0 : i32
    %c0_i32_2 = arith.constant 0 : i32
    return %c0_i32, %c0_i32_0, %c0_i32_1 : i32, i32, i32
  }
  func.func @transform_9(%arg0: i32) -> (i32, i32, i32) {
    %c0_i32 = arith.constant 0 : i32
    %c0_i32_0 = arith.constant 0 : i32
    %c0_i32_1 = arith.constant 0 : i32
    %c0_i32_2 = arith.constant 0 : i32
    return %c0_i32, %c0_i32_0, %c0_i32_1 : i32, i32, i32
  }
  func.func @transform_10(%arg0: i32) -> (i32, i32, i32) {
    %c0_i32 = arith.constant 0 : i32
    %c0_i32_0 = arith.constant 0 : i32
    %c0_i32_1 = arith.constant 0 : i32
    %c0_i32_2 = arith.constant 0 : i32
    return %c0_i32, %c0_i32_0, %c0_i32_1 : i32, i32, i32
  }
  func.func @transform_11(%arg0: i32) -> (i32, i32, i32) {
    %c0_i32 = arith.constant 0 : i32
    %c0_i32_0 = arith.constant 0 : i32
    %c0_i32_1 = arith.constant 0 : i32
    %c0_i32_2 = arith.constant 0 : i32
    return %c0_i32, %c0_i32_0, %c0_i32_1 : i32, i32, i32
  }
  func.func @transform_12(%arg0: i32) -> (i32, i32, i32) {
    %c0_i32 = arith.constant 0 : i32
    %c0_i32_0 = arith.constant 0 : i32
    %c0_i32_1 = arith.constant 0 : i32
    %c0_i32_2 = arith.constant 0 : i32
    return %c0_i32, %c0_i32_0, %c0_i32_1 : i32, i32, i32
  }
  func.func @transform_13(%arg0: i32) -> (i32, i32, i32) {
    %c0_i32 = arith.constant 0 : i32
    %c0_i32_0 = arith.constant 0 : i32
    %c0_i32_1 = arith.constant 0 : i32
    %c0_i32_2 = arith.constant 0 : i32
    return %c0_i32, %c0_i32_0, %c0_i32_1 : i32, i32, i32
  }
  func.func @transform_14(%arg0: i32) -> (i32, i32, i32) {
    %c0_i32 = arith.constant 0 : i32
    %c0_i32_0 = arith.constant 0 : i32
    %c0_i32_1 = arith.constant 0 : i32
    %c0_i32_2 = arith.constant 0 : i32
    return %c0_i32, %c0_i32_0, %c0_i32_1 : i32, i32, i32
  }
  func.func @transform_15(%arg0: i32) -> (i32, i32, i32) {
    %c0_i32 = arith.constant 0 : i32
    %c0_i32_0 = arith.constant 0 : i32
    %c0_i32_1 = arith.constant 0 : i32
    %c0_i32_2 = arith.constant 0 : i32
    return %c0_i32, %c0_i32_0, %c0_i32_1 : i32, i32, i32
  }
  func.func @transform_16(%arg0: i32) -> (i32, i32, i32) {
    %c0_i32 = arith.constant 0 : i32
    %c0_i32_0 = arith.constant 0 : i32
    %c0_i32_1 = arith.constant 0 : i32
    %c0_i32_2 = arith.constant 0 : i32
    return %c0_i32, %c0_i32_0, %c0_i32_1 : i32, i32, i32
  }
  func.func @transform_17(%arg0: i32) -> (i32, i32, i32) {
    %c0_i32 = arith.constant 0 : i32
    %c0_i32_0 = arith.constant 0 : i32
    %c0_i32_1 = arith.constant 0 : i32
    %c0_i32_2 = arith.constant 0 : i32
    return %c0_i32, %c0_i32_0, %c0_i32_1 : i32, i32, i32
  }
  func.func @transform_18(%arg0: i32) -> (i32, i32, i32) {
    %c0_i32 = arith.constant 0 : i32
    %c0_i32_0 = arith.constant 0 : i32
    %c0_i32_1 = arith.constant 0 : i32
    %c0_i32_2 = arith.constant 0 : i32
    return %c0_i32, %c0_i32_0, %c0_i32_1 : i32, i32, i32
  }
  func.func @transform_19(%arg0: i32) -> (i32, i32, i32) {
    %c0_i32 = arith.constant 0 : i32
    %c0_i32_0 = arith.constant 0 : i32
    %c0_i32_1 = arith.constant 0 : i32
    %c0_i32_2 = arith.constant 0 : i32
    return %c0_i32, %c0_i32_0, %c0_i32_1 : i32, i32, i32
  }
  func.func @transform_20(%arg0: i32) -> (i32, i32, i32) {
    %c0_i32 = arith.constant 0 : i32
    %c0_i32_0 = arith.constant 0 : i32
    %c0_i32_1 = arith.constant 0 : i32
    %c0_i32_2 = arith.constant 0 : i32
    return %c0_i32, %c0_i32_0, %c0_i32_1 : i32, i32, i32
  }
  func.func @transform_21(%arg0: i32) -> (i32, i32, i32) {
    %c0_i32 = arith.constant 0 : i32
    %c0_i32_0 = arith.constant 0 : i32
    %c0_i32_1 = arith.constant 0 : i32
    %c0_i32_2 = arith.constant 0 : i32
    return %c0_i32, %c0_i32_0, %c0_i32_1 : i32, i32, i32
  }
  func.func @transform_22(%arg0: i32) -> (i32, i32, i32) {
    %c0_i32 = arith.constant 0 : i32
    %c0_i32_0 = arith.constant 0 : i32
    %c0_i32_1 = arith.constant 0 : i32
    %c0_i32_2 = arith.constant 0 : i32
    return %c0_i32, %c0_i32_0, %c0_i32_1 : i32, i32, i32
  }
  func.func @transform_23(%arg0: i32) -> (i32, i32, i32) {
    %c0_i32 = arith.constant 0 : i32
    %c0_i32_0 = arith.constant 0 : i32
    %c0_i32_1 = arith.constant 0 : i32
    %c0_i32_2 = arith.constant 0 : i32
    return %c0_i32, %c0_i32_0, %c0_i32_1 : i32, i32, i32
  }
  func.func @transform_24(%arg0: i32) -> (i32, i32, i32) {
    %c0_i32 = arith.constant 0 : i32
    %c0_i32_0 = arith.constant 0 : i32
    %c0_i32_1 = arith.constant 0 : i32
    %c0_i32_2 = arith.constant 0 : i32
    return %c0_i32, %c0_i32_0, %c0_i32_1 : i32, i32, i32
  }
  func.func @transform_25(%arg0: i32) -> (i32, i32, i32) {
    %c0_i32 = arith.constant 0 : i32
    %c0_i32_0 = arith.constant 0 : i32
    %c0_i32_1 = arith.constant 0 : i32
    %c0_i32_2 = arith.constant 0 : i32
    return %c0_i32, %c0_i32_0, %c0_i32_1 : i32, i32, i32
  }
  func.func @transform_26(%arg0: i32) -> (i32, i32, i32) {
    %c0_i32 = arith.constant 0 : i32
    %c0_i32_0 = arith.constant 0 : i32
    %c0_i32_1 = arith.constant 0 : i32
    %c0_i32_2 = arith.constant 0 : i32
    return %c0_i32, %c0_i32_0, %c0_i32_1 : i32, i32, i32
  }
  func.func @transform_27(%arg0: i32) -> (i32, i32) {
    %c0_i32 = arith.constant 0 : i32
    %c0_i32_0 = arith.constant 0 : i32
    %c0_i32_1 = arith.constant 0 : i32
    return %c0_i32, %c0_i32_0 : i32, i32
  }
  func.func @transform_28(%arg0: i32) -> (i32, i32) {
    %c0_i32 = arith.constant 0 : i32
    %c0_i32_0 = arith.constant 0 : i32
    %c0_i32_1 = arith.constant 0 : i32
    return %c0_i32, %c0_i32_0 : i32, i32
  }
  func.func @transform_29(%arg0: i32) -> (i32, i32, i32) {
    %c0_i32 = arith.constant 0 : i32
    %c0_i32_0 = arith.constant 0 : i32
    %c0_i32_1 = arith.constant 0 : i32
    return %arg0, %c0_i32, %c0_i32_0 : i32, i32, i32
  }
}

</mosaic_0001>

<bundles_post_ra>
// kernel: bart_forward.2
= control target key start
LH: loop header
LB: loop body
LE: loop exit
PB: predicated region body
PF: predicated region fallthrough
CT: control target
= control target key end

     0   :  { %s2096_s24 = smov 0   ;;  %s2455_s0 = inlined_call_operand.vmem [shape: f32[2,8,32], index: 0, kind: input, shape index: {}]   ;;  %s2456_s1 = inlined_call_operand.vmem [shape: f32[8,32], index: 1, kind: input, shape index: {}]   ;;  %s2457_s2 = inlined_call_operand.vmem [shape: f32[1,32], index: 2, kind: input, shape index: {}]   ;;  %s2458_s3 = inlined_call_operand.vmem [shape: f32[1,32], index: 3, kind: input, shape index: {}]   ;;  %s2459_s4 = inlined_call_operand.vmem [shape: f32[2,1,8], index: 4, kind: input, shape index: {}]   ;;  %s2460_s5 = inlined_call_operand.vmem [shape: f32[2,32,96], index: 5, kind: input, shape index: {}]   ;;  %s2461_s6 = inlined_call_operand.vmem [shape: f32[2,1,96], index: 6, kind: input, shape index: {}]   ;;  %s2462_s7 = inlined_call_operand.vmem [shape: f32[2,32,32], index: 7, kind: input, shape index: {}]   ;;  %s2463_s8 = inlined_call_operand.vmem [shape: f32[2,1,32], index: 8, kind: input, shape index: {}]   ;;  %s2464_s9 = inlined_call_operand.vmem [shape: f32[2,1,32], index: 9, kind: input, shape index: {}]   ;;  %s2465_s10 = inlined_call_operand.vmem [shape: f32[2,1,32], index: 10, kind: input, shape index: {}]   ;;  %s2466_s11 = inlined_call_operand.vmem [shape: f32[2,32,64], index: 11, kind: input, shape index: {}]   ;;  %s2467_s12 = inlined_call_operand.vmem [shape: f32[2,1,64], index: 12, kind: input, shape index: {}]   ;;  %s2468_s13 = inlined_call_operand.vmem [shape: f32[2,64,32], index: 13, kind: input, shape index: {}]   ;;  %s2469_s14 = inlined_call_operand.vmem [shape: f32[2,1,32], index: 14, kind: input, shape index: {}]   ;;  %s2470_s15 = inlined_call_operand.vmem [shape: f32[2,1,32], index: 15, kind: input, shape index: {}]   ;;  %s2471_s16 = inlined_call_operand.vmem [shape: f32[2,1,32], index: 16, kind: input, shape index: {}]   ;;  %s2472_s17 = inlined_call_operand.vmem [shape: f32[2,8,32], index: 17, kind: output, shape index: {}]  }
   0x1   :  { %2480 = sst [smem:[#allocation2_spill]] %s2455_s0 }
   0x2   :  { %2481 = sst [smem:[#allocation3_spill]] %s2456_s1 }
   0x3 LB: > { %s1818_s25 = sadd.s32 4294967295, %s1991_s24   ;;  %p1822_p0 = scmp.ge.s32.totalorder %s1991_s24, 1  ;;  %s1991_s24 = sphi %s2096_s24, %s27_s24  }
   0x4   : > { %p494_p1 = scmp.lt.s32.totalorder %s1991_s24, 3 }
   0x6   : > { %p495_p2 = pnand %p1822_p0, %p494_p1 }
   0x7   : > { %p547_p3 = scmp.lt.s32.totalorder (!%p495_p2), %s1818_s25, 1  ;;  %s2482_s18 = sld [smem:[#allocation3_spill]] (!%p495_p2) }
   0x8   : > { %498 = sbr.rel (%p495_p2) target bundleno = 5264 (0x1490), region = 88  ;;  %s2483_s20 = sld [smem:[#allocation2_spill]] (!%p495_p2) }
   0x9   : > { %s1994_s28 = smov (!%p495_p2), 88   ;;  %s2478_s0 = smov (!%p495_p2), 64  }
   0xa   : > { %s1996_s30 = smov (!%p495_p2), 96   ;;  %s1997_s1 = smov (!%p495_p2), 56  }
   0xb   : > { %s2000_s23 = smov (!%p495_p2), 120   ;;  %s2477_s27 = smov (!%p495_p2), 112  }
   0xc   : > { %s2476_s19 = smov (!%p495_p2), 40  }
   0xd   : > { %s2492_s25 = smov (!%p547_p3, %s1818_s25), 1  ;;  %v559_v0 = vld [vmem:[%s2482_s18] sm:$0xff]  ;;  %vm563_vm0 = vcmask 261120   ;;  %v1993_v4 = vmov 32.0   ;;  %v605_v16 = vld [vmem:[%s2460_s5 + $0x18] sm:$0xff]  ;;  %v604_v17 = vld [vmem:[%s2460_s5 + $0x10] sm:$0xff] }
   0xe   : > { %s2473_s26 = sshll.u32 %s2492_s25, 3  ;;  %s553_s29 = scalar_lea.vmem %s2459_s4, %s2492_s25  ;;  %1933 = vrcp.f32 %v1993_v4  ;;  %625 = vmatpush.msra.mxu0 %v605_v16  ;;  %v603_v18 = vld [vmem:[%s2460_s5 + $0x8] sm:$0xff]  ;;  %v602_v19 = vld [vmem:[%s2460_s5] sm:$0xff]  ;;  %vm645_vm5 = vcmask 64512   ;;  %vm1118_vm14 = vcmask 523264  }
   0xf   : > { %s550_s21 = scalar_lea.vmem %s2483_s20, %s2473_s26  ;;  %v1915_v29 = vld [vmem:[%s2457_s2] ss:$0 sm:$0xff]  ;;  %s1998_s20 = smov 80   ;;  %v634_v4 = vld [vmem:[%s2462_s7 + $0x8] sm:$0xff] }
  0x10   : > { %v558_v1 = vld [vmem:[%s550_s21] sm:$0xff]  ;;  %626 = vmatpush.msra.mxu0 %v604_v17  ;;  %s2479_s21 = smov 104   ;;  %s2475_s18 = smov 72   ;;  %818 = vmatpush.msra.mxu1 %v634_v4 }
  0x11   : > { %v560_v2 = vadd.f32 %v559_v0, %v558_v1  ;;  %v1916_v32 = vld [vmem:[%s2458_s3] ss:$0 sm:$0xff]  ;;  %s2487_s26 = smov 72  }
  0x12   : > { %627 = vmatpush.msra.mxu0 %v603_v18  ;;  %v1917_v35 = vld [vmem:[%s2461_s6] ss:$0 sm:$0xff] }
  0x13   : > { %v564_v3 = vsel %vm563_vm0, %v560_v2, 0.0  ;;  %v2167_v42 = vld [vmem:[%s553_s29] ss:$0 sm:$0xff]  ;;  %s2474_s29 = smov 48  }
  0x14   : > { %565 = vadd.xlane.f32.xlu0 %v564_v3  ;;  %v1934_v5 = vpop.eup %1933  ;;  %628 = vmatpush.msra.mxu0 %v602_v19  ;;  %v633_v46 = vld [vmem:[%s2462_s7] sm:$0xff] }
  0x15   : > { %v568_v6 = vmul.f32 32.0, %v1934_v5  ;;  %vm572_vm1 = vweird.f32 %v1934_v5  ;;  %726 = vmatpush.msra.mxu3 %v633_v46 }
  0x17   : > { %v569_v7 = vsub.f32 1.0, %v568_v6 }
  0x19   : > { %v570_v8 = vmul.f32 %v1934_v5, %v569_v7 }
  0x1b   : > { %v571_v9 = vadd.f32 %v1934_v5, %v570_v8 }
  0x1d   : > { %v2120_v10 = vsel %vm572_vm1, %v1934_v5, %v571_v9 }
  0x87   : > { %v566_v11 = vpop.xlane.xlu0 %565 }
  0x88   : > { %v574_v12 = vmul.f32 %v2120_v10, %v566_v11 }
  0x8a   : > { %v575_v13 = vsub.f32 %v560_v2, %v574_v12 }
  0x8c   : > { %v576_v14 = vmul.f32 %v575_v13, %v575_v13 }
  0x8e   : > { %v577_v15 = vsel %vm563_vm0, %v576_v14, 0.0 }
  0x8f   : > { %578 = vadd.xlane.f32.xlu0 %v577_v15 }
 0x102   : > { %v579_v20 = vpop.xlane.xlu0 %578 }
 0x103   : > { %v580_v21 = vmul.f32 %v579_v20, %v2120_v10 }
 0x105   : > { %v581_v22 = vadd.f32 1e-05, %v580_v21 }
 0x107   : > { %1935 = vrsqrt.f32 %v581_v22  ;;  %vm588_vm3 = vweird.f32 %v581_v22 }
 0x10d   : > { %v1936_v23 = vpop.eup %1935 }
 0x10e   : > { %v583_v24 = vmul.f32 %v1936_v23, %v581_v22  ;;  %vm589_vm2 = vweird.f32 %v1936_v23 }
 0x10f   : > { %vm590_vm4 = vmor %vm588_vm3, %vm589_vm2 }
 0x110   : > { %v584_v25 = vmul.f32 %v1936_v23, %v583_v24 }
 0x112   : > { %v585_v26 = vmul.f32 0.5, %v584_v25 }
 0x114   : > { %v586_v27 = vsub.f32 1.5, %v585_v26 }
 0x116   : > { %v587_v28 = vmul.f32 %v1936_v23, %v586_v27 }
 0x118   : > { %v591_v30 = vsel %vm590_vm4, %v1936_v23, %v587_v28 }
 0x119   : > { %v592_v31 = vmul.f32 %v591_v30, %v575_v13 }
 0x11b   : > { %v596_v33 = vmul.f32 %v1915_v29, %v592_v31 }
 0x11d   : > { %v2143_v34 = vadd.f32 %v1916_v32, %v596_v33 }
 0x11f   : > { %1825 = vmatmul.msk.f32.vlgmr.msra.gmra.mxu0 %vm563_vm0, %v2143_v34 }
 0x19c   : > { %v630_v36 = vpop.f32.mrf.mxu0 }
 0x19d   : > { %v2150_v37 = vadd.f32 %v1917_v35, %v630_v36  ;;  %v635_v35 = vld [vmem:[%s2462_s7 + $0x10] sm:$0xff] }
 0x19f   : > { %737 = vrot.lane.b32.xlu0 %v2150_v37, %s1994_s28  ;;  %682 = vrot.lane.b32.xlu2 %v2150_v37, %s2478_s0  ;;  %v638_v41 = vmul.f32 0.35355338, %v2150_v37 }
 0x1a0   : > { %643 = vrot.lane.b32.xlu1 %v2150_v37, %s1996_s30 }
 0x1f9   : > { %v683_v38 = vpop.permute.xlu2 %682 }
 0x1fa   : > { %703 = vmatpush.msra.mxu2 %v683_v38 }
 0x211   : > { %v738_v39 = vpop.permute.xlu0 %737 }
 0x212   : > { %v644_v40 = vpop.permute.xlu1 %643  ;;  %1830 = vmatpush.xpose.msk.msrb.mxu2 %vm645_vm5, %v738_v39 }
 0x213   : > { %1826 = vmatpush.xpose.msk.msrb.mxu0 %vm645_vm5, %v644_v40 }
 0x216   : > { %1827 = vmatmul.msk.f32.vlgmr.msrb.gmra.mxu0 %vm645_vm5, %v638_v41 }
 0x293   : > { %v668_v43 = vpop.f32.mrf.mxu0 }
 0x294   : > { %v669_v44 = vadd.f32 %v2167_v42, %v668_v43 }
 0x296   : > { %v671_v45 = vsel %vm645_vm5, %v669_v44, -inf }
 0x297   : > { %672 = vmax.xlane.f32.xlu1 %v671_v45 }
 0x2b0   : > { %774 = vrot.lane.b32.xlu1 %v2150_v37, %s1997_s1 }
 0x2b8   : > { %826 = vrot.lane.b32.xlu1 %v2150_v37, %s1998_s20 }
 0x2c0   : > { %913 = vrot.lane.b32.xlu1 %v638_v41, %s2479_s21  ;;  %s2488_s21 = smov 48  }
 0x30a   : > { %v673_v47 = vpop.xlane.xlu1 %672 }
 0x30b   : > { %v674_v48 = vsub.f32 %v669_v44, %v673_v47  ;;  %v1918_v44 = vld [vmem:[%s2463_s8] ss:$0 sm:$0xff] }
 0x30d   : > { %v675_v49 = vmul.f32 1.442695, %v674_v48 }
 0x30f   : > { %1937 = vpow2.f32 %v675_v49 }
 0x315   : > { %v1938_v50 = vpop.eup %1937 }
 0x316   : > { %v677_v51 = vsel %vm645_vm5, %v1938_v50, 0.0 }
 0x317   : > { %678 = vadd.xlane.f32.xlu2 %v677_v51 }
 0x322   : > { %v775_v52 = vpop.permute.xlu1 %774 }
 0x323   : > { %795 = vmatpush.msrb.mxu3 %v775_v52 }
 0x32a   : > { %v827_v53 = vpop.permute.xlu1 %826 }
 0x32b   : > { %1834 = vmatpush.xpose.msk.msra.mxu0 %vm645_vm5, %v827_v53 }
 0x32f   : > { %735 = vrot.lane.b32.xlu2 %v638_v41, %s2000_s23 }
 0x332   : > { %v914_v13 = vpop.permute.xlu1 %913 }
 0x38a   : > { %v679_v54 = vpop.xlane.xlu2 %678 }
 0x38b   : > { %1939 = vrcp.f32 %v679_v54 }
 0x391   : > { %v1940_v55 = vpop.eup %1939 }
 0x392   : > { %v681_v56 = vmul.f32 %v1940_v55, %v1938_v50  ;;  %v736_v57 = vpop.permute.xlu2 %735 }
 0x394   : > { %1828 = vmatmul.msk.f32.vlgmr.msra.gmra.mxu2 %vm645_vm5, %v681_v56 }
 0x39c   : > { %1831 = vmatmul.msk.f32.vlgmr.msrb.gmra.mxu2 %vm645_vm5, %v736_v57 }
 0x417   : > { %v705_v58 = vpop.f32.mrf.mxu2 }
 0x418   : > { %1829 = vmatmul.msk.f32.vlgmr.msra.gmra.mxu3 %vm645_vm5, %v705_v58  ;;  %v1038_v58 = vld [vmem:[%s2466_s11 + $0x18] sm:$0xff] }
 0x419   : > { %907 = vmatpush.msra.mxu3 %v635_v35 }
 0x41f   : > { %v760_v59 = vpop.f32.mrf.mxu2 }
 0x420   : > { %v761_v60 = vadd.f32 %v2167_v42, %v760_v59  ;;  %v1036_v59 = vld [vmem:[%s2466_s11 + $0x8] sm:$0xff] }
 0x422   : > { %v763_v61 = vsel %vm645_vm5, %v761_v60, -inf }
 0x423   : > { %764 = vmax.xlane.f32.xlu0 %v763_v61 }
 0x437   : > { %824 = vrot.lane.b32.xlu0 %v638_v41, %s2477_s27 }
 0x496   : > { %v765_v62 = vpop.xlane.xlu0 %764 }
 0x497   : > { %v766_v63 = vsub.f32 %v761_v60, %v765_v62  ;;  %v1035_v60 = vld [vmem:[%s2466_s11] sm:$0xff] }
 0x499   : > { %v767_v0 = vmul.f32 1.442695, %v766_v63 }
 0x49b   : > { %1941 = vpow2.f32 %v767_v0  ;;  %v728_v14 = vpop.f32.mrf.mxu3 }
 0x49c   : > { %v734_v45 = vadd.f32 %v1918_v44, %v728_v14 }
 0x4a1   : > { %v1942_v1 = vpop.eup %1941 }
 0x4a2   : > { %v769_v2 = vsel %vm645_vm5, %v1942_v1, 0.0 }
 0x4a3   : > { %770 = vadd.xlane.f32.xlu2 %v769_v2 }
 0x4a9   : > { %v825_v3 = vpop.permute.xlu0 %824 }
 0x4aa   : > { %1835 = vmatmul.msk.f32.vlgmr.msra.gmra.mxu0 %vm645_vm5, %v825_v3 }
 0x4bb   : > { %915 = vrot.lane.b32.xlu2 %v2150_v37, %s2475_s18  ;;  %s2489_s18 = smov 40  }
 0x516   : > { %v771_v5 = vpop.xlane.xlu2 %770 }
 0x517   : > { %1943 = vrcp.f32 %v771_v5 }
 0x51d   : > { %v1944_v6 = vpop.eup %1943 }
 0x51e   : > { %v916_v7 = vpop.permute.xlu2 %915  ;;  %v773_v8 = vmul.f32 %v1944_v6, %v1942_v1  ;;  %v1919_v6 = vld [vmem:[%s2464_s9] ss:$0 sm:$0xff] }
 0x51f   : > { %1838 = vmatpush.xpose.msk.msrb.mxu1 %vm645_vm5, %v916_v7 }
 0x520   : > { %1832 = vmatmul.msk.f32.vlgmr.msrb.gmra.mxu3 %vm645_vm5, %v773_v8 }
 0x521   : > { %1058 = vmatpush.msrb.mxu3 %v1038_v58 }
 0x527   : > { %v849_v9 = vpop.f32.mrf.mxu0 }
 0x528   : > { %v850_v11 = vadd.f32 %v2167_v42, %v849_v9  ;;  %v1920_v9 = vld [vmem:[%s2465_s10] ss:$0 sm:$0xff] }
 0x52a   : > { %v852_v12 = vsel %vm645_vm5, %v850_v11, -inf }
 0x52b   : > { %853 = vmax.xlane.f32.xlu1 %v852_v12 }
 0x59e   : > { %v854_v15 = vpop.xlane.xlu1 %853 }
 0x59f   : > { %v855_v16 = vsub.f32 %v850_v11, %v854_v15 }
 0x5a1   : > { %v856_v17 = vmul.f32 1.442695, %v855_v16 }
 0x5a3   : > { %1945 = vpow2.f32 %v856_v17  ;;  %v797_v18 = vpop.f32.mrf.mxu3 }
 0x5a4   : > { %1833 = vmatmul.msk.f32.vlgmr.msra.gmra.mxu1 %vm645_vm5, %v797_v18 }
 0x5a9   : > { %v1946_v19 = vpop.eup %1945 }
 0x5aa   : > { %v858_v20 = vsel %vm645_vm5, %v1946_v19, 0.0 }
 0x5ab   : > { %859 = vadd.xlane.f32.xlu2 %v858_v20  ;;  %v1113_v20 = vld [vmem:[%s2468_s13 + $0x38] sm:$0xff] }
 0x5ac   : > { %1839 = vmatmul.msk.f32.vlgmr.msrb.gmra.mxu1 %vm645_vm5, %v914_v13  ;;  %v1921_v13 = vld [vmem:[%s2467_s12] ss:$0 sm:$0xff] }
 0x5ad   : > { %1130 = vmatpush.msra.mxu1 %v1113_v20  ;;  %v1923_v20 = vld [vmem:[%s2470_s15] ss:$0 sm:$0xff] }
 0x61e   : > { %v860_v28 = vpop.xlane.xlu2 %859 }
 0x621   : > { %v820_v21 = vpop.f32.mrf.mxu1 }
 0x622   : > { %v823_v47 = vadd.f32 %v820_v21, %v734_v45  ;;  %v1112_v21 = vld [vmem:[%s2468_s13 + $0x30] sm:$0xff] }
 0x623   : > { %1131 = vmatpush.msra.mxu1 %v1112_v21 }
 0x629   : > { %v938_v22 = vpop.f32.mrf.mxu1 }
 0x62a   : > { %v939_v23 = vadd.f32 %v2167_v42, %v938_v22  ;;  %v1111_v22 = vld [vmem:[%s2468_s13 + $0x28] sm:$0xff] }
 0x62b   : > { %1132 = vmatpush.msra.mxu1 %v1111_v22 }
 0x62c   : > { %v941_v24 = vsel %vm645_vm5, %v939_v23, -inf }
 0x62d   : > { %942 = vmax.xlane.f32.xlu0 %v941_v24 }
 0x641   : > { %863 = vrot.lane.b32.xlu0 %v2150_v37, %s2474_s29 }
 0x6a0   : > { %v943_v25 = vpop.xlane.xlu0 %942 }
 0x6a1   : > { %v944_v26 = vsub.f32 %v939_v23, %v943_v25  ;;  %v1110_v23 = vld [vmem:[%s2468_s13 + $0x20] sm:$0xff]  ;;  %v1109_v25 = vld [vmem:[%s2468_s13 + $0x18] sm:$0xff] }
 0x6a2   : > { %1133 = vmatpush.msra.mxu1 %v1110_v23  ;;  %v1924_v23 = vld [vmem:[%s2471_s16] ss:$0 sm:$0xff] }
 0x6a3   : > { %v945_v27 = vmul.f32 1.442695, %v944_v26 }
 0x6a4   : > { %1134 = vmatpush.msra.mxu1 %v1109_v25 }
 0x6a5   : > { %1947 = vpow2.f32 %v945_v27  ;;  %v1108_v27 = vld [vmem:[%s2468_s13 + $0x10] sm:$0xff] }
 0x6a6   : > { %1949 = vrcp.f32 %v860_v28  ;;  %1135 = vmatpush.msra.mxu1 %v1108_v27 }
 0x6ab   : > { %v1948_v29 = vpop.eup %1947 }
 0x6ac   : > { %v947_v30 = vsel %vm645_vm5, %v1948_v29, 0.0  ;;  %v1950_v31 = vpop.eup %1949 }
 0x6ad   : > { %948 = vadd.xlane.f32.xlu1 %v947_v30  ;;  %v862_v32 = vmul.f32 %v1950_v31, %v1946_v19  ;;  %v1107_v30 = vld [vmem:[%s2468_s13 + $0x8] sm:$0xff] }
 0x6ae   : > { %1136 = vmatpush.msra.mxu1 %v1107_v30 }
 0x6b3   : > { %v864_v33 = vpop.permute.xlu0 %863 }
 0x6b4   : > { %884 = vmatpush.msra.mxu2 %v864_v33  ;;  %v1106_v33 = vld [vmem:[%s2468_s13] sm:$0xff] }
 0x6b5   : > { %1836 = vmatmul.msk.f32.vlgmr.msra.gmra.mxu2 %vm645_vm5, %v862_v32  ;;  %1137 = vmatpush.msra.mxu1 %v1106_v33 }
 0x6c6   : > { %952 = vrot.lane.b32.xlu1 %v2150_v37, %s2476_s19  ;;  %v636_v37 = vld [vmem:[%s2462_s7 + $0x18] sm:$0xff] }
 0x6c7   : > { %996 = vmatpush.msrb.mxu2 %v636_v37 }
 0x720   : > { %v949_v36 = vpop.xlane.xlu1 %948 }
 0x721   : > { %1951 = vrcp.f32 %v949_v36 }
 0x727   : > { %v1952_v38 = vpop.eup %1951 }
 0x728   : > { %v951_v39 = vmul.f32 %v1952_v38, %v1948_v29 }
 0x738   : > { %v886_v40 = vpop.f32.mrf.mxu2  ;;  %v953_v41 = vpop.permute.xlu1 %952 }
 0x739   : > { %1837 = vmatmul.msk.f32.vlgmr.msra.gmra.mxu3 %vm645_vm5, %v886_v40  ;;  %973 = vmatpush.msrb.mxu0 %v953_v41 }
 0x73a   : > { %1840 = vmatmul.msk.f32.vlgmr.msrb.gmra.mxu0 %vm645_vm5, %v951_v39 }
 0x7b7   : > { %v975_v43 = vpop.f32.mrf.mxu0 }
 0x7b8   : > { %1841 = vmatmul.msk.f32.vlgmr.msrb.gmra.mxu2 %vm645_vm5, %v975_v43 }
 0x7bc   : > { %v909_v46 = vpop.f32.mrf.mxu3 }
 0x7bd   : > { %v912_v48 = vadd.f32 %v909_v46, %v823_v47 }
 0x83b   : > { %v998_v49 = vpop.f32.mrf.mxu2 }
 0x83c   : > { %v1001_v50 = vadd.f32 %v998_v49, %v912_v48 }
 0x83e   : > { %v1002_v51 = vadd.f32 %v1001_v50, %v2143_v34  ;;  %v1037_v34 = vld [vmem:[%s2466_s11 + $0x10] sm:$0xff] }
 0x83f   : > { %1059 = vmatpush.msrb.mxu3 %v1037_v34 }
 0x840   : > { %v1005_v52 = vsel %vm563_vm0, %v1002_v51, 0.0 }
 0x841   : > { %1006 = vadd.xlane.f32.xlu2 %v1005_v52  ;;  %1060 = vmatpush.msrb.mxu3 %v1036_v59 }
 0x843   : > { %1061 = vmatpush.msrb.mxu3 %v1035_v60  ;;  %v1922_v60 = vld [vmem:[%s2469_s14] ss:$0 sm:$0xff] }
 0x8b4   : > { %v1007_v53 = vpop.xlane.xlu2 %1006 }
 0x8b5   : > { %v1008_v54 = vmul.f32 %v1007_v53, %v2120_v10 }
 0x8b7   : > { %v1009_v55 = vsub.f32 %v1002_v51, %v1008_v54 }
 0x8b9   : > { %v1010_v56 = vmul.f32 %v1009_v55, %v1009_v55 }
 0x8bb   : > { %v1011_v57 = vsel %vm563_vm0, %v1010_v56, 0.0 }
 0x8bc   : > { %1012 = vadd.xlane.f32.xlu2 %v1011_v57 }
 0x92f   : > { %v1013_v61 = vpop.xlane.xlu2 %1012 }
 0x930   : > { %v1014_v62 = vmul.f32 %v1013_v61, %v2120_v10 }
 0x932   : > { %v1015_v63 = vadd.f32 1e-05, %v1014_v62 }
 0x934   : > { %1953 = vrsqrt.f32 %v1015_v63  ;;  %vm1022_vm7 = vweird.f32 %v1015_v63 }
 0x93a   : > { %v1954_v0 = vpop.eup %1953 }
 0x93b   : > { %v1017_v1 = vmul.f32 %v1954_v0, %v1015_v63  ;;  %vm1023_vm6 = vweird.f32 %v1954_v0 }
 0x93c   : > { %vm1024_vm8 = vmor %vm1022_vm7, %vm1023_vm6 }
 0x93d   : > { %v1018_v2 = vmul.f32 %v1954_v0, %v1017_v1 }
 0x93f   : > { %v1019_v3 = vmul.f32 0.5, %v1018_v2 }
 0x941   : > { %v1020_v4 = vsub.f32 1.5, %v1019_v3 }
 0x943   : > { %v1021_v5 = vmul.f32 %v1954_v0, %v1020_v4 }
 0x945   : > { %v1025_v7 = vsel %vm1024_vm8, %v1954_v0, %v1021_v5 }
 0x946   : > { %v1026_v8 = vmul.f32 %v1025_v7, %v1009_v55  ;;  %v2005_v55 = vmov -1.0   ;;  %v1846_v7 = vld [vmem:[%s2460_s5 + $0x30] sm:$0xff] }
 0x948   : > { %v1030_v11 = vmul.f32 %v1919_v6, %v1026_v8  ;;  %v1847_v6 = vld [vmem:[%s2460_s5 + $0x38] sm:$0xff]  ;;  %v1845_v8 = vld [vmem:[%s2460_s5 + $0x28] sm:$0xff] }
 0x949   : > { %1200 = vmatpush.msra.mxu0 %v1847_v6 }
 0x94a   : > { %v2245_v12 = vadd.f32 %v1920_v9, %v1030_v11  ;;  %v1844_v9 = vld [vmem:[%s2460_s5 + $0x20] sm:$0xff] }
 0x94b   : > { %1201 = vmatpush.msra.mxu0 %v1846_v7 }
 0x94c   : > { %1842 = vmatmul.msk.f32.vlgmr.msrb.gmra.mxu3 %vm563_vm0, %v2245_v12 }
 0x94d   : > { %1202 = vmatpush.msra.mxu0 %v1845_v8 }
 0x94f   : > { %1203 = vmatpush.msra.mxu0 %v1844_v9 }
 0x9cf   : > { %v1063_v14 = vpop.f32.mrf.mxu3 }
 0x9d0   : > { %v1064_v15 = vadd.f32 %v1921_v13, %v1063_v14 }
 0x9d2   : > { %v1067_v16 = vmul.f32 0.70710677, %v1064_v15  ;;  %v1066_v58 = vmul.f32 0.5, %v1064_v15 }
 0x9d4   : > { %v1070_v17 = vand.u32 2147483647, %v1067_v16  ;;  %vm1068_vm13 = vcmp.ge.f32.partialorder %v1067_v16, 0.0 }
 0x9d5   : > { %v1069_v56 = vsel %vm1068_vm13, 1.0, %v2005_v55 }
 0x9d6   : > { %v1071_v18 = vmul.f32 0.3275911, %v1070_v17  ;;  %v1097_v40 = vsub.f32 0.0, %v1070_v17 }
 0x9d8   : > { %v1072_v19 = vadd.f32 1.0, %v1071_v18  ;;  %v1098_v43 = vmul.f32 %v1097_v40, %v1070_v17 }
 0x9da   : > { %1955 = vrcp.f32 %v1072_v19  ;;  %v1084_v29 = vand.u32 2147483648, %v1072_v19  ;;  %v1082_v32 = vand.u32 2147483647, %v1072_v19  ;;  %vm1078_vm10 = vweird.f32 %v1072_v19 }
 0x9db   : > { %v1099_v46 = vmul.f32 1.442695, %v1098_v43 }
 0x9dc   : > { %v1085_v36 = vor.u32 1.1754944e-38, %v1084_v29  ;;  %vm1083_vm12 = vcmp.eq.f32.partialorder %v1082_v32, 8.507059e+37 }
 0x9dd   : > { %1957 = vpow2.f32 %v1099_v46 }
 0x9e0   : > { %v1956_v24 = vpop.eup %1955 }
 0x9e1   : > { %v1074_v26 = vmul.f32 %v1956_v24, %v1072_v19  ;;  %vm1079_vm9 = vweird.f32 %v1956_v24 }
 0x9e2   : > { %vm1080_vm11 = vmor %vm1078_vm10, %vm1079_vm9 }
 0x9e3   : > { %v1075_v28 = vsub.f32 1.0, %v1074_v26  ;;  %v1958_v52 = vpop.eup %1957  ;;  %v1925_v26 = vld [vmem:[%s2461_s6 + $0x1] ss:$0 sm:$0xff] }
 0x9e5   : > { %v1076_v31 = vmul.f32 %v1956_v24, %v1075_v28 }
 0x9e7   : > { %v1077_v35 = vadd.f32 %v1956_v24, %v1076_v31 }
 0x9e9   : > { %v1081_v38 = vsel %vm1080_vm11, %v1956_v24, %v1077_v35 }
 0x9ea   : > { %v1086_v39 = vsel %vm1083_vm12, %v1085_v36, %v1081_v38 }
 0x9eb   : > { %v1088_v41 = vmul.f32 1.0614054, %v1086_v39 }
 0x9ed   : > { %v1089_v37 = vadd.f32 -1.4531521, %v1088_v41  ;;  %v1850_v41 = vld [vmem:[%s2462_s7 + $0x20] sm:$0xff] }
 0x9ee   : > { %1299 = vmatpush.msrb.mxu0 %v1850_v41 }
 0x9ef   : > { %v1090_v44 = vmul.f32 %v1089_v37, %v1086_v39 }
 0x9f1   : > { %v1091_v45 = vadd.f32 1.4214138, %v1090_v44 }
 0x9f3   : > { %v1092_v47 = vmul.f32 %v1091_v45, %v1086_v39 }
 0x9f5   : > { %v1093_v48 = vadd.f32 -0.28449672, %v1092_v47 }
 0x9f7   : > { %v1094_v49 = vmul.f32 %v1093_v48, %v1086_v39 }
 0x9f9   : > { %v1095_v50 = vadd.f32 0.2548296, %v1094_v49 }
 0x9fb   : > { %v1096_v51 = vmul.f32 %v1095_v50, %v1086_v39 }
 0x9fd   : > { %v1101_v53 = vmul.f32 %v1958_v52, %v1096_v51 }
 0x9ff   : > { %v1102_v54 = vsub.f32 1.0, %v1101_v53  ;;  %v1851_v53 = vld [vmem:[%s2462_s7 + $0x28] sm:$0xff] }
 0xa00   : > { %1391 = vmatpush.msrb.mxu1 %v1851_v53 }
 0xa01   : > { %v1103_v57 = vmul.f32 %v1102_v54, %v1069_v56 }
 0xa03   : > { %v1104_v34 = vadd.f32 1.0, %v1103_v57 }
 0xa05   : > { %v1105_v59 = vmul.f32 %v1104_v34, %v1066_v58 }
 0xa07   : > { %1843 = vmatmul.msk.f32.vlgmr.msra.gmra.mxu1 %vm1118_vm14, %v1105_v59 }
 0xa84   : > { %v1139_v61 = vpop.f32.mrf.mxu1 }
 0xa85   : > { %v1140_v62 = vadd.f32 %v1922_v60, %v1139_v61 }
 0xa87   : > { %v1142_v63 = vadd.f32 %v1140_v62, %v2245_v12 }
 0xa89   : > { %v1145_v0 = vsel %vm563_vm0, %v1142_v63, 0.0 }
 0xa8a   : > { %1146 = vadd.xlane.f32.xlu0 %v1145_v0 }
 0xafd   : > { %v1147_v1 = vpop.xlane.xlu0 %1146 }
 0xafe   : > { %v1148_v2 = vmul.f32 %v1147_v1, %v2120_v10 }
 0xb00   : > { %v1149_v3 = vsub.f32 %v1142_v63, %v1148_v2 }
 0xb02   : > { %v1150_v4 = vmul.f32 %v1149_v3, %v1149_v3 }
 0xb04   : > { %v1151_v5 = vsel %vm563_vm0, %v1150_v4, 0.0  ;;  %v1926_v4 = vld [vmem:[%s2463_s8 + $0x1] ss:$0 sm:$0xff] }
 0xb05   : > { %1152 = vadd.xlane.f32.xlu2 %v1151_v5 }
 0xb78   : > { %v1153_v11 = vpop.xlane.xlu2 %1152 }
 0xb79   : > { %v1154_v12 = vmul.f32 %v1153_v11, %v2120_v10 }
 0xb7b   : > { %v1155_v13 = vadd.f32 1e-05, %v1154_v12 }
 0xb7d   : > { %1959 = vrsqrt.f32 %v1155_v13  ;;  %vm1162_vm1 = vweird.f32 %v1155_v13 }
 0xb83   : > { %v1960_v14 = vpop.eup %1959 }
 0xb84   : > { %v1157_v15 = vmul.f32 %v1960_v14, %v1155_v13  ;;  %vm1163_vm15 = vweird.f32 %v1960_v14 }
 0xb85   : > { %vm1164_vm2 = vmor %vm1162_vm1, %vm1163_vm15 }
 0xb86   : > { %v1158_v16 = vmul.f32 %v1960_v14, %v1157_v15 }
 0xb88   : > { %v1159_v17 = vmul.f32 0.5, %v1158_v16 }
 0xb8a   : > { %v1160_v18 = vsub.f32 1.5, %v1159_v17 }
 0xb8c   : > { %v1161_v19 = vmul.f32 %v1960_v14, %v1160_v18 }
 0xb8e   : > { %v1165_v21 = vsel %vm1164_vm2, %v1960_v14, %v1161_v19 }
 0xb8f   : > { %v1166_v22 = vmul.f32 %v1165_v21, %v1149_v3 }
 0xb91   : > { %v1170_v24 = vmul.f32 %v1923_v20, %v1166_v22 }
 0xb93   : > { %v2304_v25 = vadd.f32 %v1924_v23, %v1170_v24 }
 0xb95   : > { %1849 = vmatmul.msk.f32.vlgmr.msra.gmra.mxu0 %vm563_vm0, %v2304_v25 }
 0xc12   : > { %v1205_v27 = vpop.f32.mrf.mxu0 }
 0xc13   : > { %v2311_v28 = vadd.f32 %v1925_v26, %v1205_v27 }
 0xc15   : > { %1310 = vrot.lane.b32.xlu2 %v2311_v28, %s1994_s28  ;;  %1217 = vrot.lane.b32.xlu1 %v2311_v28, %s1996_s30  ;;  %v1215_v29 = vmul.f32 0.35355338, %v2311_v28  ;;  %s2484_s28 = smov 104  }
 0xc1d   : > { %1308 = vrot.lane.b32.xlu1 %v1215_v29, %s2000_s23 }
 0xc6f   : > { %v1311_v31 = vpop.permute.xlu2 %1310 }
 0xc87   : > { %v1218_v30 = vpop.permute.xlu1 %1217 }
 0xc88   : > { %1855 = vmatpush.xpose.msk.msra.mxu2 %vm645_vm5, %v1218_v30 }
 0xc8b   : > { %1856 = vmatmul.msk.f32.vlgmr.msra.gmra.mxu2 %vm645_vm5, %v1215_v29 }
 0xc8c   : > { %1859 = vmatpush.xpose.msk.msrb.mxu2 %vm645_vm5, %v1311_v31 }
 0xc8f   : > { %v1309_v32 = vpop.permute.xlu1 %1308 }
 0xc93   : > { %1860 = vmatmul.msk.f32.vlgmr.msrb.gmra.mxu2 %vm645_vm5, %v1309_v32 }
 0xd0e   : > { %v1241_v33 = vpop.f32.mrf.mxu2 }
 0xd0f   : > { %v1242_v35 = vadd.f32 %v2167_v42, %v1241_v33 }
 0xd11   : > { %v1244_v36 = vsel %vm645_vm5, %v1242_v35, -inf }
 0xd12   : > { %1245 = vmax.xlane.f32.xlu1 %v1244_v36 }
 0xd16   : > { %v1333_v38 = vpop.f32.mrf.mxu2 }
 0xd17   : > { %v1334_v39 = vadd.f32 %v2167_v42, %v1333_v38 }
 0xd19   : > { %v1336_v40 = vsel %vm645_vm5, %v1334_v39, -inf }
 0xd1a   : > { %1337 = vmax.xlane.f32.xlu2 %v1336_v40 }
 0xd2b   : > { %1347 = vrot.lane.b32.xlu1 %v2311_v28, %s1997_s1  ;;  %s2485_s1 = smov 64  }
 0xd32   : > { %1399 = vrot.lane.b32.xlu2 %v2311_v28, %s1998_s20  ;;  %s2486_s20 = smov 112  }
 0xd33   : > { %1486 = vrot.lane.b32.xlu1 %v1215_v29, %s2484_s28  ;;  %s2490_s28 = sshll.u32 %s2492_s25, 3 }
 0xd85   : > { %v1246_v37 = vpop.xlane.xlu1 %1245 }
 0xd86   : > { %v1247_v43 = vsub.f32 %v1242_v35, %v1246_v37  ;;  %v1852_v35 = vld [vmem:[%s2462_s7 + $0x30] sm:$0xff] }
 0xd88   : > { %v1248_v44 = vmul.f32 1.442695, %v1247_v43 }
 0xd8a   : > { %1961 = vpow2.f32 %v1248_v44 }
 0xd8d   : > { %v1338_v45 = vpop.xlane.xlu2 %1337 }
 0xd8e   : > { %v1339_v46 = vsub.f32 %v1334_v39, %v1338_v45 }
 0xd90   : > { %v1962_v47 = vpop.eup %1961  ;;  %v1340_v48 = vmul.f32 1.442695, %v1339_v46 }
 0xd91   : > { %v1250_v49 = vsel %vm645_vm5, %v1962_v47, 0.0 }
 0xd92   : > { %1963 = vpow2.f32 %v1340_v48  ;;  %1251 = vadd.xlane.f32.xlu0 %v1250_v49 }
 0xd95   : > { %v1400_v50 = vpop.permute.xlu2 %1399 }
 0xd96   : > { %1863 = vmatpush.xpose.msk.msra.mxu0 %vm645_vm5, %v1400_v50  ;;  %v1876_v50 = vld [vmem:[%s2466_s11 + $0x38] sm:$0xff] }
 0xd98   : > { %v1964_v51 = vpop.eup %1963 }
 0xd99   : > { %v1342_v52 = vsel %vm645_vm5, %v1964_v51, 0.0 }
 0xd9a   : > { %1343 = vadd.xlane.f32.xlu0 %v1342_v52  ;;  %v1873_v52 = vld [vmem:[%s2466_s11 + $0x20] sm:$0xff] }
 0xd9d   : > { %v1348_v59 = vpop.permute.xlu1 %1347 }
 0xda5   : > { %v1487_v2 = vpop.permute.xlu1 %1486 }
 0xdae   : > { %1255 = vrot.lane.b32.xlu0 %v2311_v28, %s2485_s1  ;;  %s557_s1 = scalar_lea.vmem %s2472_s17, %s2490_s28 }
 0xdb6   : > { %1397 = vrot.lane.b32.xlu0 %v1215_v29, %s2486_s20 }
 0xdbe   : > { %1488 = vrot.lane.b32.xlu0 %v2311_v28, %s2487_s26 }
 0xe05   : > { %v1252_v54 = vpop.xlane.xlu0 %1251 }
 0xe06   : > { %1965 = vrcp.f32 %v1252_v54 }
 0xe0c   : > { %v1966_v57 = vpop.eup %1965 }
 0xe0d   : > { %v1344_v56 = vpop.xlane.xlu0 %1343  ;;  %v1254_v58 = vmul.f32 %v1966_v57, %v1962_v47 }
 0xe0e   : > { %1967 = vrcp.f32 %v1344_v56 }
 0xe14   : > { %v1968_v60 = vpop.eup %1967 }
 0xe15   : > { %v1346_v61 = vmul.f32 %v1968_v60, %v1964_v51  ;;  %v1874_v51 = vld [vmem:[%s2466_s11 + $0x28] sm:$0xff] }
 0xe20   : > { %v1256_v34 = vpop.permute.xlu0 %1255 }
 0xe21   : > { %1276 = vmatpush.msra.mxu3 %v1256_v34 }
 0xe22   : > { %1857 = vmatmul.msk.f32.vlgmr.msra.gmra.mxu3 %vm645_vm5, %v1254_v58 }
 0xe23   : > { %1368 = vmatpush.msrb.mxu3 %v1348_v59 }
 0xe25   : > { %1480 = vmatpush.msra.mxu3 %v1852_v35 }
 0xe28   : > { %v1398_v62 = vpop.permute.xlu0 %1397 }
 0xe2a   : > { %1861 = vmatmul.msk.f32.vlgmr.msrb.gmra.mxu3 %vm645_vm5, %v1346_v61 }
 0xe2b   : > { %1635 = vmatpush.msrb.mxu3 %v1876_v50 }
 0xe30   : > { %v1489_v63 = vpop.permute.xlu0 %1488 }
 0xe31   : > { %1867 = vmatpush.xpose.msk.msra.mxu1 %vm645_vm5, %v1489_v63 }
 0xea5   : > { %v1278_v0 = vpop.f32.mrf.mxu3 }
 0xea6   : > { %1858 = vmatmul.msk.f32.vlgmr.msrb.gmra.mxu0 %vm645_vm5, %v1278_v0 }
 0xead   : > { %v1370_v1 = vpop.f32.mrf.mxu3 }
 0xeae   : > { %1862 = vmatmul.msk.f32.vlgmr.msrb.gmra.mxu1 %vm645_vm5, %v1370_v1  ;;  %1864 = vmatmul.msk.f32.vlgmr.msra.gmra.mxu0 %vm645_vm5, %v1398_v62  ;;  %v1927_v62 = vld [vmem:[%s2464_s9 + $0x1] ss:$0 sm:$0xff] }
 0xeaf   : > { %v1928_v1 = vld [vmem:[%s2465_s10 + $0x1] ss:$0 sm:$0xff] }
 0xeb6   : > { %1868 = vmatmul.msk.f32.vlgmr.msra.gmra.mxu1 %vm645_vm5, %v1487_v2 }
 0xf23   : > { %v1301_v3 = vpop.f32.mrf.mxu0 }
 0xf24   : > { %v1307_v5 = vadd.f32 %v1926_v4, %v1301_v3  ;;  %v1929_v4 = vld [vmem:[%s2467_s12 + $0x1] ss:$0 sm:$0xff] }
 0xf2b   : > { %v1393_v6 = vpop.f32.mrf.mxu1  ;;  %v1422_v7 = vpop.f32.mrf.mxu0 }
 0xf2c   : > { %v1396_v8 = vadd.f32 %v1393_v6, %v1307_v5  ;;  %v1423_v9 = vadd.f32 %v2167_v42, %v1422_v7 }
 0xf2e   : > { %v1425_v11 = vsel %vm645_vm5, %v1423_v9, -inf }
 0xf2f   : > { %1426 = vmax.xlane.f32.xlu0 %v1425_v11 }
 0xf33   : > { %v1511_v12 = vpop.f32.mrf.mxu1 }
 0xf34   : > { %v1512_v13 = vadd.f32 %v2167_v42, %v1511_v12  ;;  %v1886_v12 = vld [vmem:[%s2468_s13 + $0x78] sm:$0xff] }
 0xf35   : > { %1708 = vmatpush.msrb.mxu1 %v1886_v12 }
 0xf36   : > { %v1514_v14 = vsel %vm645_vm5, %v1512_v13, -inf }
 0xf37   : > { %1515 = vmax.xlane.f32.xlu1 %v1514_v14  ;;  %v1884_v14 = vld [vmem:[%s2468_s13 + $0x68] sm:$0xff] }
 0xf50   : > { %1436 = vrot.lane.b32.xlu1 %v2311_v28, %s2488_s21 }
 0xfa2   : > { %v1427_v15 = vpop.xlane.xlu0 %1426 }
 0xfa3   : > { %v1428_v16 = vsub.f32 %v1423_v9, %v1427_v15  ;;  %v1883_v15 = vld [vmem:[%s2468_s13 + $0x60] sm:$0xff] }
 0xfa5   : > { %v1429_v17 = vmul.f32 1.442695, %v1428_v16 }
 0xfa7   : > { %1969 = vpow2.f32 %v1429_v17  ;;  %v1882_v17 = vld [vmem:[%s2468_s13 + $0x58] sm:$0xff] }
 0xfaa   : > { %v1516_v18 = vpop.xlane.xlu1 %1515 }
 0xfab   : > { %v1517_v19 = vsub.f32 %v1512_v13, %v1516_v18  ;;  %v1885_v13 = vld [vmem:[%s2468_s13 + $0x70] sm:$0xff] }
 0xfac   : > { %1709 = vmatpush.msrb.mxu1 %v1885_v13 }
 0xfad   : > { %v1970_v20 = vpop.eup %1969  ;;  %v1518_v21 = vmul.f32 1.442695, %v1517_v19  ;;  %v1881_v19 = vld [vmem:[%s2468_s13 + $0x50] sm:$0xff] }
 0xfae   : > { %v1431_v22 = vsel %vm645_vm5, %v1970_v20, 0.0  ;;  %1710 = vmatpush.msrb.mxu1 %v1884_v14 }
 0xfaf   : > { %1971 = vpow2.f32 %v1518_v21  ;;  %1432 = vadd.xlane.f32.xlu2 %v1431_v22  ;;  %v1880_v22 = vld [vmem:[%s2468_s13 + $0x48] sm:$0xff] }
 0xfb0   : > { %1711 = vmatpush.msrb.mxu1 %v1883_v15 }
 0xfb2   : > { %1712 = vmatpush.msrb.mxu1 %v1882_v17 }
 0xfb4   : > { %1713 = vmatpush.msrb.mxu1 %v1881_v19 }
 0xfb5   : > { %v1972_v23 = vpop.eup %1971 }
 0xfb6   : > { %v1520_v42 = vsel %vm645_vm5, %v1972_v23, 0.0  ;;  %1714 = vmatpush.msrb.mxu1 %v1880_v22 }
 0xfb7   : > { %1521 = vadd.xlane.f32.xlu0 %v1520_v42 }
 0xfc2   : > { %v1437_v24 = vpop.permute.xlu1 %1436 }
 0xfc3   : > { %1457 = vmatpush.msra.mxu2 %v1437_v24  ;;  %v1879_v24 = vld [vmem:[%s2468_s13 + $0x40] sm:$0xff] }
 0xfc4   : > { %1715 = vmatpush.msrb.mxu1 %v1879_v24 }
 0xfc7   : > { %1525 = vrot.lane.b32.xlu2 %v2311_v28, %s2489_s18  ;;  %v1853_v28 = vld [vmem:[%s2462_s7 + $0x38] sm:$0xff] }
 0xfc8   : > { %1569 = vmatpush.msrb.mxu2 %v1853_v28 }
0x1022   : > { %v1433_v26 = vpop.xlane.xlu2 %1432 }
0x1023   : > { %1973 = vrcp.f32 %v1433_v26 }
0x1029   : > { %v1974_v27 = vpop.eup %1973 }
0x102a   : > { %v1435_v29 = vmul.f32 %v1974_v27, %v1970_v20  ;;  %v1526_v30 = vpop.permute.xlu2 %1525  ;;  %v1522_v31 = vpop.xlane.xlu0 %1521 }
0x102b   : > { %1975 = vrcp.f32 %v1522_v31  ;;  %1546 = vmatpush.msrb.mxu0 %v1526_v30 }
0x102c   : > { %1865 = vmatmul.msk.f32.vlgmr.msra.gmra.mxu2 %vm645_vm5, %v1435_v29 }
0x1031   : > { %v1976_v32 = vpop.eup %1975 }
0x1032   : > { %v1524_v33 = vmul.f32 %v1976_v32, %v1972_v23 }
0x1034   : > { %1869 = vmatmul.msk.f32.vlgmr.msrb.gmra.mxu0 %vm645_vm5, %v1524_v33 }
0x10af   : > { %v1459_v36 = vpop.f32.mrf.mxu2 }
0x10b0   : > { %1866 = vmatmul.msk.f32.vlgmr.msra.gmra.mxu3 %vm645_vm5, %v1459_v36 }
0x10b1   : > { %v1548_v38 = vpop.f32.mrf.mxu0 }
0x10b2   : > { %1870 = vmatmul.msk.f32.vlgmr.msrb.gmra.mxu2 %vm645_vm5, %v1548_v38 }
0x1133   : > { %v1482_v39 = vpop.f32.mrf.mxu3 }
0x1134   : > { %v1485_v40 = vadd.f32 %v1482_v39, %v1396_v8 }
0x1135   : > { %v1571_v41 = vpop.f32.mrf.mxu2 }
0x1136   : > { %v1574_v37 = vadd.f32 %v1571_v41, %v1485_v40 }
0x1138   : > { %v1575_v43 = vadd.f32 %v1574_v37, %v2304_v25  ;;  %v1875_v25 = vld [vmem:[%s2466_s11 + $0x30] sm:$0xff] }
0x1139   : > { %1636 = vmatpush.msrb.mxu3 %v1875_v25 }
0x113a   : > { %v1580_v44 = vsel %vm563_vm0, %v1575_v43, 0.0 }
0x113b   : > { %1581 = vadd.xlane.f32.xlu0 %v1580_v44  ;;  %1637 = vmatpush.msrb.mxu3 %v1874_v51  ;;  %v1930_v51 = vld [vmem:[%s2469_s14 + $0x1] ss:$0 sm:$0xff] }
0x113d   : > { %1638 = vmatpush.msrb.mxu3 %v1873_v52 }
0x11ae   : > { %v1582_v45 = vpop.xlane.xlu0 %1581 }
0x11af   : > { %v1583_v46 = vmul.f32 %v1582_v45, %v2120_v10 }
0x11b1   : > { %v1584_v47 = vsub.f32 %v1575_v43, %v1583_v46 }
0x11b3   : > { %v1585_v48 = vmul.f32 %v1584_v47, %v1584_v47 }
0x11b5   : > { %v1586_v49 = vsel %vm563_vm0, %v1585_v48, 0.0 }
0x11b6   : > { %1587 = vadd.xlane.f32.xlu0 %v1586_v49 }
0x1229   : > { %v1588_v53 = vpop.xlane.xlu0 %1587 }
0x122a   : > { %v1589_v54 = vmul.f32 %v1588_v53, %v2120_v10 }
0x122c   : > { %v1590_v56 = vadd.f32 1e-05, %v1589_v54 }
0x122e   : > { %1977 = vrsqrt.f32 %v1590_v56  ;;  %vm1597_vm4 = vweird.f32 %v1590_v56 }
0x1234   : > { %v1978_v57 = vpop.eup %1977 }
0x1235   : > { %v1592_v58 = vmul.f32 %v1978_v57, %v1590_v56  ;;  %vm1598_vm3 = vweird.f32 %v1978_v57 }
0x1236   : > { %vm1599_vm5 = vmor %vm1597_vm4, %vm1598_vm3 }
0x1237   : > { %v1593_v34 = vmul.f32 %v1978_v57, %v1592_v58 }
0x1239   : > { %v1594_v59 = vmul.f32 0.5, %v1593_v34 }
0x123b   : > { %v1595_v60 = vsub.f32 1.5, %v1594_v59 }
0x123d   : > { %v1596_v61 = vmul.f32 %v1978_v57, %v1595_v60 }
0x123f   : > { %v1600_v63 = vsel %vm1599_vm5, %v1978_v57, %v1596_v61 }
0x1240   : > { %v1601_v0 = vmul.f32 %v1600_v63, %v1584_v47 }
0x1242   : > { %v1605_v2 = vmul.f32 %v1927_v62, %v1601_v0 }
0x1244   : > { %v2399_v3 = vadd.f32 %v1928_v1, %v1605_v2 }
0x1246   : > { %1878 = vmatmul.msk.f32.vlgmr.msrb.gmra.mxu3 %vm563_vm0, %v2399_v3 }
0x12c9   : > { %v1640_v5 = vpop.f32.mrf.mxu3 }
0x12ca   : > { %v1641_v6 = vadd.f32 %v1929_v4, %v1640_v5  ;;  %v1931_v5 = vld [vmem:[%s2470_s15 + $0x1] ss:$0 sm:$0xff] }
0x12cc   : > { %v1644_v7 = vmul.f32 0.70710677, %v1641_v6  ;;  %v1643_v49 = vmul.f32 0.5, %v1641_v6 }
0x12ce   : > { %v1647_v8 = vand.u32 2147483647, %v1644_v7  ;;  %vm1645_vm10 = vcmp.ge.f32.partialorder %v1644_v7, 0.0 }
0x12cf   : > { %v1646_v47 = vsel %vm1645_vm10, 1.0, %v2005_v55 }
0x12d0   : > { %v1648_v9 = vmul.f32 0.3275911, %v1647_v8  ;;  %v1674_v31 = vsub.f32 0.0, %v1647_v8 }
0x12d2   : > { %v1649_v11 = vadd.f32 1.0, %v1648_v9  ;;  %v1675_v35 = vmul.f32 %v1674_v31, %v1647_v8 }
0x12d4   : > { %1979 = vrcp.f32 %v1649_v11  ;;  %v1661_v21 = vand.u32 2147483648, %v1649_v11  ;;  %v1659_v42 = vand.u32 2147483647, %v1649_v11  ;;  %vm1655_vm7 = vweird.f32 %v1649_v11 }
0x12d5   : > { %v1676_v38 = vmul.f32 1.442695, %v1675_v35 }
0x12d6   : > { %v1662_v27 = vor.u32 1.1754944e-38, %v1661_v21  ;;  %vm1660_vm9 = vcmp.eq.f32.partialorder %v1659_v42, 8.507059e+37 }
0x12d7   : > { %1981 = vpow2.f32 %v1676_v38 }
0x12da   : > { %v1980_v16 = vpop.eup %1979 }
0x12db   : > { %v1651_v18 = vmul.f32 %v1980_v16, %v1649_v11  ;;  %vm1656_vm6 = vweird.f32 %v1980_v16 }
0x12dc   : > { %vm1657_vm8 = vmor %vm1655_vm7, %vm1656_vm6 }
0x12dd   : > { %v1652_v20 = vsub.f32 1.0, %v1651_v18  ;;  %v1982_v44 = vpop.eup %1981 }
0x12df   : > { %v1653_v23 = vmul.f32 %v1980_v16, %v1652_v20 }
0x12e1   : > { %v1654_v26 = vadd.f32 %v1980_v16, %v1653_v23 }
0x12e3   : > { %v1658_v29 = vsel %vm1657_vm8, %v1980_v16, %v1654_v26 }
0x12e4   : > { %v1663_v30 = vsel %vm1660_vm9, %v1662_v27, %v1658_v29 }
0x12e5   : > { %v1665_v32 = vmul.f32 1.0614054, %v1663_v30 }
0x12e7   : > { %v1666_v33 = vadd.f32 -1.4531521, %v1665_v32 }
0x12e9   : > { %v1667_v28 = vmul.f32 %v1666_v33, %v1663_v30 }
0x12eb   : > { %v1668_v36 = vadd.f32 1.4214138, %v1667_v28 }
0x12ed   : > { %v1669_v39 = vmul.f32 %v1668_v36, %v1663_v30 }
0x12ef   : > { %v1670_v40 = vadd.f32 -0.28449672, %v1669_v39 }
0x12f1   : > { %v1671_v41 = vmul.f32 %v1670_v40, %v1663_v30 }
0x12f3   : > { %v1672_v37 = vadd.f32 0.2548296, %v1671_v41 }
0x12f5   : > { %v1673_v43 = vmul.f32 %v1672_v37, %v1663_v30 }
0x12f7   : > { %v1678_v45 = vmul.f32 %v1982_v44, %v1673_v43 }
0x12f9   : > { %v1679_v46 = vsub.f32 1.0, %v1678_v45 }
0x12fb   : > { %v1680_v48 = vmul.f32 %v1679_v46, %v1646_v47 }
0x12fd   : > { %v1681_v50 = vadd.f32 1.0, %v1680_v48 }
0x12ff   : > { %v1682_v25 = vmul.f32 %v1681_v50, %v1643_v49 }
0x1301   : > { %1888 = vmatmul.msk.f32.vlgmr.msrb.gmra.mxu1 %vm1118_vm14, %v1682_v25 }
0x137e   : > { %v1717_v52 = vpop.f32.mrf.mxu1 }
0x137f   : > { %v1718_v53 = vadd.f32 %v1930_v51, %v1717_v52 }
0x1381   : > { %v1720_v54 = vadd.f32 %v1718_v53, %v2399_v3 }
0x1383   : > { %v1725_v56 = vsel %vm563_vm0, %v1720_v54, 0.0 }
0x1384   : > { %1726 = vadd.xlane.f32.xlu0 %v1725_v56 }
0x13f7   : > { %v1727_v57 = vpop.xlane.xlu0 %1726 }
0x13f8   : > { %v1728_v55 = vmul.f32 %v1727_v57, %v2120_v10 }
0x13fa   : > { %v1729_v58 = vsub.f32 %v1720_v54, %v1728_v55 }
0x13fc   : > { %v1730_v34 = vmul.f32 %v1729_v58, %v1729_v58 }
0x13fe   : > { %v1731_v59 = vsel %vm563_vm0, %v1730_v34, 0.0 }
0x13ff   : > { %1732 = vadd.xlane.f32.xlu1 %v1731_v59 }
0x1472   : > { %v1733_v60 = vpop.xlane.xlu1 %1732 }
0x1473   : > { %v1734_v61 = vmul.f32 %v1733_v60, %v2120_v10  ;;  %v1932_v10 = vld [vmem:[%s2471_s16 + $0x1] ss:$0 sm:$0xff] }
0x1475   : > { %v1735_v62 = vadd.f32 1e-05, %v1734_v61 }
0x1477   : > { %1983 = vrsqrt.f32 %v1735_v62  ;;  %vm1742_vm12 = vweird.f32 %v1735_v62 }
0x147d   : > { %v1984_v63 = vpop.eup %1983 }
0x147e   : > { %v1737_v0 = vmul.f32 %v1984_v63, %v1735_v62  ;;  %vm1743_vm11 = vweird.f32 %v1984_v63 }
0x147f   : > { %vm1744_vm13 = vmor %vm1742_vm12, %vm1743_vm11 }
0x1480   : > { %v1738_v1 = vmul.f32 %v1984_v63, %v1737_v0 }
0x1482   : > { %v1739_v2 = vmul.f32 0.5, %v1738_v1 }
0x1484   : > { %v1740_v3 = vsub.f32 1.5, %v1739_v2 }
0x1486   : > { %v1741_v4 = vmul.f32 %v1984_v63, %v1740_v3 }
0x1488   : > { %v1745_v6 = vsel %vm1744_vm13, %v1984_v63, %v1741_v4 }
0x1489   : > { %v1746_v7 = vmul.f32 %v1745_v6, %v1729_v58 }
0x148b   : > { %v1750_v8 = vmul.f32 %v1931_v5, %v1746_v7 }
0x148d   : > { %v1754_v9 = vadd.f32 %v1932_v10, %v1750_v8 }
0x148f   : > { %1755 = vst.msk [vmem:[%s557_s1] sm:$0xff] %vm563_vm0, %v1754_v9 }
0x1490 PF: > { %s27_s24 = sadd.s32 1, %s1991_s24  }
0x1491   : > { %p24_p4 = scmp.ge.s32.totalorder %s27_s24, 4  }
0x1493   :  { %26 = sbr.rel (!%p24_p4) target bundleno = 3 (0x3), region = 133 }

// kernel: bart_forward.3
= control target key start
LH: loop header
LB: loop body
LE: loop exit
PB: predicated region body
PF: predicated region fallthrough
CT: control target
= control target key end

     0   :  { %s3857_s6 = smov 1   ;;  %s3858_s10 = smov 2   ;;  %s4595_s0 = inlined_call_operand.smem [shape: u32[30], index: -1, kind: input, shape index: {}] }
   0x1   :  { %s3910_s5 = sld [smem:[%s4595_s0]]   ;;  %s3859_s14 = smov 3  }
   0x2   :  { %s3915_s9 = sld [smem:[%s4595_s0 + %s3857_s6]]   ;;  %s3860_s18 = smov 4  }
   0x3   :  { %s3920_s13 = sld [smem:[%s4595_s0 + %s3858_s10]]   ;;  %s3861_s22 = smov 5  }
   0x4   :  { %s3925_s17 = sld [smem:[%s4595_s0 + %s3859_s14]]   ;;  %s3862_s26 = smov 6  }
   0x5   :  { %s3930_s21 = sld [smem:[%s4595_s0 + %s3860_s18]]   ;;  %s3863_s30 = smov 7  }
   0x6   :  { %s3935_s25 = sld [smem:[%s4595_s0 + %s3861_s22]]   ;;  %s3864_s4 = smov 8  }
   0x7   :  { %4641 = sst [smem:[#allocation11_spill]] %s3910_s5  ;;  %s3865_s10 = smov 9  }
   0x8   :  { %4642 = sst [smem:[#allocation12_spill]] %s3915_s9  ;;  %s3866_s15 = smov 10  }
   0x9   :  { %4643 = sst [smem:[#allocation13_spill]] %s3920_s13  ;;  %s3867_s20 = smov 11  }
   0xa   :  { %4644 = sst [smem:[#allocation14_spill]] %s3925_s17  ;;  %s3869_s1 = smov 13  }
   0xb   :  { %4645 = sst [smem:[#allocation15_spill]] %s3930_s21  ;;  %s3870_s7 = smov 14  }
   0xc   :  { %4646 = sst [smem:[#allocation16_spill]] %s3935_s25  ;;  %s3872_s22 = smov 16  }
   0xd   :  { %s3940_s29 = sld [smem:[%s4595_s0 + %s3862_s26]]   ;;  %s3868_s26 = smov 12  }
   0xe   :  { %s3945_s3 = sld [smem:[%s4595_s0 + %s3863_s30]]   ;;  %s3873_s28 = smov 17  }
   0xf   :  { %s3950_s8 = sld [smem:[%s4595_s0 + %s3864_s4]]  }
  0x10   :  { %s3955_s14 = sld [smem:[%s4595_s0 + %s3865_s10]]  }
  0x11   :  { %s3960_s19 = sld [smem:[%s4595_s0 + %s3866_s15]]   ;;  %s3871_s15 = smov 15  }
  0x12   :  { %s3965_s24 = sld [smem:[%s4595_s0 + %s3867_s20]]  }
  0x13   :  { %4647 = sst [smem:[#allocation17_spill]] %s3940_s29 }
  0x14   :  { %4648 = sst [smem:[#allocation18_spill]] %s3945_s3 }
  0x15   :  { %4649 = sst [smem:[#allocation19_spill]] %s3950_s8 }
  0x16   :  { %s3970_s30 = sld [smem:[%s4595_s0 + %s3868_s26]]  }
  0x17   :  { %s3975_s6 = sld [smem:[%s4595_s0 + %s3869_s1]]  }
  0x18   :  { %s3980_s12 = sld [smem:[%s4595_s0 + %s3870_s7]]   ;;  %s3874_s7 = smov 18  }
  0x19   :  { %s3985_s20 = sld [smem:[%s4595_s0 + %s3871_s15]]   ;;  %s3875_s15 = smov 19  }
  0x1a   :  { %s3990_s27 = sld [smem:[%s4595_s0 + %s3872_s22]]   ;;  %s3876_s22 = smov 20  }
  0x1b   :  { %s3995_s4 = sld [smem:[%s4595_s0 + %s3873_s28]]   ;;  %s3877_s28 = smov 21  }
  0x1c   :  { %4650 = sst [smem:[#allocation20_spill]] %s3970_s30 }
  0x1d   :  { %s4005_s30 = sld [smem:[%s4595_s0 + %s3875_s15]]   ;;  %s3879_s15 = smov 23  }
  0x1e   :  { %4651 = sst [smem:[#allocation21_spill]] %s3980_s12 }
  0x1f   :  { %s4000_s12 = sld [smem:[%s4595_s0 + %s3874_s7]]   ;;  %s3878_s7 = smov 22  }
  0x20   :  { %4652 = sst [smem:[#allocation22_spill]] %s3990_s27 }
  0x21   :  { %4653 = sst [smem:[#allocation23_spill]] %s3995_s4 }
  0x22   :  { %s4010_s27 = sld [smem:[%s4595_s0 + %s3876_s22]]   ;;  %s3880_s22 = smov 24  }
  0x23   :  { %4655 = sst [smem:[#allocation25_spill]] %s4005_s30 }
  0x24   :  { %s4015_s4 = sld [smem:[%s4595_s0 + %s3877_s28]]   ;;  %s3881_s28 = smov 25  }
  0x25   :  { %4654 = sst [smem:[#allocation24_spill]] %s4000_s12 }
  0x26   :  { %s4020_s12 = sld [smem:[%s4595_s0 + %s3878_s7]]   ;;  %s3882_s7 = smov 26  }
  0x27   :  { %s4025_s30 = sld [smem:[%s4595_s0 + %s3879_s15]]   ;;  %s3883_s15 = smov 27  }
  0x28   :  { %4656 = sst [smem:[#allocation26_spill]] %s4010_s27 }
  0x29   :  { %s4030_s27 = sld [smem:[%s4595_s0 + %s3880_s22]]   ;;  %s3884_s22 = smov 28  }
  0x2a   :  { %4657 = sst [smem:[#allocation27_spill]] %s4015_s4 }
  0x2b   :  { %s4035_s4 = sld [smem:[%s4595_s0 + %s3881_s28]]   ;;  %s3885_s28 = smov 29  }
  0x2c   :  { %4658 = sst [smem:[#allocation28_spill]] %s4020_s12 }
  0x2d   :  { %4659 = sst [smem:[#allocation29_spill]] %s4025_s30 }
  0x2e   :  { %s4040_s12 = sld [smem:[%s4595_s0 + %s3882_s7]]  }
  0x2f   :  { %4660 = sst [smem:[#allocation30_spill]] %s4030_s27 }
  0x30   :  { %s4045_s30 = sld [smem:[%s4595_s0 + %s3883_s15]]  }
  0x31   :  { %4661 = sst [smem:[#allocation31_spill]] %s4035_s4 }
  0x32   :  { %s4050_s27 = sld [smem:[%s4595_s0 + %s3884_s22]]  }
  0x33   :  { %s4055_s4 = sld [smem:[%s4595_s0 + %s3885_s28]]  }
  0x38   :  { %4662 = sst [smem:[#allocation32_spill]] %s4050_s27 }
  0x39   :  { %64 = vsyncpa [#allocation3], 0 }
  0x3a   :  { %65 = vsyncpa [#allocation6], 0 }
  0x3b   :  { %66 = vsyncpa [#allocation4], 0 }
  0x3c   :  { %68 = vsyncpa [#allocation4 + $0x1], 0  ;;  %s4057_s7 = smov 0   ;;  %s4059_s10 = smov 0  }
  0x3d   :  { %s4061_s11 = smov 0   ;;  %s4063_s15 = smov 0  }
  0x3e LB: > { %s4663_s27 = sld [smem:[#allocation32_spill]]  ;;  %s4078_s0 = sadd.s32 4294967295, %s3855_s15   ;;  %s3843_s7 = sphi %s4057_s7, %s4722_s7   ;;  %s3855_s15 = sphi %s4063_s15, %s4719_s15   ;;  %s3851_s11 = sphi %s4061_s11, %s4721_s11   ;;  %s3847_s10 = sphi %s4059_s10, %s4723_s10  }
  0x3f   : > { %s4664_s8 = sld [smem:[#allocation19_spill]]  ;;  %s3351_s16 = sadd.s32 4294967294, %s3855_s15  }
  0x40   : > { %s4665_s3 = sld [smem:[#allocation18_spill]]  ;;  %s4082_s18 = sadd.s32 1, %s3855_s15  }
  0x41   : > { %s4666_s25 = sld [smem:[#allocation16_spill]]  ;;  %s710_s22 = sadd.s32 1, %s3851_s11 }
  0x42   : > { %s4667_s17 = sld [smem:[#allocation14_spill]]  ;;  %s707_s23 = ssub.s32 %s3855_s15, %s4082_s18 }
  0x43   : > { %4668 = sst [smem:[#allocation33_spill]] %s3843_s7  ;;  %p720_p0 = scmp.ne.s32.totalorder %s3851_s11, %s3847_s10 }
  0x44   : > { %4669 = sst [smem:[#allocation34_spill]] %s3851_s11  ;;  %p708_p1 = scmp.eq.s32.totalorder %s707_s23, 0 }
  0x45   : > { %4670 = sst [smem:[#allocation35_spill]] %s3855_s15  ;;  %p721_p2 = scmp.eq.s32.totalorder %s4078_s0, 1 }
  0x46   : > { %4671 = sst [smem:[#allocation36_spill]] %s4082_s18  ;;  %p726_p3 = scmp.ne.s32.totalorder %s3847_s10, %s3843_s7 }
  0x47   : > { %p727_p4 = scmp.eq.s32.totalorder %s3351_s16, 1  ;;  %p4095_p5 = por %p721_p2, %p720_p0 }
  0x48   : > { %s4093_s26 = scalar_select %p708_p1, %s3851_s11, %s710_s22  }
  0x49   : > { %s4673_s28 = scalar_select %p4095_p5, 1, 0 }
  0x4a   : > { %4672 = sst [smem:[#allocation37_spill]] %s4093_s26  ;;  %p4099_p6 = por %p727_p4, %p726_p3 }
  0x4b   : > { %4674 = sst [smem:[#allocation38_spill]] %s4673_s28  ;;  %p3352_p7 = scmp.ge.s32.totalorder %s3855_s15, 1 }
  0x4c   : > { %s4675_s1 = scalar_select %p4099_p6, 1, 0 }
  0x4d   : > { %p734_p8 = scmp.lt.s32.totalorder %s3855_s15, 3  ;;  %p3523_p9 = scmp.eq.s32.totalorder %s4078_s0, 0 }
  0x4e   : > { %4676 = sst [smem:[#allocation39_spill]] %s4675_s1  ;;  %s752_s23 = sshll.u32 %s4667_s17, 4  ;;  %s753_s23 = int_to_ptr.hbm [resolvable:$true] %s752_s23 }
  0x4f   : > { %p4106_p10 = pnand %p3352_p7, %p734_p8  ;;  %s3886_s16 = smov [#allocation2]  }
  0x50   : > { %s754_s22 = sshll.u32 %s3886_s16, 4  ;;  %s827_s26 = sshll.u32 %s4663_s27, 4  ;;  %s755_s22 = int_to_ptr.vmem [resolvable:$true] %s754_s22  ;;  %s4120_s26 = int_to_ptr.hbm [resolvable:$true] %s827_s26 }
  0x51   : > { %p3512_p11 = pneg %p4106_p10  ;;  %s3887_s18 = smov [#allocation5]  }
  0x52   : > { %s4122_s1 = sshll.u32 %s3887_s18, 4  ;;  %s3725_s7 = sshra.s32 %s753_s23, 4  ;;  %s3726_s7 = int_to_ptr.hbm [resolvable:$true] %s3725_s7  ;;  %s830_s1 = int_to_ptr.vmem [resolvable:$true] %s4122_s1 }
  0x53   : > { %p4116_p12 = pnand %p3523_p9, %p3512_p11  ;;  %s3727_s15 = scalar_lea.hbm %s3726_s7, 1 }
  0x54   : > { %p3728_p13 = scmp.ne.s32.totalorder %s3726_s7, %s3727_s15  ;;  %s3732_s16 = scalar_lea.hbm %s4667_s17, 1 }
  0x55   : > { %p3729_p0 = pneg %p4116_p12  ;;  %p3733_p3 = scmp.lt.s32.totalorder %s3726_s7, %s4667_s17 }
  0x56   : > { %p3734_p4 = scmp.lt.s32.totalorder %s3732_s16, %s3727_s15 }
  0x57   : > { %p3730_p1 = pnand %p3729_p0, %p3728_p13 }
  0x58   : > { %p3735_p7 = por %p3734_p4, %p3733_p3 }
  0x59   : > { %p3731_p2 = pneg %p3730_p1 }
  0x5b   : > { %p3736_p8 = pnand %p3735_p7, %p3731_p2 }
  0x5d   : > { %3739 = shalt.err (!%p3736_p8)
}
  0x5e   : > { %3515 = dma.hbm_to_vmem [thread:$0]  (!%p4116_p12), %s753_s23, 16, %s755_s22, [#allocation3]  }
  0x5f   : > { %s3755_s18 = sshra.s32 %s4120_s26, 4  ;;  %s3762_s7 = scalar_lea.hbm %s4663_s27, 1  ;;  %s3756_s18 = int_to_ptr.hbm [resolvable:$true] %s3755_s18 }
  0x60   : > { %s3757_s28 = scalar_lea.hbm %s3756_s18, 1  ;;  %p3763_p2 = scmp.lt.s32.totalorder %s3756_s18, %s4663_s27 }
  0x61   : > { %p3758_p11 = scmp.ne.s32.totalorder %s3756_s18, %s3757_s28  ;;  %p3764_p3 = scmp.lt.s32.totalorder %s3762_s7, %s3757_s28 }
  0x63   : > { %p3760_p13 = pnand %p3758_p11, %p3729_p0  ;;  %p3765_p4 = por %p3764_p3, %p3763_p2 }
  0x65   : > { %p3761_p1 = pneg %p3760_p13 }
  0x67   : > { %p3766_p7 = pnand %p3765_p4, %p3761_p1 }
  0x69   : > { %3769 = shalt.err (!%p3766_p7)
}
  0x6a   : > { %3518 = dma.hbm_to_vmem [thread:$0]  (!%p4116_p12), %s4120_s26, 16, %s830_s1, [#allocation6]  }
  0x6b   : > { %868 = sbr.rel (%p4106_p10) target bundleno = 8887 (0x22b7), region = 136 }
  0x70   : > { %3830 = dma.done.wait (%p3523_p9), [#allocation3], 16  }
  0x71   : > { %3832 = vsyncadd (%p3523_p9), [#allocation3], 4294967280 }
  0x72   : > { %3834 = dma.done.wait (%p3523_p9), [#allocation6], 16  }
  0x73   : > { %3836 = vsyncadd (%p3523_p9), [#allocation6], 4294967280  ;;  %s4679_s5 = sld [smem:[#allocation11_spill]]  ;;  %p959_p12 = scmp.lt.s32.totalorder %s4078_s0, 1  ;;  %vm978_vm0 = vcmask 261120   ;;  %v3888_v4 = vmov 32.0   ;;  %v1017_v42 = vlaneseq }
  0x74   : > { %s4680_s29 = sld [smem:[#allocation17_spill]]  ;;  %3636 = vrcp.f32 %v3888_v4  ;;  %v1032_v16 = vld [vmem:[%s4665_s3 + $0x18] sm:$0xff]  ;;  %v1031_v17 = vld [vmem:[%s4665_s3 + $0x10] sm:$0xff]  ;;  %v1030_v18 = vld [vmem:[%s4665_s3 + $0x8] sm:$0xff]  ;;  %s4624_s2 = smov 88   ;;  %vm1069_vm5 = vcmask 64512  }
  0x75   : > { %s4681_s9 = sld [smem:[#allocation12_spill]]  ;;  %1052 = vmatpush.msra.mxu2 %v1032_v16  ;;  %v1029_v19 = vld [vmem:[%s4665_s3] sm:$0xff]  ;;  %s4617_s23 = smov 64   ;;  %v1018_v43 = vshrl.u32 %v1017_v42, 7  ;;  %v1020_v44 = vand.u32 127, %v1017_v42  ;;  %v1062_v42 = vld [vmem:[%s3955_s14 + $0x10] sm:$0xff] }
  0x76   : > { %s4155_s11 = scalar_select %p959_p12, %s4078_s0, 1  ;;  %v3608_v32 = vld [vmem:[#allocation2] ss:$0 sm:$0xff]  ;;  %v3892_v46 = vmov -1e+09  }
  0x77   : > { %1053 = vmatpush.msra.mxu2 %v1031_v17  ;;  %s4682_s13 = sld [smem:[#allocation13_spill]]  ;;  %v3609_v35 = vld [vmem:[%s4664_s8] ss:$0 sm:$0xff]  ;;  %s4632_s22 = smov 96   ;;  %vm1021_vm6 = vcmp.ge.s32.totalorder %v1018_v43, %v1020_v44 }
  0x78   : > { %s3360_s15 = sshll.u32 %s4155_s11, 3  ;;  %s969_s28 = scalar_lea.vmem %s4666_s25, %s4155_s11  ;;  %v1022_v47 = vsel %vm1021_vm6, 0.0, %v3892_v46  ;;  %v1060_v52 = vld [vmem:[%s3955_s14] sm:$0xff] }
  0x79   : > { %s962_s26 = scalar_lea.vmem %s4679_s5, %s3360_s15  ;;  %1054 = vmatpush.msra.mxu2 %v1030_v18  ;;  %v3605_v45 = vld [vmem:[%s969_s28] ss:$0 sm:$0xff]  ;;  %s4616_s16 = smov 56   ;;  %1150 = vmatpush.msra.mxu3 %v1060_v52 }
  0x7a   : > { %s4165_s1 = scalar_lea.vmem %s4680_s29, %s4155_s11  ;;  %v973_v0 = vld [vmem:[%s962_s26] sm:$0xff]  ;;  %v3637_v5 = vpop.eup %3636  ;;  %v4199_v48 = vadd.f32 %v3605_v45, %v1022_v47  ;;  %s4618_s18 = smov 80  }
  0x7b   : > { %v974_v1 = vld [vmem:[%s4681_s9] sm:$0xff]  ;;  %v983_v6 = vmul.f32 32.0, %v3637_v5  ;;  %vm987_vm1 = vweird.f32 %v3637_v5  ;;  %1055 = vmatpush.msra.mxu2 %v1029_v19  ;;  %s4630_s7 = smov 104   ;;  %s4626_s26 = smov 120  }
  0x7c   : > { %v975_v2 = vadd.f32 %v974_v1, %v973_v0  ;;  %s4628_s28 = smov 112   ;;  %s4683_s21 = sld [smem:[#allocation15_spill]] }
  0x7d   : > { %v984_v7 = vsub.f32 1.0, %v983_v6  ;;  %v3607_v29 = vld [vmem:[%s4682_s13] ss:$0 sm:$0xff]  ;;  %s4684_s11 = sld [smem:[#allocation20_spill]]  ;;  %s4710_s27 = smov 104  }
  0x7e   : > { %v979_v3 = vsel %vm978_vm0, %v975_v2, 0.0  ;;  %s4698_s5 = sld [smem:[#allocation25_spill]]  ;;  %s4711_s29 = smov 112  }
  0x7f   : > { %980 = vadd.xlane.f32.xlu0 %v979_v3  ;;  %v985_v8 = vmul.f32 %v3637_v5, %v984_v7  ;;  %s4699_s9 = sld [smem:[#allocation26_spill]] }
  0x80   : > { %s4700_s13 = sld [smem:[#allocation28_spill]] }
  0x81   : > { %v986_v9 = vadd.f32 %v3637_v5, %v985_v8 }
  0x83   : > { %v4169_v10 = vsel %vm987_vm1, %v3637_v5, %v986_v9  ;;  %v1061_v9 = vld [vmem:[%s3955_s14 + $0x8] sm:$0xff] }
  0xf2   : > { %v981_v11 = vpop.xlane.xlu0 %980 }
  0xf3   : > { %v989_v12 = vmul.f32 %v4169_v10, %v981_v11 }
  0xf5   : > { %v990_v13 = vsub.f32 %v975_v2, %v989_v12 }
  0xf7   : > { %v991_v14 = vmul.f32 %v990_v13, %v990_v13 }
  0xf9   : > { %v992_v15 = vsel %vm978_vm0, %v991_v14, 0.0 }
  0xfa   : > { %993 = vadd.xlane.f32.xlu0 %v992_v15 }
 0x16d   : > { %v994_v20 = vpop.xlane.xlu0 %993 }
 0x16e   : > { %v995_v21 = vmul.f32 %v994_v20, %v4169_v10 }
 0x170   : > { %v996_v22 = vadd.f32 1e-05, %v995_v21 }
 0x172   : > { %3638 = vrsqrt.f32 %v996_v22  ;;  %vm1003_vm3 = vweird.f32 %v996_v22 }
 0x178   : > { %v3639_v23 = vpop.eup %3638 }
 0x179   : > { %v998_v24 = vmul.f32 %v3639_v23, %v996_v22  ;;  %vm1004_vm2 = vweird.f32 %v3639_v23 }
 0x17a   : > { %vm1005_vm4 = vmor %vm1003_vm3, %vm1004_vm2  ;;  %vm2003_vm3 = vcmask 523264  }
 0x17b   : > { %v999_v25 = vmul.f32 %v3639_v23, %v998_v24 }
 0x17d   : > { %v1000_v26 = vmul.f32 0.5, %v999_v25 }
 0x17f   : > { %v1001_v27 = vsub.f32 1.5, %v1000_v26 }
 0x181   : > { %v1002_v28 = vmul.f32 %v3639_v23, %v1001_v27 }
 0x183   : > { %v1006_v30 = vsel %vm1005_vm4, %v3639_v23, %v1002_v28 }
 0x184   : > { %v1007_v31 = vmul.f32 %v1006_v30, %v990_v13 }
 0x186   : > { %v1011_v33 = vmul.f32 %v3607_v29, %v1007_v31 }
 0x188   : > { %v4179_v34 = vadd.f32 %v3608_v32, %v1011_v33 }
 0x18a   : > { %3362 = vmatmul.msk.f32.vlgmr.msra.gmra.mxu2 %vm978_vm0, %v4179_v34 }
 0x20d   : > { %v1057_v36 = vpop.f32.mrf.mxu2 }
 0x20e   : > { %v4184_v37 = vadd.f32 %v3609_v35, %v1057_v36 }
 0x210   : > { %1161 = vrot.lane.b32.xlu0 %v4184_v37, %s4624_s2  ;;  %1106 = vrot.lane.b32.xlu2 %v4184_v37, %s4617_s23  ;;  %v1065_v41 = vmul.f32 0.35355338, %v4184_v37  ;;  %s4620_s23 = smov 48  }
 0x211   : > { %1067 = vrot.lane.b32.xlu1 %v4184_v37, %s4632_s22 }
 0x26a   : > { %v1107_v38 = vpop.permute.xlu2 %1106 }
 0x26b   : > { %1127 = vmatpush.msrb.mxu2 %v1107_v38 }
 0x282   : > { %v1162_v39 = vpop.permute.xlu0 %1161 }
 0x283   : > { %v1068_v40 = vpop.permute.xlu1 %1067  ;;  %3367 = vmatpush.xpose.msk.msra.mxu2 %vm1069_vm5, %v1162_v39 }
 0x284   : > { %3363 = vmatpush.xpose.msk.msra.mxu1 %vm1069_vm5, %v1068_v40 }
 0x287   : > { %3364 = vmatmul.msk.f32.vlgmr.msra.gmra.mxu1 %vm1069_vm5, %v1065_v41 }
 0x288   : > { %1242 = vmatpush.msrb.mxu1 %v1061_v9 }
 0x304   : > { %v1092_v49 = vpop.f32.mrf.mxu1 }
 0x305   : > { %v1093_v50 = vadd.f32 %v1092_v49, %v4199_v48  ;;  %v1063_v49 = vld [vmem:[%s3955_s14 + $0x18] sm:$0xff] }
 0x307   : > { %v1095_v51 = vsel %vm1069_vm5, %v1093_v50, -inf }
 0x308   : > { %1096 = vmax.xlane.f32.xlu1 %v1095_v51 }
 0x321   : > { %1198 = vrot.lane.b32.xlu1 %v4184_v37, %s4616_s16  ;;  %s4622_s16 = smov 72  }
 0x329   : > { %1250 = vrot.lane.b32.xlu1 %v4184_v37, %s4618_s18  ;;  %s4621_s18 = smov 40  }
 0x331   : > { %1337 = vrot.lane.b32.xlu1 %v1065_v41, %s4630_s7 }
 0x37b   : > { %v1097_v53 = vpop.xlane.xlu1 %1096 }
 0x37c   : > { %v1098_v54 = vsub.f32 %v1093_v50, %v1097_v53 }
 0x37e   : > { %v1099_v55 = vmul.f32 1.442695, %v1098_v54 }
 0x380   : > { %3640 = vpow2.f32 %v1099_v55 }
 0x386   : > { %v3641_v56 = vpop.eup %3640 }
 0x387   : > { %v1101_v57 = vsel %vm1069_vm5, %v3641_v56, 0.0 }
 0x388   : > { %1102 = vadd.xlane.f32.xlu2 %v1101_v57 }
 0x393   : > { %v1199_v58 = vpop.permute.xlu1 %1198 }
 0x394   : > { %1219 = vmatpush.msrb.mxu3 %v1199_v58 }
 0x39b   : > { %v1251_v0 = vpop.permute.xlu1 %1250 }
 0x3a0   : > { %1159 = vrot.lane.b32.xlu2 %v1065_v41, %s4626_s26 }
 0x3a3   : > { %v1338_v18 = vpop.permute.xlu1 %1337 }
 0x3fb   : > { %v1103_v59 = vpop.xlane.xlu2 %1102 }
 0x3fc   : > { %3642 = vrcp.f32 %v1103_v59 }
 0x402   : > { %v3643_v60 = vpop.eup %3642 }
 0x403   : > { %v1105_v61 = vmul.f32 %v3643_v60, %v3641_v56  ;;  %v1160_v62 = vpop.permute.xlu2 %1159 }
 0x405   : > { %3365 = vmatmul.msk.f32.vlgmr.msrb.gmra.mxu2 %vm1069_vm5, %v1105_v61 }
 0x40d   : > { %3368 = vmatmul.msk.f32.vlgmr.msra.gmra.mxu2 %vm1069_vm5, %v1160_v62 }
 0x488   : > { %v1129_v63 = vpop.f32.mrf.mxu2 }
 0x489   : > { %3366 = vmatmul.msk.f32.vlgmr.msra.gmra.mxu3 %vm1069_vm5, %v1129_v63 }
 0x48a   : > { %3371 = vmatpush.xpose.msk.msra.mxu3 %vm1069_vm5, %v1251_v0  ;;  %v1493_v0 = vld [vmem:[%s3985_s20 + $0x18] sm:$0xff] }
 0x490   : > { %v1184_v1 = vpop.f32.mrf.mxu2 }
 0x491   : > { %v1185_v2 = vadd.f32 %v1184_v1, %v4199_v48  ;;  %v1492_v1 = vld [vmem:[%s3985_s20 + $0x10] sm:$0xff] }
 0x493   : > { %v1187_v3 = vsel %vm1069_vm5, %v1185_v2, -inf }
 0x494   : > { %1188 = vmax.xlane.f32.xlu0 %v1187_v3 }
 0x4a8   : > { %1248 = vrot.lane.b32.xlu0 %v1065_v41, %s4628_s28 }
 0x507   : > { %v1189_v4 = vpop.xlane.xlu0 %1188 }
 0x508   : > { %v1190_v5 = vsub.f32 %v1185_v2, %v1189_v4  ;;  %v1490_v2 = vld [vmem:[%s3985_s20] sm:$0xff]  ;;  %v1462_v4 = vld [vmem:[%s3975_s6 + $0x18] sm:$0xff] }
 0x50a   : > { %v1191_v6 = vmul.f32 1.442695, %v1190_v5  ;;  %v1461_v5 = vld [vmem:[%s3975_s6 + $0x10] sm:$0xff] }
 0x50c   : > { %3644 = vpow2.f32 %v1191_v6  ;;  %v1152_v16 = vpop.f32.mrf.mxu3  ;;  %v1460_v6 = vld [vmem:[%s3975_s6 + $0x8] sm:$0xff] }
 0x512   : > { %v3645_v7 = vpop.eup %3644 }
 0x513   : > { %v1193_v8 = vsel %vm1069_vm5, %v3645_v7, 0.0 }
 0x514   : > { %1194 = vadd.xlane.f32.xlu2 %v1193_v8 }
 0x51a   : > { %v1249_v15 = vpop.permute.xlu0 %1248 }
 0x52c   : > { %1339 = vrot.lane.b32.xlu2 %v4184_v37, %s4622_s16  ;;  %s4688_s16 = sld [smem:[#allocation21_spill]] }
 0x587   : > { %v1195_v11 = vpop.xlane.xlu2 %1194 }
 0x588   : > { %3646 = vrcp.f32 %v1195_v11 }
 0x58e   : > { %v3647_v12 = vpop.eup %3646 }
 0x58f   : > { %v1340_v13 = vpop.permute.xlu2 %1339  ;;  %v1197_v14 = vmul.f32 %v3647_v12, %v3645_v7  ;;  %v1459_v7 = vld [vmem:[%s3975_s6] sm:$0xff] }
 0x590   : > { %3375 = vmatpush.xpose.msk.msra.mxu1 %vm1069_vm5, %v1340_v13 }
 0x591   : > { %3369 = vmatmul.msk.f32.vlgmr.msrb.gmra.mxu3 %vm1069_vm5, %v1197_v14 }
 0x592   : > { %1331 = vmatpush.msrb.mxu3 %v1062_v42 }
 0x599   : > { %3372 = vmatmul.msk.f32.vlgmr.msra.gmra.mxu3 %vm1069_vm5, %v1249_v15 }
 0x59a   : > { %1482 = vmatpush.msra.mxu3 %v1462_v4 }
 0x59c   : > { %1483 = vmatpush.msra.mxu3 %v1461_v5 }
 0x59e   : > { %1484 = vmatpush.msra.mxu3 %v1460_v6 }
 0x5a0   : > { %1485 = vmatpush.msra.mxu3 %v1459_v7 }
 0x614   : > { %v1221_v17 = vpop.f32.mrf.mxu3 }
 0x615   : > { %3370 = vmatmul.msk.f32.vlgmr.msrb.gmra.mxu1 %vm1069_vm5, %v1221_v17 }
 0x61c   : > { %v1273_v19 = vpop.f32.mrf.mxu3 }
 0x61d   : > { %v1274_v20 = vadd.f32 %v1273_v19, %v4199_v48  ;;  %3376 = vmatmul.msk.f32.vlgmr.msra.gmra.mxu1 %vm1069_vm5, %v1338_v18  ;;  %v3611_v18 = vld [vmem:[%s3965_s24] ss:$0 sm:$0xff] }
 0x61f   : > { %v1276_v21 = vsel %vm1069_vm5, %v1274_v20, -inf }
 0x620   : > { %1277 = vmax.xlane.f32.xlu1 %v1276_v21  ;;  %v3612_v21 = vld [vmem:[%s4684_s11] ss:$0 sm:$0xff] }
 0x692   : > { %v1244_v22 = vpop.f32.mrf.mxu1 }
 0x693   : > { %v1278_v23 = vpop.xlane.xlu1 %1277 }
 0x694   : > { %v1279_v24 = vsub.f32 %v1274_v20, %v1278_v23 }
 0x696   : > { %v1280_v25 = vmul.f32 1.442695, %v1279_v24 }
 0x698   : > { %3648 = vpow2.f32 %v1280_v25 }
 0x69a   : > { %v1362_v26 = vpop.f32.mrf.mxu1 }
 0x69b   : > { %v1363_v27 = vadd.f32 %v1362_v26, %v4199_v48 }
 0x69d   : > { %v1365_v28 = vsel %vm1069_vm5, %v1363_v27, -inf }
 0x69e   : > { %v3649_v29 = vpop.eup %3648  ;;  %1366 = vmax.xlane.f32.xlu0 %v1365_v28 }
 0x69f   : > { %v1282_v30 = vsel %vm1069_vm5, %v3649_v29, 0.0 }
 0x6a0   : > { %1283 = vadd.xlane.f32.xlu2 %v1282_v30 }
 0x6b2   : > { %1287 = vrot.lane.b32.xlu0 %v4184_v37, %s4620_s23  ;;  %s966_s23 = scalar_lea.vmem %s4683_s21, %s3360_s15  ;;  %s4686_s15 = sld [smem:[#allocation22_spill]] }
 0x6b3   : > { %v4255_v3 = vld [vmem:[%s966_s23] sm:$0xff] }
 0x6b8   : > { %s4687_s23 = smov %s4686_s15  ;;  %v3613_v24 = vld [vmem:[%s4686_s15] ss:$0 sm:$0xff]  ;;  %s4691_s15 = smov 88  }
 0x711   : > { %v1367_v31 = vpop.xlane.xlu0 %1366 }
 0x712   : > { %v1368_v32 = vsub.f32 %v1363_v27, %v1367_v31  ;;  %v3614_v27 = vld [vmem:[%s4688_s16] ss:$0 sm:$0xff] }
 0x713   : > { %v1284_v35 = vpop.xlane.xlu2 %1283 }
 0x714   : > { %v1369_v33 = vmul.f32 1.442695, %v1368_v32 }
 0x716   : > { %3650 = vpow2.f32 %v1369_v33  ;;  %v4283_v33 = vld [vmem:[%s4165_s1] ss:$0 sm:$0xff] }
 0x717   : > { %3652 = vrcp.f32 %v1284_v35 }
 0x71c   : > { %v3651_v36 = vpop.eup %3650 }
 0x71d   : > { %v1371_v38 = vsel %vm1069_vm5, %v3651_v36, 0.0  ;;  %v3653_v39 = vpop.eup %3652 }
 0x71e   : > { %1372 = vadd.xlane.f32.xlu1 %v1371_v38  ;;  %v1286_v40 = vmul.f32 %v3653_v39, %v3649_v29 }
 0x724   : > { %v1288_v41 = vpop.permute.xlu0 %1287 }
 0x725   : > { %1308 = vmatpush.msrb.mxu2 %v1288_v41 }
 0x726   : > { %3373 = vmatmul.msk.f32.vlgmr.msrb.gmra.mxu2 %vm1069_vm5, %v1286_v40 }
 0x727   : > { %1420 = vmatpush.msra.mxu2 %v1063_v49 }
 0x737   : > { %1376 = vrot.lane.b32.xlu1 %v4184_v37, %s4621_s18  ;;  %v3610_v37 = vld [vmem:[%s3960_s19] ss:$0 sm:$0xff]  ;;  %s4685_s18 = smov %s4684_s11  ;;  %s4689_s11 = sld [smem:[#allocation23_spill]] }
 0x738   : > { %v1158_v51 = vadd.f32 %v3610_v37, %v1152_v16 }
 0x73a   : > { %v1247_v53 = vadd.f32 %v1244_v22, %v1158_v51 }
 0x73d   : > { %s4690_s2 = smov %s4689_s11 }
 0x791   : > { %v1373_v43 = vpop.xlane.xlu1 %1372 }
 0x792   : > { %3654 = vrcp.f32 %v1373_v43 }
 0x798   : > { %v3655_v44 = vpop.eup %3654 }
 0x799   : > { %v1375_v45 = vmul.f32 %v3655_v44, %v3651_v36 }
 0x7a9   : > { %v1310_v46 = vpop.f32.mrf.mxu2  ;;  %v1377_v47 = vpop.permute.xlu1 %1376 }
 0x7aa   : > { %3374 = vmatmul.msk.f32.vlgmr.msrb.gmra.mxu3 %vm1069_vm5, %v1310_v46  ;;  %1397 = vmatpush.msrb.mxu1 %v1377_v47  ;;  %v1521_v47 = vld [vmem:[%s4689_s11] sm:$0xff]  ;;  %s4692_s11 = sld [smem:[#allocation24_spill]] }
 0x7ab   : > { %3377 = vmatmul.msk.f32.vlgmr.msrb.gmra.mxu1 %vm1069_vm5, %v1375_v45 }
 0x7ac   : > { %1513 = vmatpush.msra.mxu1 %v1493_v0 }
 0x7ae   : > { %1514 = vmatpush.msra.mxu1 %v1492_v1 }
 0x828   : > { %v1399_v50 = vpop.f32.mrf.mxu1 }
 0x829   : > { %3378 = vmatmul.msk.f32.vlgmr.msra.gmra.mxu2 %vm1069_vm5, %v1399_v50 }
 0x82d   : > { %v1333_v52 = vpop.f32.mrf.mxu3 }
 0x82e   : > { %v1336_v54 = vadd.f32 %v1333_v52, %v1247_v53 }
 0x8ac   : > { %v1422_v55 = vpop.f32.mrf.mxu2 }
 0x8ad   : > { %v1425_v56 = vadd.f32 %v1422_v55, %v1336_v54 }
 0x8af   : > { %v1426_v57 = vadd.f32 %v1425_v56, %v4179_v34  ;;  %v1491_v34 = vld [vmem:[%s3985_s20 + $0x8] sm:$0xff] }
 0x8b0   : > { %1515 = vmatpush.msra.mxu1 %v1491_v34 }
 0x8b1   : > { %v1429_v58 = vsel %vm978_vm0, %v1426_v57, 0.0 }
 0x8b2   : > { %1430 = vadd.xlane.f32.xlu2 %v1429_v58  ;;  %1516 = vmatpush.msra.mxu1 %v1490_v2 }
 0x8b3   : > { %3380 = vmatmul.msk.f32.vlgmr.msra.gmra.mxu1 %vm978_vm0, %v4255_v3 }
 0x925   : > { %v1431_v59 = vpop.xlane.xlu2 %1430 }
 0x926   : > { %v1432_v60 = vmul.f32 %v1431_v59, %v4169_v10 }
 0x928   : > { %v1433_v61 = vsub.f32 %v1426_v57, %v1432_v60 }
 0x92a   : > { %v1434_v62 = vmul.f32 %v1433_v61, %v1433_v61 }
 0x92c   : > { %v1435_v63 = vsel %vm978_vm0, %v1434_v62, 0.0 }
 0x92d   : > { %1436 = vadd.xlane.f32.xlu2 %v1435_v63  ;;  %v1522_v63 = vld [vmem:[%s4690_s2 + $0x8] sm:$0xff] }
 0x930   : > { %v1518_v25 = vpop.f32.mrf.mxu1 }
 0x931   : > { %v4271_v26 = vadd.f32 %v3613_v24, %v1518_v25 }
 0x933   : > { %1622 = vrot.lane.b32.xlu0 %v4271_v26, %s4626_s26  ;;  %3381 = vmatpush.xpose.msk.msrb.mxu3 %vm1069_vm5, %v4271_v26 }
 0x9a0   : > { %v1437_v8 = vpop.xlane.xlu2 %1436 }
 0x9a1   : > { %v1438_v9 = vmul.f32 %v1437_v8, %v4169_v10  ;;  %v3615_v8 = vld [vmem:[%s4692_s11] ss:$0 sm:$0xff] }
 0x9a3   : > { %v1439_v11 = vadd.f32 1e-05, %v1438_v9 }
 0x9a5   : > { %3656 = vrsqrt.f32 %v1439_v11  ;;  %vm1446_vm8 = vweird.f32 %v1439_v11  ;;  %v1623_v31 = vpop.permute.xlu0 %1622 }
 0x9a6   : > { %3385 = vmatpush.xpose.msk.msrb.mxu1 %vm1069_vm5, %v1623_v31 }
 0x9ab   : > { %v3657_v12 = vpop.eup %3656 }
 0x9ac   : > { %v1441_v13 = vmul.f32 %v3657_v12, %v1439_v11  ;;  %vm1447_vm7 = vweird.f32 %v3657_v12 }
 0x9ad   : > { %vm1448_vm9 = vmor %vm1446_vm8, %vm1447_vm7 }
 0x9ae   : > { %v1442_v14 = vmul.f32 %v3657_v12, %v1441_v13 }
 0x9b0   : > { %v1443_v15 = vmul.f32 0.5, %v1442_v14 }
 0x9b2   : > { %v1444_v16 = vsub.f32 1.5, %v1443_v15 }
 0x9b4   : > { %v1445_v17 = vmul.f32 %v3657_v12, %v1444_v16 }
 0x9b6   : > { %v1449_v19 = vsel %vm1448_vm9, %v3657_v12, %v1445_v17 }
 0x9b7   : > { %v1450_v20 = vmul.f32 %v1449_v19, %v1433_v61 }
 0x9b9   : > { %v1454_v22 = vmul.f32 %v3611_v18, %v1450_v20 }
 0x9bb   : > { %v4266_v23 = vadd.f32 %v3612_v21, %v1454_v22 }
 0x9bd   : > { %3379 = vmatmul.msk.f32.vlgmr.msra.gmra.mxu3 %vm978_vm0, %v4266_v23 }
 0x9be   : > { %1611 = vmatpush.msra.mxu3 %v1521_v47 }
 0xa40   : > { %v1487_v28 = vpop.f32.mrf.mxu3 }
 0xa41   : > { %v1488_v29 = vadd.f32 %v3614_v27, %v1487_v28 }
 0xa43   : > { %v1526_v30 = vmul.f32 0.35355338, %v1488_v29 }
 0xa45   : > { %1620 = vrot.lane.b32.xlu2 %v1526_v30, %s4626_s26  ;;  %3382 = vmatmul.msk.f32.vlgmr.msrb.gmra.mxu3 %vm1069_vm5, %v1526_v30  ;;  %s4693_s26 = smov %s4692_s11  ;;  %s4695_s11 = smov 80  }
 0xa9f   : > { %v1621_v32 = vpop.permute.xlu2 %1620 }
 0xaa0   : > { %3386 = vmatmul.msk.f32.vlgmr.msrb.gmra.mxu1 %vm1069_vm5, %v1621_v32 }
 0xac8   : > { %v1553_v35 = vpop.f32.mrf.mxu3 }
 0xac9   : > { %v1554_v36 = vadd.f32 %v4283_v33, %v1553_v35 }
 0xacb   : > { %v1556_v38 = vsel %vm1069_vm5, %v1554_v36, -inf }
 0xacc   : > { %1557 = vmax.xlane.f32.xlu1 %v1556_v38 }
 0xb1d   : > { %v1645_v39 = vpop.f32.mrf.mxu1 }
 0xb1e   : > { %v1646_v40 = vadd.f32 %v4283_v33, %v1645_v39  ;;  %v1523_v39 = vld [vmem:[%s4690_s2 + $0x10] sm:$0xff] }
 0xb1f   : > { %1792 = vmatpush.msra.mxu0 %v1523_v39 }
 0xb20   : > { %v1648_v41 = vsel %vm1069_vm5, %v1646_v40, -inf }
 0xb21   : > { %1649 = vmax.xlane.f32.xlu0 %v1648_v41 }
 0xb35   : > { %1567 = vrot.lane.b32.xlu0 %v4271_v26, %s4632_s22 }
 0xb3d   : > { %1798 = vrot.lane.b32.xlu0 %v1526_v30, %s4630_s7 }
 0xb3f   : > { %v1558_v42 = vpop.xlane.xlu1 %1557 }
 0xb40   : > { %v1559_v43 = vsub.f32 %v1554_v36, %v1558_v42 }
 0xb42   : > { %v1560_v44 = vmul.f32 1.442695, %v1559_v43 }
 0xb44   : > { %3658 = vpow2.f32 %v1560_v44 }
 0xb45   : > { %1711 = vrot.lane.b32.xlu0 %v4271_v26, %s4628_s28 }
 0xb4a   : > { %v3659_v45 = vpop.eup %3658 }
 0xb4b   : > { %v1562_v46 = vsel %vm1069_vm5, %v3659_v45, 0.0 }
 0xb4c   : > { %1563 = vadd.xlane.f32.xlu2 %v1562_v46 }
 0xb64   : > { %1800 = vrot.lane.b32.xlu2 %v4271_v26, %s4630_s7  ;;  %s4696_s7 = sld [smem:[#allocation27_spill]] }
 0xb6a   : > { %s4697_s22 = smov %s4696_s7 }
 0xb94   : > { %v1650_v49 = vpop.xlane.xlu0 %1649 }
 0xb95   : > { %v1651_v50 = vsub.f32 %v1646_v40, %v1650_v49  ;;  %v1524_v40 = vld [vmem:[%s4690_s2 + $0x18] sm:$0xff] }
 0xb97   : > { %v1652_v37 = vmul.f32 1.442695, %v1651_v50 }
 0xb99   : > { %3660 = vpow2.f32 %v1652_v37 }
 0xb9f   : > { %v3661_v51 = vpop.eup %3660 }
 0xba0   : > { %v1654_v52 = vsel %vm1069_vm5, %v3661_v51, 0.0 }
 0xba1   : > { %1655 = vadd.xlane.f32.xlu1 %v1654_v52 }
 0xba7   : > { %v1568_v53 = vpop.permute.xlu0 %1567 }
 0xba8   : > { %1588 = vmatpush.msrb.mxu2 %v1568_v53  ;;  %v1923_v53 = vld [vmem:[%s4696_s7 + $0x18] sm:$0xff]  ;;  %s4701_s7 = sld [smem:[#allocation29_spill]] }
 0xba9   : > { %1943 = vmatpush.msrb.mxu0 %v1923_v53 }
 0xbae   : > { %s4702_s17 = smov %s4701_s7 }
 0xbaf   : > { %v1799_v54 = vpop.permute.xlu0 %1798 }
 0xbb7   : > { %v1712_v55 = vpop.permute.xlu0 %1711 }
 0xbb8   : > { %3389 = vmatpush.xpose.msk.msrb.mxu3 %vm1069_vm5, %v1712_v55  ;;  %v1921_v55 = vld [vmem:[%s4697_s22 + $0x8] sm:$0xff] }
 0xbba   : > { %1659 = vrot.lane.b32.xlu1 %v4271_v26, %s4691_s15 }
 0xbbf   : > { %v1564_v56 = vpop.xlane.xlu2 %1563 }
 0xbc0   : > { %3662 = vrcp.f32 %v1564_v56  ;;  %v1920_v56 = vld [vmem:[%s4697_s22] sm:$0xff] }
 0xbc2   : > { %1709 = vrot.lane.b32.xlu1 %v1526_v30, %s4628_s28  ;;  %s4694_s28 = smov 72  }
 0xbc6   : > { %v3663_v57 = vpop.eup %3662 }
 0xbc7   : > { %v1566_v58 = vmul.f32 %v3663_v57, %v3659_v45  ;;  %v1801_v0 = vpop.permute.xlu2 %1800 }
 0xbc9   : > { %3383 = vmatmul.msk.f32.vlgmr.msrb.gmra.mxu2 %vm1069_vm5, %v1566_v58 }
 0xc14   : > { %v1656_v59 = vpop.xlane.xlu1 %1655 }
 0xc15   : > { %3664 = vrcp.f32 %v1656_v59 }
 0xc1b   : > { %v3665_v60 = vpop.eup %3664 }
 0xc1c   : > { %v1658_v61 = vmul.f32 %v3665_v60, %v3661_v51 }
 0xc2c   : > { %v1660_v62 = vpop.permute.xlu1 %1659 }
 0xc2d   : > { %1680 = vmatpush.msra.mxu2 %v1660_v62 }
 0xc2e   : > { %3387 = vmatmul.msk.f32.vlgmr.msra.gmra.mxu2 %vm1069_vm5, %v1658_v61 }
 0xc2f   : > { %1703 = vmatpush.msrb.mxu2 %v1522_v63 }
 0xc31   : > { %3393 = vmatpush.xpose.msk.msra.mxu2 %vm1069_vm5, %v1801_v0 }
 0xc34   : > { %v1710_v34 = vpop.permute.xlu1 %1709 }
 0xc4c   : > { %v1590_v1 = vpop.f32.mrf.mxu2 }
 0xc4d   : > { %3384 = vmatmul.msk.f32.vlgmr.msra.gmra.mxu3 %vm1069_vm5, %v1590_v1  ;;  %v3616_v1 = vld [vmem:[%s4698_s5] ss:$0 sm:$0xff] }
 0xc55   : > { %3390 = vmatmul.msk.f32.vlgmr.msrb.gmra.mxu3 %vm1069_vm5, %v1710_v34 }
 0xcb1   : > { %v1682_v2 = vpop.f32.mrf.mxu2 }
 0xcb2   : > { %3388 = vmatmul.msk.f32.vlgmr.msrb.gmra.mxu2 %vm1069_vm5, %v1682_v2 }
 0xcba   : > { %3394 = vmatmul.msk.f32.vlgmr.msra.gmra.mxu2 %vm1069_vm5, %v1799_v54  ;;  %v1922_v54 = vld [vmem:[%s4697_s22 + $0x10] sm:$0xff] }
 0xcbb   : > { %1944 = vmatpush.msrb.mxu0 %v1922_v54 }
 0xcbd   : > { %1945 = vmatpush.msrb.mxu0 %v1921_v55 }
 0xcbf   : > { %1946 = vmatpush.msrb.mxu0 %v1920_v56 }
 0xcd0   : > { %v1613_v4 = vpop.f32.mrf.mxu3 }
 0xcd1   : > { %v1619_v9 = vadd.f32 %v3615_v8, %v1613_v4  ;;  %v3617_v4 = vld [vmem:[%s4699_s9] ss:$0 sm:$0xff] }
 0xcd8   : > { %v1734_v5 = vpop.f32.mrf.mxu3 }
 0xcd9   : > { %v1735_v6 = vadd.f32 %v4283_v33, %v1734_v5 }
 0xcdb   : > { %v1737_v7 = vsel %vm1069_vm5, %v1735_v6, -inf }
 0xcdc   : > { %1738 = vmax.xlane.f32.xlu1 %v1737_v7  ;;  %v3618_v7 = vld [vmem:[%s4700_s13] ss:$0 sm:$0xff] }
 0xcf5   : > { %1837 = vrot.lane.b32.xlu1 %v4271_v26, %s4694_s28 }
 0xd35   : > { %v1705_v11 = vpop.f32.mrf.mxu2 }
 0xd36   : > { %v1708_v12 = vadd.f32 %v1705_v11, %v1619_v9 }
 0xd3d   : > { %v1823_v13 = vpop.f32.mrf.mxu2 }
 0xd3e   : > { %v1824_v14 = vadd.f32 %v4283_v33, %v1823_v13 }
 0xd40   : > { %v1826_v15 = vsel %vm1069_vm5, %v1824_v14, -inf }
 0xd41   : > { %1827 = vmax.xlane.f32.xlu0 %v1826_v15  ;;  %v1998_v15 = vld [vmem:[%s4701_s7 + $0x38] sm:$0xff]  ;;  %s4703_s7 = sld [smem:[#allocation30_spill]] }
 0xd42   : > { %2015 = vmatpush.msrb.mxu2 %v1998_v15 }
 0xd47   : > { %s4704_s21 = smov %s4703_s7 }
 0xd4f   : > { %v1739_v16 = vpop.xlane.xlu1 %1738 }
 0xd50   : > { %v1740_v17 = vsub.f32 %v1735_v6, %v1739_v16  ;;  %v1997_v16 = vld [vmem:[%s4702_s17 + $0x30] sm:$0xff] }
 0xd51   : > { %2016 = vmatpush.msrb.mxu2 %v1997_v16 }
 0xd52   : > { %v1741_v18 = vmul.f32 1.442695, %v1740_v17  ;;  %v1996_v17 = vld [vmem:[%s4702_s17 + $0x28] sm:$0xff] }
 0xd53   : > { %2017 = vmatpush.msrb.mxu2 %v1996_v17 }
 0xd54   : > { %3666 = vpow2.f32 %v1741_v18  ;;  %v1995_v18 = vld [vmem:[%s4702_s17 + $0x20] sm:$0xff] }
 0xd55   : > { %2018 = vmatpush.msrb.mxu2 %v1995_v18 }
 0xd5a   : > { %v3667_v19 = vpop.eup %3666 }
 0xd5b   : > { %v1743_v20 = vsel %vm1069_vm5, %v3667_v19, 0.0 }
 0xd5c   : > { %1744 = vadd.xlane.f32.xlu0 %v1743_v20  ;;  %v1994_v20 = vld [vmem:[%s4702_s17 + $0x18] sm:$0xff] }
 0xd5d   : > { %2019 = vmatpush.msrb.mxu2 %v1994_v20  ;;  %v3621_v20 = vld [vmem:[%s4040_s12] ss:$0 sm:$0xff] }
 0xd67   : > { %v1838_v21 = vpop.permute.xlu1 %1837 }
 0xd68   : > { %1858 = vmatpush.msra.mxu3 %v1838_v21 }
 0xdb4   : > { %v1828_v22 = vpop.xlane.xlu0 %1827 }
 0xdb5   : > { %v1829_v24 = vsub.f32 %v1824_v14, %v1828_v22  ;;  %v1993_v22 = vld [vmem:[%s4702_s17 + $0x10] sm:$0xff] }
 0xdb6   : > { %2020 = vmatpush.msrb.mxu2 %v1993_v22 }
 0xdb7   : > { %v1830_v25 = vmul.f32 1.442695, %v1829_v24 }
 0xdb9   : > { %3668 = vpow2.f32 %v1830_v25 }
 0xdbf   : > { %v3669_v27 = vpop.eup %3668 }
 0xdc0   : > { %v1832_v28 = vsel %vm1069_vm5, %v3669_v27, 0.0 }
 0xdc1   : > { %1833 = vadd.xlane.f32.xlu2 %v1832_v28 }
 0xdcf   : > { %v1745_v29 = vpop.xlane.xlu0 %1744 }
 0xdd0   : > { %3670 = vrcp.f32 %v1745_v29 }
 0xdd6   : > { %v3671_v31 = vpop.eup %3670 }
 0xdd7   : > { %v1747_v35 = vmul.f32 %v3671_v31, %v3667_v19 }
 0xdd9   : > { %1748 = vrot.lane.b32.xlu2 %v4271_v26, %s4695_s11 }
 0xe34   : > { %v1834_v30 = vpop.xlane.xlu2 %1833 }
 0xe35   : > { %3672 = vrcp.f32 %v1834_v30  ;;  %v1991_v30 = vld [vmem:[%s4702_s17] sm:$0xff] }
 0xe3b   : > { %v3673_v32 = vpop.eup %3672 }
 0xe3c   : > { %v1836_v36 = vmul.f32 %v3673_v32, %v3669_v27  ;;  %v1749_v38 = vpop.permute.xlu2 %1748  ;;  %v1992_v27 = vld [vmem:[%s4702_s17 + $0x8] sm:$0xff] }
 0xe3d   : > { %1769 = vmatpush.msra.mxu1 %v1749_v38  ;;  %2021 = vmatpush.msrb.mxu2 %v1992_v27 }
 0xe3e   : > { %3391 = vmatmul.msk.f32.vlgmr.msra.gmra.mxu1 %vm1069_vm5, %v1747_v35  ;;  %3395 = vmatmul.msk.f32.vlgmr.msra.gmra.mxu3 %vm1069_vm5, %v1836_v36 }
 0xe3f   : > { %1881 = vmatpush.msrb.mxu1 %v1524_v40  ;;  %2022 = vmatpush.msrb.mxu2 %v1991_v30 }
 0xebb   : > { %v1771_v41 = vpop.f32.mrf.mxu1 }
 0xebc   : > { %3392 = vmatmul.msk.f32.vlgmr.msra.gmra.mxu0 %vm1069_vm5, %v1771_v41 }
 0xec1   : > { %v1860_v26 = vpop.f32.mrf.mxu3 }
 0xec2   : > { %3396 = vmatmul.msk.f32.vlgmr.msrb.gmra.mxu1 %vm1069_vm5, %v1860_v26 }
 0xf39   : > { %v1794_v42 = vpop.f32.mrf.mxu0 }
 0xf3a   : > { %v1797_v43 = vadd.f32 %v1794_v42, %v1708_v12 }
 0xf3f   : > { %v1883_v44 = vpop.f32.mrf.mxu1 }
 0xf40   : > { %v1886_v45 = vadd.f32 %v1883_v44, %v1797_v43 }
 0xf42   : > { %v1887_v46 = vadd.f32 %v1886_v45, %v4266_v23 }
 0xf44   : > { %v1890_v47 = vsel %vm978_vm0, %v1887_v46, 0.0 }
 0xf45   : > { %1891 = vadd.xlane.f32.xlu0 %v1890_v47 }
 0xfb8   : > { %v1892_v49 = vpop.xlane.xlu0 %1891 }
 0xfb9   : > { %v1893_v50 = vmul.f32 %v1892_v49, %v4169_v10 }
 0xfbb   : > { %v1894_v37 = vsub.f32 %v1887_v46, %v1893_v50 }
 0xfbd   : > { %v1895_v51 = vmul.f32 %v1894_v37, %v1894_v37 }
 0xfbf   : > { %v1896_v52 = vsel %vm978_vm0, %v1895_v51, 0.0 }
 0xfc0   : > { %1897 = vadd.xlane.f32.xlu0 %v1896_v52  ;;  %v3901_v52 = vmov -1.0  }
0x1033   : > { %v1898_v23 = vpop.xlane.xlu0 %1897 }
0x1034   : > { %v1899_v57 = vmul.f32 %v1898_v23, %v4169_v10 }
0x1036   : > { %v1900_v58 = vadd.f32 1e-05, %v1899_v57  ;;  %v3619_v57 = vld [vmem:[%s4703_s7] ss:$0 sm:$0xff]  ;;  %s4705_s7 = sld [smem:[#allocation31_spill]] }
0x1038   : > { %3674 = vrsqrt.f32 %v1900_v58  ;;  %vm1907_vm11 = vweird.f32 %v1900_v58 }
0x103c   : > { %s4706_s25 = smov %s4705_s7  ;;  %v3620_v17 = vld [vmem:[%s4705_s7] ss:$0 sm:$0xff]  ;;  %s4708_s7 = smov 120  }
0x103e   : > { %v3675_v59 = vpop.eup %3674 }
0x103f   : > { %v1902_v60 = vmul.f32 %v3675_v59, %v1900_v58  ;;  %vm1908_vm10 = vweird.f32 %v3675_v59 }
0x1040   : > { %vm1909_vm12 = vmor %vm1907_vm11, %vm1908_vm10 }
0x1041   : > { %v1903_v61 = vmul.f32 %v3675_v59, %v1902_v60 }
0x1043   : > { %v1904_v62 = vmul.f32 0.5, %v1903_v61 }
0x1045   : > { %v1905_v63 = vsub.f32 1.5, %v1904_v62 }
0x1047   : > { %v1906_v0 = vmul.f32 %v3675_v59, %v1905_v63 }
0x1049   : > { %v1910_v34 = vsel %vm1909_vm12, %v3675_v59, %v1906_v0 }
0x104a   : > { %v1911_v2 = vmul.f32 %v1910_v34, %v1894_v37 }
0x104c   : > { %v1915_v5 = vmul.f32 %v3616_v1, %v1911_v2  ;;  %v3402_v2 = vld [vmem:[%s4665_s3 + $0x38] sm:$0xff] }
0x104d   : > { %2085 = vmatpush.msrb.mxu3 %v3402_v2 }
0x104e   : > { %v4339_v6 = vadd.f32 %v3617_v4, %v1915_v5  ;;  %v3401_v4 = vld [vmem:[%s4665_s3 + $0x30] sm:$0xff]  ;;  %v3400_v5 = vld [vmem:[%s4665_s3 + $0x28] sm:$0xff] }
0x104f   : > { %2086 = vmatpush.msrb.mxu3 %v3401_v4 }
0x1050   : > { %3397 = vmatmul.msk.f32.vlgmr.msrb.gmra.mxu0 %vm978_vm0, %v4339_v6 }
0x1051   : > { %2087 = vmatpush.msrb.mxu3 %v3400_v5 }
0x10cd   : > { %v1948_v8 = vpop.f32.mrf.mxu0 }
0x10ce   : > { %v1949_v9 = vadd.f32 %v3618_v7, %v1948_v8  ;;  %v3399_v7 = vld [vmem:[%s4665_s3 + $0x20] sm:$0xff]  ;;  %s4707_s3 = smov 96  }
0x10cf   : > { %2088 = vmatpush.msrb.mxu3 %v3399_v7  ;;  %v3623_v7 = vld [vmem:[%s3960_s19 + $0x1] ss:$0 sm:$0xff] }
0x10d0   : > { %v1952_v11 = vmul.f32 0.70710677, %v1949_v9  ;;  %v1951_v55 = vmul.f32 0.5, %v1949_v9 }
0x10d2   : > { %v1955_v12 = vand.u32 2147483647, %v1952_v11  ;;  %vm1953_vm2 = vcmp.ge.f32.partialorder %v1952_v11, 0.0 }
0x10d3   : > { %v1954_v53 = vsel %vm1953_vm2, 1.0, %v3901_v52 }
0x10d4   : > { %v1956_v13 = vmul.f32 0.3275911, %v1955_v12  ;;  %v1982_v38 = vsub.f32 0.0, %v1955_v12 }
0x10d6   : > { %v1957_v14 = vadd.f32 1.0, %v1956_v13  ;;  %v1983_v41 = vmul.f32 %v1982_v38, %v1955_v12 }
0x10d8   : > { %3676 = vrcp.f32 %v1957_v14  ;;  %v1969_v25 = vand.u32 2147483648, %v1957_v14  ;;  %v1967_v29 = vand.u32 2147483647, %v1957_v14  ;;  %vm1963_vm14 = vweird.f32 %v1957_v14 }
0x10d9   : > { %v1984_v43 = vmul.f32 1.442695, %v1983_v41 }
0x10da   : > { %v1970_v32 = vor.u32 1.1754944e-38, %v1969_v25  ;;  %vm1968_vm1 = vcmp.eq.f32.partialorder %v1967_v29, 8.507059e+37 }
0x10db   : > { %3678 = vpow2.f32 %v1984_v43  ;;  %v3406_v43 = vld [vmem:[%s3955_s14 + $0x28] sm:$0xff] }
0x10dc   : > { %2276 = vmatpush.msra.mxu2 %v3406_v43 }
0x10de   : > { %v3677_v19 = vpop.eup %3676 }
0x10df   : > { %v1959_v21 = vmul.f32 %v3677_v19, %v1957_v14  ;;  %vm1964_vm13 = vweird.f32 %v3677_v19 }
0x10e0   : > { %vm1965_vm15 = vmor %vm1963_vm14, %vm1964_vm13 }
0x10e1   : > { %v1960_v24 = vsub.f32 1.0, %v1959_v21  ;;  %v3679_v50 = vpop.eup %3678 }
0x10e3   : > { %v1961_v28 = vmul.f32 %v3677_v19, %v1960_v24  ;;  %v3622_v24 = vld [vmem:[%s4664_s8 + $0x1] ss:$0 sm:$0xff]  ;;  %s4709_s8 = smov 64  }
0x10e5   : > { %v1962_v31 = vadd.f32 %v3677_v19, %v1961_v28 }
0x10e7   : > { %v1966_v35 = vsel %vm1965_vm15, %v3677_v19, %v1962_v31 }
0x10e8   : > { %v1971_v36 = vsel %vm1968_vm1, %v1970_v32, %v1966_v35 }
0x10e9   : > { %v1973_v39 = vmul.f32 1.0614054, %v1971_v36 }
0x10eb   : > { %v1974_v40 = vadd.f32 -1.4531521, %v1973_v39 }
0x10ed   : > { %v1975_v26 = vmul.f32 %v1974_v40, %v1971_v36 }
0x10ef   : > { %v1976_v42 = vadd.f32 1.4214138, %v1975_v26 }
0x10f1   : > { %v1977_v44 = vmul.f32 %v1976_v42, %v1971_v36 }
0x10f3   : > { %v1978_v45 = vadd.f32 -0.28449672, %v1977_v44 }
0x10f5   : > { %v1979_v46 = vmul.f32 %v1978_v45, %v1971_v36 }
0x10f7   : > { %v1980_v47 = vadd.f32 0.2548296, %v1979_v46 }
0x10f9   : > { %v1981_v49 = vmul.f32 %v1980_v47, %v1971_v36 }
0x10fb   : > { %v1986_v37 = vmul.f32 %v3679_v50, %v1981_v49 }
0x10fd   : > { %v1987_v51 = vsub.f32 1.0, %v1986_v37 }
0x10ff   : > { %v1988_v54 = vmul.f32 %v1987_v51, %v1954_v53 }
0x1101   : > { %v1989_v56 = vadd.f32 1.0, %v1988_v54 }
0x1103   : > { %v1990_v23 = vmul.f32 %v1989_v56, %v1951_v55 }
0x1105   : > { %3398 = vmatmul.msk.f32.vlgmr.msrb.gmra.mxu2 %vm2003_vm3, %v1990_v23  ;;  %v3405_v23 = vld [vmem:[%s3955_s14 + $0x20] sm:$0xff] }
0x1106   : > { %2184 = vmatpush.msra.mxu3 %v3405_v23  ;;  %v3429_v23 = vld [vmem:[%s3975_s6 + $0x28] sm:$0xff] }
0x1188   : > { %v2024_v58 = vpop.f32.mrf.mxu2 }
0x1189   : > { %v2025_v59 = vadd.f32 %v3619_v57, %v2024_v58 }
0x118b   : > { %v2027_v60 = vadd.f32 %v2025_v59, %v4339_v6 }
0x118d   : > { %v2030_v61 = vsel %vm978_vm0, %v2027_v60, 0.0 }
0x118e   : > { %2031 = vadd.xlane.f32.xlu0 %v2030_v61 }
0x1201   : > { %v2032_v62 = vpop.xlane.xlu0 %2031 }
0x1202   : > { %v2033_v63 = vmul.f32 %v2032_v62, %v4169_v10 }
0x1204   : > { %v2034_v0 = vsub.f32 %v2027_v60, %v2033_v63 }
0x1206   : > { %v2035_v1 = vmul.f32 %v2034_v0, %v2034_v0 }
0x1208   : > { %v2036_v34 = vsel %vm978_vm0, %v2035_v1, 0.0 }
0x1209   : > { %2037 = vadd.xlane.f32.xlu1 %v2036_v34 }
0x127c   : > { %v2038_v6 = vpop.xlane.xlu1 %2037 }
0x127d   : > { %v2039_v8 = vmul.f32 %v2038_v6, %v4169_v10 }
0x127f   : > { %v2040_v9 = vadd.f32 1e-05, %v2039_v8 }
0x1281   : > { %3680 = vrsqrt.f32 %v2040_v9  ;;  %vm2047_vm6 = vweird.f32 %v2040_v9 }
0x1287   : > { %v3681_v11 = vpop.eup %3680 }
0x1288   : > { %v2042_v12 = vmul.f32 %v3681_v11, %v2040_v9  ;;  %vm2048_vm4 = vweird.f32 %v3681_v11 }
0x1289   : > { %vm2049_vm7 = vmor %vm2047_vm6, %vm2048_vm4 }
0x128a   : > { %v2043_v13 = vmul.f32 %v3681_v11, %v2042_v12 }
0x128c   : > { %v2044_v14 = vmul.f32 0.5, %v2043_v13 }
0x128e   : > { %v2045_v15 = vsub.f32 1.5, %v2044_v14 }
0x1290   : > { %v2046_v16 = vmul.f32 %v3681_v11, %v2045_v15 }
0x1292   : > { %v2050_v18 = vsel %vm2049_vm7, %v3681_v11, %v2046_v16 }
0x1293   : > { %v2051_v19 = vmul.f32 %v2050_v18, %v2034_v0 }
0x1295   : > { %v2055_v21 = vmul.f32 %v3620_v17, %v2051_v19 }
0x1297   : > { %v4366_v22 = vadd.f32 %v3621_v20, %v2055_v21 }
0x1299   : > { %3404 = vmatmul.msk.f32.vlgmr.msrb.gmra.mxu3 %vm978_vm0, %v4366_v22 }
0x131c   : > { %v2090_v25 = vpop.f32.mrf.mxu3 }
0x131d   : > { %v4371_v27 = vadd.f32 %v3622_v24, %v2090_v25 }
0x131f   : > { %2195 = vrot.lane.b32.xlu0 %v4371_v27, %s4691_s15  ;;  %2102 = vrot.lane.b32.xlu2 %v4371_v27, %s4707_s3  ;;  %v2100_v28 = vmul.f32 0.35355338, %v4371_v27 }
0x1327   : > { %2193 = vrot.lane.b32.xlu2 %v2100_v28, %s4708_s7 }
0x1379   : > { %v2103_v29 = vpop.permute.xlu2 %2102 }
0x137a   : > { %3410 = vmatpush.xpose.msk.msra.mxu1 %vm1069_vm5, %v2103_v29 }
0x137d   : > { %3411 = vmatmul.msk.f32.vlgmr.msra.gmra.mxu1 %vm1069_vm5, %v2100_v28 }
0x1381   : > { %v2194_v31 = vpop.permute.xlu2 %2193 }
0x1391   : > { %v2196_v30 = vpop.permute.xlu0 %2195 }
0x1392   : > { %3414 = vmatpush.xpose.msk.msrb.mxu1 %vm1069_vm5, %v2196_v30 }
0x1395   : > { %3415 = vmatmul.msk.f32.vlgmr.msrb.gmra.mxu1 %vm1069_vm5, %v2194_v31 }
0x13fa   : > { %v2126_v32 = vpop.f32.mrf.mxu1 }
0x13fb   : > { %v2127_v35 = vadd.f32 %v2126_v32, %v4199_v48 }
0x13fd   : > { %v2129_v36 = vsel %vm1069_vm5, %v2127_v35, -inf }
0x13fe   : > { %2130 = vmax.xlane.f32.xlu2 %v2129_v36 }
0x1412   : > { %v2218_v38 = vpop.f32.mrf.mxu1 }
0x1413   : > { %v2219_v39 = vadd.f32 %v2218_v38, %v4199_v48  ;;  %v3408_v38 = vld [vmem:[%s3955_s14 + $0x38] sm:$0xff] }
0x1415   : > { %v2221_v40 = vsel %vm1069_vm5, %v2219_v39, -inf }
0x1416   : > { %2222 = vmax.xlane.f32.xlu0 %v2221_v40  ;;  %2140 = vrot.lane.b32.xlu2 %v4371_v27, %s4709_s8  ;;  %s4712_s8 = smov 56  }
0x141e   : > { %2371 = vrot.lane.b32.xlu2 %v2100_v28, %s4710_s27 }
0x142a   : > { %2373 = vrot.lane.b32.xlu0 %v4371_v27, %s4694_s28 }
0x1432   : > { %2282 = vrot.lane.b32.xlu0 %v2100_v28, %s4711_s29 }
0x1471   : > { %v2131_v41 = vpop.xlane.xlu2 %2130 }
0x1472   : > { %v2132_v26 = vsub.f32 %v2127_v35, %v2131_v41 }
0x1474   : > { %v2133_v42 = vmul.f32 1.442695, %v2132_v26 }
0x1476   : > { %3682 = vpow2.f32 %v2133_v42 }
0x1479   : > { %v2141_v44 = vpop.permute.xlu2 %2140 }
0x147a   : > { %2161 = vmatpush.msra.mxu0 %v2141_v44 }
0x147c   : > { %v3683_v45 = vpop.eup %3682 }
0x147d   : > { %v2135_v46 = vsel %vm1069_vm5, %v3683_v45, 0.0 }
0x147e   : > { %2136 = vadd.xlane.f32.xlu1 %v2135_v46 }
0x1481   : > { %v2372_v1 = vpop.permute.xlu2 %2371 }
0x1489   : > { %v2223_v47 = vpop.xlane.xlu0 %2222 }
0x148a   : > { %v2224_v49 = vsub.f32 %v2219_v39, %v2223_v47  ;;  %v3407_v39 = vld [vmem:[%s3955_s14 + $0x30] sm:$0xff] }
0x148c   : > { %v2225_v50 = vmul.f32 1.442695, %v2224_v49 }
0x148e   : > { %3684 = vpow2.f32 %v2225_v50 }
0x1494   : > { %v3685_v37 = vpop.eup %3684 }
0x1495   : > { %v2227_v51 = vsel %vm1069_vm5, %v3685_v37, 0.0 }
0x1496   : > { %2228 = vadd.xlane.f32.xlu1 %v2227_v51  ;;  %v3437_v51 = vld [vmem:[%s3985_s20 + $0x38] sm:$0xff] }
0x149c   : > { %v2374_v53 = vpop.permute.xlu0 %2373 }
0x149d   : > { %3422 = vmatpush.xpose.msk.msrb.mxu2 %vm1069_vm5, %v2374_v53  ;;  %v3436_v53 = vld [vmem:[%s3985_s20 + $0x30] sm:$0xff] }
0x14a4   : > { %v2283_v63 = vpop.permute.xlu0 %2282 }
0x14af   : > { %2232 = vrot.lane.b32.xlu1 %v4371_v27, %s4712_s8  ;;  %s4713_s8 = smov 40  }
0x14b7   : > { %2284 = vrot.lane.b32.xlu1 %v4371_v27, %s4695_s11 }
0x14f1   : > { %v2137_v54 = vpop.xlane.xlu1 %2136 }
0x14f2   : > { %3686 = vrcp.f32 %v2137_v54  ;;  %v3434_v54 = vld [vmem:[%s3985_s20 + $0x20] sm:$0xff] }
0x14f8   : > { %v3687_v55 = vpop.eup %3686 }
0x14f9   : > { %v2139_v56 = vmul.f32 %v3687_v55, %v3683_v45  ;;  %v3431_v55 = vld [vmem:[%s3975_s6 + $0x38] sm:$0xff] }
0x14fb   : > { %3412 = vmatmul.msk.f32.vlgmr.msra.gmra.mxu0 %vm1069_vm5, %v2139_v56  ;;  %v3430_v56 = vld [vmem:[%s3975_s6 + $0x30] sm:$0xff] }
0x1509   : > { %v2229_v57 = vpop.xlane.xlu1 %2228 }
0x150a   : > { %3688 = vrcp.f32 %v2229_v57  ;;  %v3428_v57 = vld [vmem:[%s3975_s6 + $0x20] sm:$0xff] }
0x1510   : > { %v3689_v58 = vpop.eup %3688 }
0x1511   : > { %v2231_v59 = vmul.f32 %v3689_v58, %v3685_v37 }
0x1521   : > { %v2233_v60 = vpop.permute.xlu1 %2232 }
0x1522   : > { %2253 = vmatpush.msrb.mxu0 %v2233_v60 }
0x1523   : > { %3416 = vmatmul.msk.f32.vlgmr.msrb.gmra.mxu0 %vm1069_vm5, %v2231_v59 }
0x1524   : > { %2365 = vmatpush.msra.mxu0 %v3407_v39 }
0x1526   : > { %2520 = vmatpush.msrb.mxu0 %v3431_v55 }
0x1528   : > { %2521 = vmatpush.msrb.mxu0 %v3430_v56 }
0x1529   : > { %v2285_v61 = vpop.permute.xlu1 %2284 }
0x152a   : > { %3418 = vmatpush.xpose.msk.msrb.mxu3 %vm1069_vm5, %v2285_v61  ;;  %2522 = vmatpush.msrb.mxu0 %v3429_v23 }
0x152c   : > { %2523 = vmatpush.msrb.mxu0 %v3428_v57 }
0x1578   : > { %v2163_v62 = vpop.f32.mrf.mxu0 }
0x1579   : > { %3413 = vmatmul.msk.f32.vlgmr.msra.gmra.mxu3 %vm1069_vm5, %v2163_v62 }
0x1581   : > { %3419 = vmatmul.msk.f32.vlgmr.msrb.gmra.mxu3 %vm1069_vm5, %v2283_v63 }
0x15a0   : > { %v2255_v0 = vpop.f32.mrf.mxu0 }
0x15a1   : > { %3417 = vmatmul.msk.f32.vlgmr.msra.gmra.mxu2 %vm1069_vm5, %v2255_v0 }
0x15a2   : > { %2550 = vmatpush.msra.mxu2 %v3437_v51 }
0x15a4   : > { %2551 = vmatpush.msra.mxu2 %v3436_v53 }
0x15a9   : > { %3423 = vmatmul.msk.f32.vlgmr.msrb.gmra.mxu2 %vm1069_vm5, %v2372_v1 }
0x15fc   : > { %v2186_v34 = vpop.f32.mrf.mxu3 }
0x15fd   : > { %v2192_v6 = vadd.f32 %v3623_v7, %v2186_v34  ;;  %v3624_v34 = vld [vmem:[%s3965_s24 + $0x1] ss:$0 sm:$0xff] }
0x1604   : > { %v2307_v2 = vpop.f32.mrf.mxu3 }
0x1605   : > { %v2308_v4 = vadd.f32 %v2307_v2, %v4199_v48 }
0x1607   : > { %v2310_v5 = vsel %vm1069_vm5, %v2308_v4, -inf }
0x1608   : > { %2311 = vmax.xlane.f32.xlu1 %v2310_v5  ;;  %v3625_v5 = vld [vmem:[%s4685_s18 + $0x1] ss:$0 sm:$0xff] }
0x1621   : > { %2410 = vrot.lane.b32.xlu1 %v4371_v27, %s4713_s8  ;;  %s4714_s8 = smov 48  }
0x1624   : > { %v2278_v8 = vpop.f32.mrf.mxu2 }
0x1625   : > { %v2281_v9 = vadd.f32 %v2278_v8, %v2192_v6  ;;  %v3626_v8 = vld [vmem:[%s4687_s23 + $0x1] ss:$0 sm:$0xff] }
0x162c   : > { %v2396_v11 = vpop.f32.mrf.mxu2 }
0x162d   : > { %v2397_v12 = vadd.f32 %v2396_v11, %v4199_v48 }
0x162f   : > { %v2399_v13 = vsel %vm1069_vm5, %v2397_v12, -inf }
0x1630   : > { %2400 = vmax.xlane.f32.xlu2 %v2399_v13 }
0x167b   : > { %v2312_v14 = vpop.xlane.xlu1 %2311 }
0x167c   : > { %v2313_v15 = vsub.f32 %v2308_v4, %v2312_v14 }
0x167e   : > { %v2314_v16 = vmul.f32 1.442695, %v2313_v15 }
0x1680   : > { %3690 = vpow2.f32 %v2314_v16 }
0x1686   : > { %v3691_v17 = vpop.eup %3690 }
0x1687   : > { %v2316_v18 = vsel %vm1069_vm5, %v3691_v17, 0.0 }
0x1688   : > { %2317 = vadd.xlane.f32.xlu2 %v2316_v18 }
0x1693   : > { %v2411_v19 = vpop.permute.xlu1 %2410 }
0x1694   : > { %2431 = vmatpush.msra.mxu3 %v2411_v19 }
0x16a3   : > { %v2401_v20 = vpop.xlane.xlu2 %2400 }
0x16a4   : > { %v2402_v21 = vsub.f32 %v2397_v12, %v2401_v20  ;;  %v3627_v12 = vld [vmem:[%s4688_s16 + $0x1] ss:$0 sm:$0xff] }
0x16a6   : > { %v2403_v24 = vmul.f32 1.442695, %v2402_v21 }
0x16a8   : > { %3692 = vpow2.f32 %v2403_v24 }
0x16ae   : > { %v3693_v25 = vpop.eup %3692 }
0x16af   : > { %v2405_v48 = vsel %vm1069_vm5, %v3693_v25, 0.0 }
0x16b0   : > { %2406 = vadd.xlane.f32.xlu0 %v2405_v48 }
0x16c4   : > { %2321 = vrot.lane.b32.xlu0 %v4371_v27, %s4714_s8 }
0x16fb   : > { %v2318_v30 = vpop.xlane.xlu2 %2317 }
0x1723   : > { %v2407_v28 = vpop.xlane.xlu0 %2406 }
0x1724   : > { %3694 = vrcp.f32 %v2407_v28 }
0x1725   : > { %3696 = vrcp.f32 %v2318_v30 }
0x172a   : > { %v3695_v29 = vpop.eup %3694 }
0x172b   : > { %v2409_v31 = vmul.f32 %v3695_v29, %v3693_v25  ;;  %v3697_v32 = vpop.eup %3696 }
0x172c   : > { %v2320_v35 = vmul.f32 %v3697_v32, %v3691_v17  ;;  %v3440_v32 = vld [vmem:[%s4690_s2 + $0x20] sm:$0xff] }
0x172d   : > { %3424 = vmatmul.msk.f32.vlgmr.msra.gmra.mxu3 %vm1069_vm5, %v2409_v31 }
0x1736   : > { %v2322_v36 = vpop.permute.xlu0 %2321 }
0x1737   : > { %2342 = vmatpush.msra.mxu1 %v2322_v36 }
0x1738   : > { %3420 = vmatmul.msk.f32.vlgmr.msra.gmra.mxu1 %vm1069_vm5, %v2320_v35 }
0x1739   : > { %2454 = vmatpush.msrb.mxu1 %v3408_v38 }
0x17b0   : > { %v2433_v40 = vpop.f32.mrf.mxu3 }
0x17b1   : > { %3425 = vmatmul.msk.f32.vlgmr.msrb.gmra.mxu1 %vm1069_vm5, %v2433_v40 }
0x17b5   : > { %v2344_v27 = vpop.f32.mrf.mxu1 }
0x17b6   : > { %3421 = vmatmul.msk.f32.vlgmr.msra.gmra.mxu0 %vm1069_vm5, %v2344_v27 }
0x17b7   : > { %2647 = vmatpush.msra.mxu0 %v3440_v32 }
0x182e   : > { %v2456_v42 = vpop.f32.mrf.mxu1 }
0x1833   : > { %v2367_v41 = vpop.f32.mrf.mxu0 }
0x1834   : > { %v2370_v26 = vadd.f32 %v2367_v41, %v2281_v9 }
0x1836   : > { %v2459_v43 = vadd.f32 %v2456_v42, %v2370_v26 }
0x1838   : > { %v2460_v44 = vadd.f32 %v2459_v43, %v4366_v22  ;;  %v3435_v22 = vld [vmem:[%s3985_s20 + $0x28] sm:$0xff] }
0x1839   : > { %2552 = vmatpush.msra.mxu2 %v3435_v22 }
0x183a   : > { %v2465_v45 = vsel %vm978_vm0, %v2460_v44, 0.0 }
0x183b   : > { %2466 = vadd.xlane.f32.xlu2 %v2465_v45  ;;  %2553 = vmatpush.msra.mxu2 %v3434_v54 }
0x183c   : > { %3439 = vmatmul.msk.f32.vlgmr.msra.gmra.mxu2 %vm978_vm0, %v4255_v3 }
0x18ae   : > { %v2467_v46 = vpop.xlane.xlu2 %2466 }
0x18af   : > { %v2468_v47 = vmul.f32 %v2467_v46, %v4169_v10 }
0x18b1   : > { %v2469_v49 = vsub.f32 %v2460_v44, %v2468_v47  ;;  %v3441_v44 = vld [vmem:[%s4690_s2 + $0x28] sm:$0xff] }
0x18b3   : > { %v2470_v50 = vmul.f32 %v2469_v49, %v2469_v49 }
0x18b5   : > { %v2471_v37 = vsel %vm978_vm0, %v2470_v50, 0.0 }
0x18b6   : > { %2472 = vadd.xlane.f32.xlu2 %v2471_v37 }
0x18bf   : > { %v2555_v9 = vpop.f32.mrf.mxu2 }
0x18c0   : > { %v4448_v11 = vadd.f32 %v3626_v8, %v2555_v9 }
0x18c2   : > { %3445 = vmatpush.xpose.msk.msrb.mxu3 %vm1069_vm5, %v4448_v11 }
0x18ce   : > { %2658 = vrot.lane.b32.xlu2 %v4448_v11, %s4708_s7 }
0x1929   : > { %v2473_v58 = vpop.xlane.xlu2 %2472 }
0x192a   : > { %v2474_v59 = vmul.f32 %v2473_v58, %v4169_v10 }
0x192c   : > { %v2475_v60 = vadd.f32 1e-05, %v2474_v59 }
0x192e   : > { %3698 = vrsqrt.f32 %v2475_v60  ;;  %vm2482_vm9 = vweird.f32 %v2475_v60 }
0x1931   : > { %v2659_v16 = vpop.permute.xlu2 %2658 }
0x1932   : > { %3449 = vmatpush.xpose.msk.msrb.mxu2 %vm1069_vm5, %v2659_v16 }
0x1934   : > { %v3699_v61 = vpop.eup %3698 }
0x1935   : > { %v2477_v62 = vmul.f32 %v3699_v61, %v2475_v60  ;;  %vm2483_vm8 = vweird.f32 %v3699_v61  ;;  %v3628_v60 = vld [vmem:[%s4693_s26 + $0x1] ss:$0 sm:$0xff] }
0x1936   : > { %vm2484_vm10 = vmor %vm2482_vm9, %vm2483_vm8 }
0x1937   : > { %v2478_v63 = vmul.f32 %v3699_v61, %v2477_v62 }
0x1939   : > { %v2479_v0 = vmul.f32 0.5, %v2478_v63 }
0x193b   : > { %v2480_v1 = vsub.f32 1.5, %v2479_v0 }
0x193d   : > { %v2481_v3 = vmul.f32 %v3699_v61, %v2480_v1 }
0x193f   : > { %v2485_v2 = vsel %vm2484_vm10, %v3699_v61, %v2481_v3  ;;  %v3724_v3 = vld [vmem:[%s4165_s1] ss:$0 sm:$0xff] }
0x1940   : > { %v2486_v4 = vmul.f32 %v2485_v2, %v2469_v49 }
0x1942   : > { %v2490_v7 = vmul.f32 %v3624_v34, %v2486_v4 }
0x1944   : > { %v4443_v6 = vadd.f32 %v3625_v5, %v2490_v7 }
0x1946   : > { %3433 = vmatmul.msk.f32.vlgmr.msrb.gmra.mxu0 %vm978_vm0, %v4443_v6 }
0x19c3   : > { %v2525_v13 = vpop.f32.mrf.mxu0 }
0x19c4   : > { %v2526_v14 = vadd.f32 %v3627_v12, %v2525_v13 }
0x19c6   : > { %v2565_v15 = vmul.f32 0.35355338, %v2526_v14 }
0x19c8   : > { %2656 = vrot.lane.b32.xlu0 %v2565_v15, %s4708_s7  ;;  %3446 = vmatmul.msk.f32.vlgmr.msrb.gmra.mxu3 %vm1069_vm5, %v2565_v15 }
0x1a3a   : > { %v2657_v17 = vpop.permute.xlu0 %2656 }
0x1a3b   : > { %3450 = vmatmul.msk.f32.vlgmr.msrb.gmra.mxu2 %vm1069_vm5, %v2657_v17 }
0x1a4b   : > { %v2589_v18 = vpop.f32.mrf.mxu3 }
0x1a4c   : > { %v2590_v19 = vadd.f32 %v4283_v33, %v2589_v18 }
0x1a4e   : > { %v2592_v20 = vsel %vm1069_vm5, %v2590_v19, -inf }
0x1a4f   : > { %2593 = vmax.xlane.f32.xlu1 %v2592_v20 }
0x1abe   : > { %v2681_v21 = vpop.f32.mrf.mxu2 }
0x1abf   : > { %v2682_v24 = vadd.f32 %v4283_v33, %v2681_v21  ;;  %v3443_v21 = vld [vmem:[%s4690_s2 + $0x38] sm:$0xff] }
0x1ac1   : > { %v2684_v25 = vsel %vm1069_vm5, %v2682_v24, -inf }
0x1ac2   : > { %v2594_v48 = vpop.xlane.xlu1 %2593  ;;  %2685 = vmax.xlane.f32.xlu0 %v2684_v25 }
0x1ac3   : > { %v2595_v28 = vsub.f32 %v2590_v19, %v2594_v48 }
0x1ac5   : > { %v2596_v29 = vmul.f32 1.442695, %v2595_v28 }
0x1ac7   : > { %3700 = vpow2.f32 %v2596_v29 }
0x1acd   : > { %v3701_v30 = vpop.eup %3700 }
0x1ace   : > { %v2598_v31 = vsel %vm1069_vm5, %v3701_v30, 0.0 }
0x1acf   : > { %2599 = vadd.xlane.f32.xlu2 %v2598_v31 }
0x1ad6   : > { %2603 = vrot.lane.b32.xlu0 %v4448_v11, %s4707_s3 }
0x1ade   : > { %2745 = vrot.lane.b32.xlu0 %v2565_v15, %s4711_s29 }
0x1ae6   : > { %2834 = vrot.lane.b32.xlu0 %v2565_v15, %s4710_s27 }
0x1ae7   : > { %2747 = vrot.lane.b32.xlu2 %v4448_v11, %s4711_s29  ;;  %s956_s29 = sand.u32 1, %s3847_s10  }
0x1ae8   : > { %s3359_s3 = sshll.u32 %s956_s29, 3  ;;  %s3196_s8 = scalar_lea.sflag [#allocation4], %s956_s29 }
0x1b35   : > { %v2686_v35 = vpop.xlane.xlu0 %2685 }
0x1b36   : > { %v2687_v36 = vsub.f32 %v2682_v24, %v2686_v35 }
0x1b38   : > { %v2688_v38 = vmul.f32 1.442695, %v2687_v36 }
0x1b3a   : > { %3702 = vpow2.f32 %v2688_v38 }
0x1b40   : > { %v3703_v39 = vpop.eup %3702 }
0x1b41   : > { %v2690_v40 = vsel %vm1069_vm5, %v3703_v39, 0.0 }
0x1b42   : > { %2691 = vadd.xlane.f32.xlu1 %v2690_v40  ;;  %v2600_v27 = vpop.xlane.xlu2 %2599  ;;  %v3466_v40 = vld [vmem:[%s4697_s22 + $0x38] sm:$0xff] }
0x1b43   : > { %3704 = vrcp.f32 %v2600_v27  ;;  %v3465_v27 = vld [vmem:[%s4697_s22 + $0x30] sm:$0xff] }
0x1b48   : > { %v2604_v41 = vpop.permute.xlu0 %2603 }
0x1b49   : > { %v3705_v26 = vpop.eup %3704  ;;  %2624 = vmatpush.msra.mxu1 %v2604_v41  ;;  %v3464_v41 = vld [vmem:[%s4697_s22 + $0x28] sm:$0xff] }
0x1b4a   : > { %v2602_v42 = vmul.f32 %v3705_v26, %v3701_v30  ;;  %v2748_v43 = vpop.permute.xlu2 %2747  ;;  %v3463_v26 = vld [vmem:[%s4697_s22 + $0x20] sm:$0xff] }
0x1b4b   : > { %3453 = vmatpush.xpose.msk.msrb.mxu0 %vm1069_vm5, %v2748_v43  ;;  %2739 = vmatpush.msrb.mxu1 %v3441_v44 }
0x1b4c   : > { %3447 = vmatmul.msk.f32.vlgmr.msra.gmra.mxu1 %vm1069_vm5, %v2602_v42 }
0x1b50   : > { %v2746_v37 = vpop.permute.xlu0 %2745 }
0x1b58   : > { %v2835_v23 = vpop.permute.xlu0 %2834 }
0x1b5b   : > { %2695 = vrot.lane.b32.xlu1 %v4448_v11, %s4691_s15  ;;  %s958_s15 = scalar_lea.vmem [#allocation7], %s3359_s3 }
0x1b63   : > { %2836 = vrot.lane.b32.xlu1 %v4448_v11, %s4710_s27  ;;  %s3499_s27 = sshll.u32 %s4078_s0, 3  ;;  %s3805_s0 = scalar_lea.hbm %s4055_s4, 16 }
0x1bb5   : > { %v2692_v45 = vpop.xlane.xlu1 %2691 }
0x1bb6   : > { %3706 = vrcp.f32 %v2692_v45 }
0x1bbc   : > { %v3707_v47 = vpop.eup %3706 }
0x1bbd   : > { %v2694_v49 = vmul.f32 %v3707_v47, %v3703_v39 }
0x1bc9   : > { %v2626_v46 = vpop.f32.mrf.mxu1 }
0x1bca   : > { %3448 = vmatmul.msk.f32.vlgmr.msra.gmra.mxu0 %vm1069_vm5, %v2626_v46 }
0x1bcd   : > { %v2696_v50 = vpop.permute.xlu1 %2695 }
0x1bce   : > { %2716 = vmatpush.msra.mxu3 %v2696_v50 }
0x1bcf   : > { %3451 = vmatmul.msk.f32.vlgmr.msra.gmra.mxu3 %vm1069_vm5, %v2694_v49 }
0x1bd2   : > { %3454 = vmatmul.msk.f32.vlgmr.msrb.gmra.mxu0 %vm1069_vm5, %v2746_v37  ;;  %v3629_v37 = vld [vmem:[%s4698_s5 + $0x1] ss:$0 sm:$0xff] }
0x1bd5   : > { %v2837_v51 = vpop.permute.xlu1 %2836 }
0x1bd6   : > { %3457 = vmatpush.xpose.msk.msra.mxu1 %vm1069_vm5, %v2837_v51 }
0x1c47   : > { %v2649_v53 = vpop.f32.mrf.mxu0 }
0x1c48   : > { %v2655_v61 = vadd.f32 %v3628_v60, %v2649_v53 }
0x1c4f   : > { %v2770_v22 = vpop.f32.mrf.mxu0 }
0x1c50   : > { %v2771_v54 = vadd.f32 %v4283_v33, %v2770_v22  ;;  %v3630_v22 = vld [vmem:[%s4699_s9 + $0x1] ss:$0 sm:$0xff] }
0x1c52   : > { %v2718_v55 = vpop.f32.mrf.mxu3  ;;  %v2773_v56 = vsel %vm1069_vm5, %v2771_v54, -inf }
0x1c53   : > { %3452 = vmatmul.msk.f32.vlgmr.msrb.gmra.mxu1 %vm1069_vm5, %v2718_v55  ;;  %2774 = vmax.xlane.f32.xlu1 %v2773_v56  ;;  %v3631_v56 = vld [vmem:[%s4700_s13 + $0x1] ss:$0 sm:$0xff] }
0x1c5b   : > { %3458 = vmatmul.msk.f32.vlgmr.msra.gmra.mxu1 %vm1069_vm5, %v2835_v23 }
0x1cc6   : > { %v2775_v57 = vpop.xlane.xlu1 %2774 }
0x1cc7   : > { %v2776_v58 = vsub.f32 %v2771_v54, %v2775_v57 }
0x1cc9   : > { %v2777_v59 = vmul.f32 1.442695, %v2776_v58 }
0x1ccb   : > { %3708 = vpow2.f32 %v2777_v59 }
0x1cd0   : > { %v2741_v62 = vpop.f32.mrf.mxu1 }
0x1cd1   : > { %v3709_v63 = vpop.eup %3708  ;;  %v2744_v0 = vadd.f32 %v2741_v62, %v2655_v61  ;;  %v3476_v62 = vld [vmem:[%s4702_s17 + $0x78] sm:$0xff] }
0x1cd2   : > { %v2779_v33 = vsel %vm1069_vm5, %v3709_v63, 0.0  ;;  %3056 = vmatpush.msrb.mxu1 %v3476_v62  ;;  %v3103_v62 = vld [vmem:[%s4045_s30] sm:$0xff] }
0x1cd3   : > { %2780 = vadd.xlane.f32.xlu2 %v2779_v33  ;;  %v3473_v33 = vld [vmem:[%s4702_s17 + $0x60] sm:$0xff] }
0x1cd8   : > { %v2859_v1 = vpop.f32.mrf.mxu1 }
0x1cd9   : > { %v2860_v34 = vadd.f32 %v3724_v3, %v2859_v1  ;;  %v3472_v3 = vld [vmem:[%s4702_s17 + $0x58] sm:$0xff] }
0x1cdb   : > { %v2862_v2 = vsel %vm1069_vm5, %v2860_v34, -inf }
0x1cdc   : > { %2863 = vmax.xlane.f32.xlu0 %v2862_v2  ;;  %v3471_v2 = vld [vmem:[%s4702_s17 + $0x50] sm:$0xff] }
0x1ceb   : > { %2873 = vrot.lane.b32.xlu2 %v4448_v11, %s4694_s28  ;;  %s3206_s28 = scalar_lea.hbm %s4055_s4, %s3499_s27 }
0x1cec   : > { %s3210_s7 = sshll.u32 %s3206_s28, 4  ;;  %s3211_s7 = int_to_ptr.hbm [resolvable:$true] %s3210_s7 }
0x1cf0   : > { %2784 = vrot.lane.b32.xlu0 %v4448_v11, %s4695_s11  ;;  %v3442_v11 = vld [vmem:[%s4690_s2 + $0x30] sm:$0xff]  ;;  %s3208_s11 = sshll.u32 %s958_s15, 4  ;;  %s3799_s2 = sshra.s32 %s3211_s7, 4  ;;  %s3209_s11 = int_to_ptr.vmem [resolvable:$true] %s3208_s11  ;;  %s3800_s2 = int_to_ptr.hbm [resolvable:$true] %s3799_s2 }
0x1cf1   : > { %2828 = vmatpush.msrb.mxu3 %v3442_v11  ;;  %s3801_s5 = scalar_lea.hbm %s3800_s2, 8  ;;  %p3806_p8 = scmp.lt.s32.totalorder %s3800_s2, %s4055_s4 }
0x1cf2   : > { %p3802_p9 = scmp.ne.s32.totalorder %s3800_s2, %s3801_s5  ;;  %p3807_p11 = scmp.lt.s32.totalorder %s3805_s0, %s3801_s5 }
0x1cf3   : > { %2983 = vmatpush.msra.mxu3 %v3466_v40 }
0x1cf4   : > { %p3803_p10 = pnand %p3802_p9, %p4095_p5  ;;  %p3808_p13 = por %p3807_p11, %p3806_p8 }
0x1cf5   : > { %2984 = vmatpush.msra.mxu3 %v3465_v27 }
0x1cf6   : > { %p3804_p0 = pneg %p3803_p10 }
0x1cf7   : > { %2985 = vmatpush.msra.mxu3 %v3464_v41  ;;  %v3632_v41 = vld [vmem:[%s4704_s21 + $0x1] ss:$0 sm:$0xff] }
0x1cf8   : > { %p3809_p1 = pnand %p3808_p13, %p3804_p0 }
0x1cf9   : > { %2986 = vmatpush.msra.mxu3 %v3463_v26 }
0x1d46   : > { %v2781_v4 = vpop.xlane.xlu2 %2780 }
0x1d4e   : > { %v2874_v5 = vpop.permute.xlu2 %2873 }
0x1d4f   : > { %v2864_v7 = vpop.xlane.xlu0 %2863  ;;  %2894 = vmatpush.msra.mxu0 %v2874_v5 }
0x1d50   : > { %v2865_v8 = vsub.f32 %v2860_v34, %v2864_v7  ;;  %v3470_v7 = vld [vmem:[%s4702_s17 + $0x48] sm:$0xff] }
0x1d52   : > { %v2866_v9 = vmul.f32 1.442695, %v2865_v8 }
0x1d54   : > { %3710 = vpow2.f32 %v2866_v9 }
0x1d55   : > { %3712 = vrcp.f32 %v2781_v4 }
0x1d5a   : > { %v3711_v12 = vpop.eup %3710 }
0x1d5b   : > { %v2868_v13 = vsel %vm1069_vm5, %v3711_v12, 0.0  ;;  %v3713_v14 = vpop.eup %3712 }
0x1d5c   : > { %2869 = vadd.xlane.f32.xlu1 %v2868_v13  ;;  %v2783_v15 = vmul.f32 %v3713_v14, %v3709_v63  ;;  %v3475_v63 = vld [vmem:[%s4702_s17 + $0x70] sm:$0xff] }
0x1d5d   : > { %3057 = vmatpush.msrb.mxu1 %v3475_v63 }
0x1d62   : > { %v2785_v16 = vpop.permute.xlu0 %2784 }
0x1d63   : > { %2805 = vmatpush.msra.mxu2 %v2785_v16 }
0x1d64   : > { %3455 = vmatmul.msk.f32.vlgmr.msra.gmra.mxu2 %vm1069_vm5, %v2783_v15 }
0x1d65   : > { %2917 = vmatpush.msrb.mxu2 %v3443_v21 }
0x1dcf   : > { %v2870_v17 = vpop.xlane.xlu1 %2869 }
0x1dd0   : > { %3714 = vrcp.f32 %v2870_v17 }
0x1dd6   : > { %v3715_v18 = vpop.eup %3714 }
0x1dd7   : > { %v2872_v19 = vmul.f32 %v3715_v18, %v3711_v12  ;;  %v3469_v12 = vld [vmem:[%s4702_s17 + $0x40] sm:$0xff] }
0x1dd9   : > { %3459 = vmatmul.msk.f32.vlgmr.msra.gmra.mxu0 %vm1069_vm5, %v2872_v19 }
0x1de7   : > { %v2807_v20 = vpop.f32.mrf.mxu2 }
0x1de8   : > { %3456 = vmatmul.msk.f32.vlgmr.msrb.gmra.mxu3 %vm1069_vm5, %v2807_v20 }
0x1e56   : > { %v2896_v24 = vpop.f32.mrf.mxu0 }
0x1e57   : > { %3460 = vmatmul.msk.f32.vlgmr.msrb.gmra.mxu2 %vm1069_vm5, %v2896_v24 }
0x1e6b   : > { %v2830_v25 = vpop.f32.mrf.mxu3 }
0x1e6c   : > { %v2833_v48 = vadd.f32 %v2830_v25, %v2744_v0  ;;  %v3474_v0 = vld [vmem:[%s4702_s17 + $0x68] sm:$0xff] }
0x1e6d   : > { %3058 = vmatpush.msrb.mxu1 %v3474_v0 }
0x1e6f   : > { %3059 = vmatpush.msrb.mxu1 %v3473_v33 }
0x1e71   : > { %3060 = vmatpush.msrb.mxu1 %v3472_v3 }
0x1e73   : > { %3061 = vmatpush.msrb.mxu1 %v3471_v2 }
0x1e75   : > { %3062 = vmatpush.msrb.mxu1 %v3470_v7  ;;  %v3633_v7 = vld [vmem:[%s4706_s25 + $0x1] ss:$0 sm:$0xff] }
0x1e77   : > { %3063 = vmatpush.msrb.mxu1 %v3469_v12  ;;  %v3634_v12 = vld [vmem:[%s4040_s12 + $0x1] ss:$0 sm:$0xff] }
0x1eda   : > { %v2919_v28 = vpop.f32.mrf.mxu2 }
0x1edb   : > { %v2922_v29 = vadd.f32 %v2919_v28, %v2833_v48 }
0x1edd   : > { %v2923_v30 = vadd.f32 %v2922_v29, %v4443_v6 }
0x1edf   : > { %v2928_v31 = vsel %vm978_vm0, %v2923_v30, 0.0 }
0x1ee0   : > { %2929 = vadd.xlane.f32.xlu1 %v2928_v31 }
0x1f53   : > { %v2930_v32 = vpop.xlane.xlu1 %2929 }
0x1f54   : > { %v2931_v35 = vmul.f32 %v2930_v32, %v4169_v10 }
0x1f56   : > { %v2932_v36 = vsub.f32 %v2923_v30, %v2931_v35 }
0x1f58   : > { %v2933_v38 = vmul.f32 %v2932_v36, %v2932_v36 }
0x1f5a   : > { %v2934_v39 = vsel %vm978_vm0, %v2933_v38, 0.0 }
0x1f5b   : > { %2935 = vadd.xlane.f32.xlu1 %v2934_v39 }
0x1fce   : > { %v2936_v6 = vpop.xlane.xlu1 %2935 }
0x1fcf   : > { %v2937_v42 = vmul.f32 %v2936_v6, %v4169_v10 }
0x1fd1   : > { %v2938_v43 = vadd.f32 1e-05, %v2937_v42 }
0x1fd3   : > { %3716 = vrsqrt.f32 %v2938_v43  ;;  %vm2945_vm11 = vweird.f32 %v2938_v43 }
0x1fd9   : > { %v3717_v44 = vpop.eup %3716 }
0x1fda   : > { %v2940_v45 = vmul.f32 %v3717_v44, %v2938_v43  ;;  %vm2946_vm5 = vweird.f32 %v3717_v44 }
0x1fdb   : > { %vm2947_vm12 = vmor %vm2945_vm11, %vm2946_vm5 }
0x1fdc   : > { %v2941_v46 = vmul.f32 %v3717_v44, %v2940_v45  ;;  %v3116_v45 = vld [vmem:[%s4045_s30 + $0x68] sm:$0xff] }
0x1fde   : > { %v2942_v47 = vmul.f32 0.5, %v2941_v46  ;;  %v3115_v46 = vld [vmem:[%s4045_s30 + $0x60] sm:$0xff] }
0x1fe0   : > { %v2943_v49 = vsub.f32 1.5, %v2942_v47  ;;  %v3114_v47 = vld [vmem:[%s4045_s30 + $0x58] sm:$0xff] }
0x1fe2   : > { %v2944_v50 = vmul.f32 %v3717_v44, %v2943_v49  ;;  %v3113_v49 = vld [vmem:[%s4045_s30 + $0x50] sm:$0xff] }
0x1fe4   : > { %v2948_v51 = vsel %vm2947_vm12, %v3717_v44, %v2944_v50  ;;  %v3117_v44 = vld [vmem:[%s4045_s30 + $0x70] sm:$0xff]  ;;  %v3112_v50 = vld [vmem:[%s4045_s30 + $0x48] sm:$0xff] }
0x1fe5   : > { %v2949_v53 = vmul.f32 %v2948_v51, %v2932_v36 }
0x1fe7   : > { %v2953_v54 = vmul.f32 %v3629_v37, %v2949_v53  ;;  %v3111_v53 = vld [vmem:[%s4045_s30 + $0x40] sm:$0xff] }
0x1fe9   : > { %v4513_v55 = vadd.f32 %v3630_v22, %v2953_v54 }
0x1feb   : > { %3468 = vmatmul.msk.f32.vlgmr.msra.gmra.mxu3 %vm978_vm0, %v4513_v55 }
0x206e   : > { %v2988_v23 = vpop.f32.mrf.mxu3 }
0x206f   : > { %v2989_v57 = vadd.f32 %v3631_v56, %v2988_v23  ;;  %v3109_v23 = vld [vmem:[%s4045_s30 + $0x30] sm:$0xff] }
0x2071   : > { %v2992_v58 = vmul.f32 0.70710677, %v2989_v57  ;;  %v2991_v39 = vmul.f32 0.5, %v2989_v57  ;;  %v3108_v57 = vld [vmem:[%s4045_s30 + $0x28] sm:$0xff] }
0x2073   : > { %v2995_v59 = vand.u32 2147483647, %v2992_v58  ;;  %vm2993_vm2 = vcmp.ge.f32.partialorder %v2992_v58, 0.0  ;;  %v3107_v58 = vld [vmem:[%s4045_s30 + $0x20] sm:$0xff] }
0x2074   : > { %v2994_v36 = vsel %vm2993_vm2, 1.0, %v3901_v52  ;;  %v3118_v52 = vld [vmem:[%s4045_s30 + $0x78] sm:$0xff] }
0x2075   : > { %v2996_v60 = vmul.f32 0.3275911, %v2995_v59  ;;  %v3022_v11 = vsub.f32 0.0, %v2995_v59  ;;  %3481 = vmatpush.xpose.msk.msrb.mxu0 %vm978_vm0, %v3118_v52 }
0x2077   : > { %v2997_v61 = vadd.f32 1.0, %v2996_v60  ;;  %v3023_v19 = vmul.f32 %v3022_v11, %v2995_v59  ;;  %v3106_v59 = vld [vmem:[%s4045_s30 + $0x18] sm:$0xff]  ;;  %v3105_v60 = vld [vmem:[%s4045_s30 + $0x10] sm:$0xff] }
0x2079   : > { %3718 = vrcp.f32 %v2997_v61  ;;  %v3009_v5 = vand.u32 2147483648, %v2997_v61  ;;  %v3007_v9 = vand.u32 2147483647, %v2997_v61  ;;  %vm3003_vm14 = vweird.f32 %v2997_v61  ;;  %3482 = vmatpush.xpose.msk.msrb.mxu0 %vm978_vm0, %v3117_v44 }
0x207a   : > { %v3024_v24 = vmul.f32 1.442695, %v3023_v19 }
0x207b   : > { %v3010_v14 = vor.u32 1.1754944e-38, %v3009_v5  ;;  %vm3008_vm1 = vcmp.eq.f32.partialorder %v3007_v9, 8.507059e+37 }
0x207c   : > { %3720 = vpow2.f32 %v3024_v24 }
0x207d   : > { %3483 = vmatpush.xpose.msk.msrb.mxu0 %vm978_vm0, %v3116_v45 }
0x207f   : > { %v3719_v1 = vpop.eup %3718 }
0x2080   : > { %v2999_v34 = vmul.f32 %v3719_v1, %v2997_v61  ;;  %vm3004_vm13 = vweird.f32 %v3719_v1  ;;  %v3104_v61 = vld [vmem:[%s4045_s30 + $0x8] sm:$0xff] }
0x2081   : > { %vm3005_vm15 = vmor %vm3003_vm14, %vm3004_vm13  ;;  %3484 = vmatpush.xpose.msk.msrb.mxu0 %vm978_vm0, %v3115_v46 }
0x2082   : > { %v3000_v4 = vsub.f32 1.0, %v2999_v34  ;;  %v3721_v31 = vpop.eup %3720 }
0x2084   : > { %v3001_v8 = vmul.f32 %v3719_v1, %v3000_v4 }
0x2085   : > { %3485 = vmatpush.xpose.msk.msrb.mxu0 %vm978_vm0, %v3114_v47 }
0x2086   : > { %v3002_v13 = vadd.f32 %v3719_v1, %v3001_v8 }
0x2088   : > { %v3006_v15 = vsel %vm3005_vm15, %v3719_v1, %v3002_v13 }
0x2089   : > { %v3011_v16 = vsel %vm3008_vm1, %v3010_v14, %v3006_v15  ;;  %3486 = vmatpush.xpose.msk.msrb.mxu0 %vm978_vm0, %v3113_v49  ;;  %v3635_v14 = vld [vmem:[#allocation5] ss:$0 sm:$0xff] }
0x208a   : > { %v3013_v17 = vmul.f32 1.0614054, %v3011_v16 }
0x208c   : > { %v3014_v18 = vadd.f32 -1.4531521, %v3013_v17 }
0x208d   : > { %3487 = vmatpush.xpose.msk.msrb.mxu0 %vm978_vm0, %v3112_v50 }
0x208e   : > { %v3015_v20 = vmul.f32 %v3014_v18, %v3011_v16 }
0x2090   : > { %v3016_v21 = vadd.f32 1.4214138, %v3015_v20 }
0x2091   : > { %3488 = vmatpush.xpose.msk.msrb.mxu0 %vm978_vm0, %v3111_v53 }
0x2092   : > { %v3017_v25 = vmul.f32 %v3016_v21, %v3011_v16 }
0x2094   : > { %v3018_v48 = vadd.f32 -0.28449672, %v3017_v25 }
0x2096   : > { %v3019_v28 = vmul.f32 %v3018_v48, %v3011_v16 }
0x2098   : > { %v3020_v29 = vadd.f32 0.2548296, %v3019_v28 }
0x209a   : > { %v3021_v30 = vmul.f32 %v3020_v29, %v3011_v16 }
0x209c   : > { %v3026_v32 = vmul.f32 %v3721_v31, %v3021_v30 }
0x209e   : > { %v3027_v35 = vsub.f32 1.0, %v3026_v32 }
0x20a0   : > { %v3028_v38 = vmul.f32 %v3027_v35, %v2994_v36 }
0x20a2   : > { %v3029_v40 = vadd.f32 1.0, %v3028_v38 }
0x20a4   : > { %v3030_v27 = vmul.f32 %v3029_v40, %v2991_v39 }
0x20a6   : > { %3478 = vmatmul.msk.f32.vlgmr.msrb.gmra.mxu1 %vm2003_vm3, %v3030_v27 }
0x2123   : > { %v3065_v26 = vpop.f32.mrf.mxu1 }
0x2124   : > { %v3066_v6 = vadd.f32 %v3632_v41, %v3065_v26 }
0x2126   : > { %v3068_v42 = vadd.f32 %v3066_v6, %v4513_v55  ;;  %v3110_v55 = vld [vmem:[%s4045_s30 + $0x38] sm:$0xff] }
0x2127   : > { %3489 = vmatpush.xpose.msk.msrb.mxu0 %vm978_vm0, %v3110_v55 }
0x2128   : > { %v3073_v43 = vsel %vm978_vm0, %v3068_v42, 0.0 }
0x2129   : > { %3074 = vadd.xlane.f32.xlu0 %v3073_v43 }
0x212b   : > { %3490 = vmatpush.xpose.msk.msrb.mxu0 %vm978_vm0, %v3109_v23 }
0x212f   : > { %3491 = vmatpush.xpose.msk.msrb.mxu0 %vm978_vm0, %v3108_v57 }
0x2133   : > { %3492 = vmatpush.xpose.msk.msrb.mxu0 %vm978_vm0, %v3107_v58 }
0x2137   : > { %3493 = vmatpush.xpose.msk.msrb.mxu0 %vm978_vm0, %v3106_v59 }
0x213b   : > { %3494 = vmatpush.xpose.msk.msrb.mxu0 %vm978_vm0, %v3105_v60 }
0x213f   : > { %3495 = vmatpush.xpose.msk.msrb.mxu0 %vm978_vm0, %v3104_v61 }
0x2143   : > { %3496 = vmatpush.xpose.msk.msrb.mxu0 %vm978_vm0, %v3103_v62 }
0x219c   : > { %v3075_v37 = vpop.xlane.xlu0 %3074 }
0x219d   : > { %v3076_v51 = vmul.f32 %v3075_v37, %v4169_v10 }
0x219f   : > { %v3077_v22 = vsub.f32 %v3068_v42, %v3076_v51 }
0x21a1   : > { %v3078_v54 = vmul.f32 %v3077_v22, %v3077_v22 }
0x21a3   : > { %v3079_v56 = vsel %vm978_vm0, %v3078_v54, 0.0 }
0x21a4   : > { %3080 = vadd.xlane.f32.xlu1 %v3079_v56 }
0x2217   : > { %v3081_v63 = vpop.xlane.xlu1 %3080 }
0x2218   : > { %v3082_v0 = vmul.f32 %v3081_v63, %v4169_v10 }
0x221a   : > { %v3083_v33 = vadd.f32 1e-05, %v3082_v0 }
0x221c   : > { %3722 = vrsqrt.f32 %v3083_v33  ;;  %vm3090_vm4 = vweird.f32 %v3083_v33 }
0x2222   : > { %v3723_v1 = vpop.eup %3722 }
0x2223   : > { %v3085_v3 = vmul.f32 %v3723_v1, %v3083_v33  ;;  %vm3091_vm3 = vweird.f32 %v3723_v1 }
0x2224   : > { %vm3092_vm6 = vmor %vm3090_vm4, %vm3091_vm3 }
0x2225   : > { %v3086_v34 = vmul.f32 %v3723_v1, %v3085_v3 }
0x2227   : > { %v3087_v2 = vmul.f32 0.5, %v3086_v34 }
0x2229   : > { %v3088_v4 = vsub.f32 1.5, %v3087_v2 }
0x222b   : > { %v3089_v5 = vmul.f32 %v3723_v1, %v3088_v4 }
0x222d   : > { %v3093_v8 = vsel %vm3092_vm6, %v3723_v1, %v3089_v5 }
0x222e   : > { %v3094_v9 = vmul.f32 %v3093_v8, %v3077_v22 }
0x2230   : > { %v3098_v13 = vmul.f32 %v3633_v7, %v3094_v9 }
0x2232   : > { %v3102_v10 = vadd.f32 %v3634_v12, %v3098_v13 }
0x2234   : > { %3497 = vmatmul.msk.f32.vlgmr.msrb.gmra.mxu0 %vm978_vm0, %v3102_v10 }
0x22b1   : > { %v3191_v15 = vpop.f32.mrf.mxu0 }
0x22b2   : > { %v3192_v16 = vadd.f32 %v3635_v14, %v3191_v15 }
0x22b4   : > { %3194 = vst [vmem:[%s958_s15] sm:$0xff] %v3192_v16 }
0x22b5   : > { %3812 = shalt.err (!%p3809_p1)
}
0x22b6   : > { %3510 = dma.vmem_to_hbm [thread:$0]  (%p4095_p5), %s3209_s11, 128, %s3211_s7, %s3196_s8  }
0x22b7 PF: > { %s4716_s3 = sld [smem:[#allocation35_spill]] }
0x22b8   : > { %s4717_s27 = sld [smem:[#allocation33_spill]] }
0x22bd   : > { %p3527_p2 = scmp.ge.s32.totalorder %s4716_s3, 2 }
0x22be   : > { %s3222_s28 = sand.u32 1, %s4717_s27  }
0x22bf   : > { %p3520_p3 = pnand %p3527_p2, %p4099_p6  ;;  %s3223_s15 = scalar_lea.sflag [#allocation4], %s3222_s28 }
0x22c1   : > { %p3521_p4 = pneg %p3520_p3 }
0x22c3   : > { %3838 = dma.done.wait (%p3521_p4), %s3223_s15, 128  }
0x22c4   : > { %3840 = vsyncadd (%p3521_p4), %s3223_s15, 4294967168  ;;  %s4719_s15 = sld [smem:[#allocation36_spill]]  ;;  %s4722_s7 = smov %s3847_s10 }
0x22c5   : > { %s4720_s5 = sld [smem:[#allocation34_spill]] }
0x22c6   : > { %s4721_s11 = sld [smem:[#allocation37_spill]] }
0x22ca   : > { %p71_p7 = scmp.ge.s32.totalorder %s4719_s15, 4  }
0x22cb   : > { %s4723_s10 = smov %s4720_s5 }
0x22cc   :  { %73 = sbr.rel (!%p71_p7) target bundleno = 62 (0x3e), region = 238 }
0x22d1   :  { %3229 = vsyncpa [#allocation3], 1 }
0x22d2   :  { %3231 = vsyncpa [#allocation3 + $0x1], 1 }
0x22d3   :  { %3232 = vsyncpa [#allocation6], 1 }
0x22d4   :  { %3233 = vsyncpa [#allocation4], 1 }
0x22d5   :  { %3235 = vsyncpa [#allocation4 + $0x1], 1 }

</bundles_post_ra>
